<compile_context>
chip_gen: v7x
topology: tpu7x:2x2x1
jax: 0.10.0
libtpu: 0.0.40
codegen_flags: <defaults>
</compile_context>

<pallas_src>
import functools

import jax
import jax.numpy as jnp
from jax import lax
from jax.experimental import pallas as pl
from jax.experimental.pallas import tpu as pltpu


# ----------------------------------------------------------------------------
# helpers
# ----------------------------------------------------------------------------
def _out_size(size, k, stride, pad, dil):
    return (size + 2 * pad - dil * (k - 1) - 1) // stride + 1


def _pick_p_tile(P, max_tp=2048):
    """Largest divisor of P that is <= max_tp and a multiple of 16 (bf16
    sublane packing).  Awkward P falls back to a single full-P block, which is
    always a legal block shape (block dim == array dim)."""
    for tp in (2048, 1024, 512, 256, 128, 64, 32, 16):
        if tp <= max_tp and P % tp == 0:
            return tp
    return P


# ----------------------------------------------------------------------------
# Pallas kernel: fused (deform-)conv matmul + GroupNorm + ReLU
# ----------------------------------------------------------------------------
def deform_gn_relu_kernel(p_ref, w_ref, gm_ref, gmT_ref, gamma_ref, beta_ref,
                          o_ref, prenorm_ref, sum_ref, *, eps, tp, n_pt):
    """One (batch, P-tile) grid step.

    p_ref       : (1, TP, K)    bf16 sampled patches (K = Cin*k*k, unpadded)
    w_ref       : (K, Cout)     bf16 flattened conv weight (unpadded)
    gm_ref      : (Cout, G)     one-hot channel->group matrix, pre-scaled by 1/count
    gmT_ref     : (G, Cout)     0/1 group->channel broadcast matrix
    gamma/beta  : (1, Cout)     GroupNorm affine
    o_ref       : (1, P, Cout)  bf16 output block, VMEM-resident across the P axis
    prenorm_ref : (P, Cout)     f32 scratch holding the pre-norm conv output
    sum_ref     : (1, Cout)     f32 running per-channel sums (scratch)
    """
    p = pl.program_id(1)

    @pl.when(p == 0)
    def _():
        sum_ref[...] = jnp.zeros_like(sum_ref)

    # bf16 x bf16 -> f32 accumulate on the MXU (K=72 is padded inside vregs by
    # Mosaic, never in HBM).
    y = jnp.dot(p_ref[0], w_ref[...], preferred_element_type=jnp.float32)
    sum_ref[...] += jnp.sum(y, axis=0, keepdims=True)

    start = pl.multiple_of(p * tp, tp)
    prenorm_ref[pl.ds(start, tp), :] = y          # stash pre-norm conv output (f32)

    @pl.when(p == n_pt - 1)
    def _():
        # group mean per channel from the running sums (1/count folded into gm_ref)
        mean_c = jnp.dot(
            jnp.dot(sum_ref[...], gm_ref[...], preferred_element_type=jnp.float32),
            gmT_ref[...], preferred_element_type=jnp.float32)      # (1, Cout)

        # two-pass centered variance, chunked over TP sub-tiles (no full (P, C)
        # temporaries, keeps the load/store units streaming).
        def ss_body(i, ss):
            s = pl.multiple_of(i * tp, tp)
            yc = prenorm_ref[pl.ds(s, tp), :] - mean_c
            return ss + jnp.sum(yc * yc, axis=0, keepdims=True)

        ss_c = lax.fori_loop(0, n_pt, ss_body,
                             jnp.zeros(sum_ref.shape, jnp.float32))
        var_c = jnp.dot(
            jnp.dot(ss_c, gm_ref[...], preferred_element_type=jnp.float32),
            gmT_ref[...], preferred_element_type=jnp.float32)      # (1, Cout)

        inv = lax.rsqrt(var_c + eps)                               # EUP
        scale = inv * gamma_ref[...]
        shift = beta_ref[...] - mean_c * scale

        # normalize + ReLU chunk-by-chunk into the bf16 output block
        # TODO(synk): pack two pixels' 64 channels into one 128-wide lane-dense
        # row before the store if the masked 64-wide stores show up in profiles.
        def norm_body(i, carry):
            s = pl.multiple_of(i * tp, tp)
            yb = prenorm_ref[pl.ds(s, tp), :]
            o_ref[0, pl.ds(s, tp), :] = jnp.maximum(
                yb * scale + shift, 0.0).astype(o_ref.dtype)
            return carry

        lax.fori_loop(0, n_pt, norm_body, 0)


def deform_conv_gn_relu_pallas(patches, w_flat, gamma, beta, *,
                               cout, num_groups, eps, max_tp=2048):
    """patches: (N, P, K) bf16 unpadded; w_flat: (K, Cout) bf16 unpadded."""
    N, P, K = patches.shape
    assert w_flat.shape == (K, cout)
    G = num_groups
    Cg = cout // G

    # one-hot channel->group matrix; 1/count folded in so there are no divides
    # in the kernel.
    ch = jnp.arange(cout)
    gm = (ch[:, None] // Cg == jnp.arange(G)[None, :]).astype(jnp.float32)
    gm_scaled = gm / float(P * Cg)                                 # (Cout, G)
    gmT = gm.T                                                     # (G, Cout)

    gamma_p = gamma.reshape(1, cout).astype(jnp.float32)
    beta_p = beta.reshape(1, cout).astype(jnp.float32)

    TP = _pick_p_tile(P, max_tp=max_tp)
    n_pt = P // TP
    kern = functools.partial(deform_gn_relu_kernel, eps=eps, tp=TP, n_pt=n_pt)

    # VMEM budget: account for physical lane padding (<=128-wide dims occupy a
    # full 128-lane tile in VMEM).  Resident output + pre-norm scratch are
    # single-buffered; only the patch tile is double-buffered.
    LANE = 128
    est = (2 * TP * LANE * 2        # double-buffered bf16 patch tile
           + P * LANE * 2           # resident bf16 output block
           + P * LANE * 4           # f32 pre-norm scratch
           + 8 * LANE * LANE        # weight + group mats + gamma/beta + sums
           + (2 << 20))             # headroom for compiler scratch / semaphores
    VMEM_CAP = 48 * 2**20           # stay well under v7x's 64 MiB per TC
    if est > VMEM_CAP:
        # TODO(synk): switch to streaming GroupNorm (per-tile sum/sum-sq, second
        # normalize pass over P tiles) so huge Ho*Wo stays resolution-independent.
        raise ValueError(f"P={P} too large for the resident GroupNorm buffer")
    vmem_limit = int(min(max(est, 16 * 2**20), VMEM_CAP))

    # TODO(synk): on v7x (2 TCs) add a parallel split of the P axis with partial
    # group statistics combined via CMEM so small-batch inference uses both cores.
    return pl.pallas_call(
        kern,
        out_shape=jax.ShapeDtypeStruct((N, P, cout), jnp.bfloat16),
        grid=(N, n_pt),
        in_specs=[
            pl.BlockSpec((1, TP, K), lambda n, p: (n, p, 0)),
            pl.BlockSpec((K, cout), lambda n, p: (0, 0)),
            pl.BlockSpec((cout, G), lambda n, p: (0, 0)),
            pl.BlockSpec((G, cout), lambda n, p: (0, 0)),
            pl.BlockSpec((1, cout), lambda n, p: (0, 0)),
            pl.BlockSpec((1, cout), lambda n, p: (0, 0)),
        ],
        out_specs=pl.BlockSpec((1, P, cout), lambda n, p: (n, 0, 0)),
        scratch_shapes=[pltpu.VMEM((P, cout), jnp.float32),
                        pltpu.VMEM((1, cout), jnp.float32)],
        compiler_params=pltpu.CompilerParams(
            dimension_semantics=("parallel", "arbitrary"),
            vmem_limit_bytes=vmem_limit),
    )(patches, w_flat, gm_scaled, gmT, gamma_p, beta_p)


# ----------------------------------------------------------------------------
# JAX glue: deformable bilinear sampling (data-dependent gather stays in JAX)
# ----------------------------------------------------------------------------
def deform_im2col(x, offset, k, stride, pad, dil):
    """Deformable bilinear sampling (torchvision deform_conv2d semantics).

    x:      [N, Cin, H, W]
    offset: [N, Ho*Wo, 2*k*k]  interleaved (dy_0, dx_0, dy_1, dx_1, ...)
    -> bf16 patches [N, Ho*Wo, Cin*k*k], last axis ordered (c, kh, kw),
       materialized in HBM once, already in its final dtype/shape.
    """
    # TODO(synk): move this gather into the Pallas kernel via memory_space=pl.ANY
    # + manual make_async_copy row gathers driven by scalar-prefetched indices.
    N, C, H, W = x.shape
    Ho = _out_size(H, k, stride, pad, dil)
    Wo = _out_size(W, k, stride, pad, dil)
    K2 = k * k

    off = offset.reshape(N, Ho, Wo, K2, 2)
    dy = off[..., 0].transpose(0, 3, 1, 2)                   # [N, K2, Ho, Wo]
    dx = off[..., 1].transpose(0, 3, 1, 2)

    base_kh = jnp.repeat(jnp.arange(k), k).astype(jnp.float32)   # tap = kh*k + kw
    base_kw = jnp.tile(jnp.arange(k), k).astype(jnp.float32)
    h_out = jnp.arange(Ho, dtype=jnp.float32)
    w_out = jnp.arange(Wo, dtype=jnp.float32)
    py = (h_out[None, :, None] * stride - pad + base_kh[:, None, None] * dil) + dy
    px = (w_out[None, None, :] * stride - pad + base_kw[:, None, None] * dil) + dx

    y0 = jnp.floor(py)
    x0 = jnp.floor(px)
    ly, lx = py - y0, px - x0
    hy, hx = 1.0 - ly, 1.0 - lx

    n_idx = jnp.arange(N)[:, None, None, None]

    def gather(yi, xi):
        valid = (yi >= 0) & (yi <= H - 1) & (xi >= 0) & (xi <= W - 1)
        yc = jnp.clip(yi, 0, H - 1).astype(jnp.int32)
        xc = jnp.clip(xi, 0, W - 1).astype(jnp.int32)
        g = x[n_idx, :, yc, xc]                              # [N, K2, Ho, Wo, C]
        return jnp.where(valid[..., None], g, 0.0)

    val = (gather(y0, x0) * (hy * hx)[..., None]
           + gather(y0, x0 + 1) * (hy * lx)[..., None]
           + gather(y0 + 1, x0) * (ly * hx)[..., None]
           + gather(y0 + 1, x0 + 1) * (ly * lx)[..., None])
    # Cast to bf16 BEFORE the final transpose/reshape so the patch array is
    # written to HBM exactly once, in bf16, unpadded.
    val = val.astype(jnp.bfloat16)
    # [N, K2, Ho, Wo, C] -> [N, Ho*Wo, C*K2]
    return val.transpose(0, 2, 3, 4, 1).reshape(N, Ho * Wo, C * K2)


# ----------------------------------------------------------------------------
# Full ConvModule forward
# ----------------------------------------------------------------------------
def conv_module_forward(x, params, *, k, stride, pad, dil, num_groups, eps=1e-5,
                        max_tp=2048):
    N, Cin, H, W = x.shape
    Cout = params["w_conv"].shape[0]
    assert Cout % num_groups == 0
    Ho = _out_size(H, k, stride, pad, dil)
    Wo = _out_size(W, k, stride, pad, dil)

    # offset = self.offset(x): tiny conv handled natively by XLA (a Pallas matmul
    # here only adds an HBM round-trip + lane-sparse 18-wide stores).
    # NOTE: matching the PyTorch spec, the offset conv uses dilation=1.
    offset = lax.conv_general_dilated(
        x, params["w_off"], (stride, stride), [(pad, pad), (pad, pad)],
        dimension_numbers=("NCHW", "OIHW", "NCHW"))
    offset = offset + params["b_off"][None, :, None, None]
    assert offset.shape[2] == Ho and offset.shape[3] == Wo, "offset/deform size mismatch"
    offset = offset.transpose(0, 2, 3, 1).reshape(N, Ho * Wo, 2 * k * k)

    # deformable sampling (JAX gather) -> unpadded bf16 patches
    d_patches = deform_im2col(x, offset, k, stride, pad, dil)   # (N, P, Cin*k*k) bf16

    K = Cin * k * k
    w_flat = params["w_conv"].reshape(Cout, K).T.astype(jnp.bfloat16)   # (K, Cout)

    # fused deform-conv matmul + GroupNorm + ReLU (Pallas); bf16, unpadded output
    y = deform_conv_gn_relu_pallas(d_patches, w_flat,
                                   params["gamma"], params["beta"],
                                   cout=Cout, num_groups=num_groups, eps=eps,
                                   max_tp=max_tp)
    # TODO(synk): keep NHWC/bf16 for downstream consumers to drop this pass;
    # NCHW f32 kept to match the PyTorch module interface (transpose + upcast
    # fuse into a single copy on the now-unpadded bf16 data).
    return y.reshape(N, Ho, Wo, Cout).transpose(0, 3, 1, 2).astype(jnp.float32)


def reference_forward(x, params, *, k, stride, pad, dil, num_groups, eps=1e-5,
                      cast_bf16=False):
    """Pure-JAX reference: offsets are zero at init, so deform conv == conv."""
    w = params["w_conv"]
    if cast_bf16:   # mimic the kernel's bf16 matmul inputs (f32 accumulate)
        x = x.astype(jnp.bfloat16).astype(jnp.float32)
        w = w.astype(jnp.bfloat16).astype(jnp.float32)
    y = lax.conv_general_dilated(
        x, w, (stride, stride), [(pad, pad), (pad, pad)],
        rhs_dilation=(dil, dil),
        dimension_numbers=("NCHW", "OIHW", "NCHW"),
        precision=lax.Precision.HIGHEST)
    N, C, Hh, Ww = y.shape
    yg = y.reshape(N, num_groups, C // num_groups, Hh, Ww)
    mean = yg.mean(axis=(2, 3, 4), keepdims=True)
    var = yg.var(axis=(2, 3, 4), keepdims=True)
    yn = ((yg - mean) / jnp.sqrt(var + eps)).reshape(N, C, Hh, Ww)
    yn = yn * params["gamma"][None, :, None, None] + params["beta"][None, :, None, None]
    return jnp.maximum(yn, 0.0)


if __name__ == "__main__":
    # Small config consistent with the module (GroupNorm(32) => Cout % 32 == 0).
    N, Cin, H, W = 2, 8, 32, 32
    Cout, k, stride, pad, dil = 64, 3, 1, 1, 1
    num_groups = 32

    key = jax.random.PRNGKey(0)
    k_w, k_x = jax.random.split(key)

    # Deterministic parameter init mirroring the module's __init__:
    fan_out = Cout * k * k
    params = {
        "w_conv": jax.random.normal(k_w, (Cout, Cin, k, k), jnp.float32)
                  * jnp.sqrt(2.0 / fan_out),                      # kaiming(fan_out, relu)
        "w_off": jnp.zeros((2 * k * k, Cin, k, k), jnp.float32),  # constant_(0)
        "b_off": jnp.zeros((2 * k * k,), jnp.float32),            # constant_(0)
        "gamma": jnp.ones((Cout,), jnp.float32),                  # GN weight = 1
        "beta": jnp.zeros((Cout,), jnp.float32),                  # GN bias = 0
    }

    x = jax.random.normal(k_x, (N, Cin, H, W), jnp.float32)

    fwd = jax.jit(functools.partial(conv_module_forward, k=k, stride=stride,
                                    pad=pad, dil=dil, num_groups=num_groups))
    out = jax.block_until_ready(fwd(x, params))

    # Also exercise the multi-P-tile accumulation path with a forced small tile.
    fwd_mt = jax.jit(functools.partial(conv_module_forward, k=k, stride=stride,
                                       pad=pad, dil=dil, num_groups=num_groups,
                                       max_tp=128))
    out_mt = jax.block_until_ready(fwd_mt(x, params))

    ref_f32 = reference_forward(x, params, k=k, stride=stride, pad=pad, dil=dil,
                                num_groups=num_groups, cast_bf16=False)
    ref_bf16 = reference_forward(x, params, k=k, stride=stride, pad=pad, dil=dil,
                                 num_groups=num_groups, cast_bf16=True)
    ref_bf16_q = ref_bf16.astype(jnp.bfloat16).astype(jnp.float32)  # match bf16 output

    err_vs_bf16 = float(jnp.max(jnp.abs(out - ref_bf16_q)))   # kernel-math check
    err_vs_f32 = float(jnp.max(jnp.abs(out - ref_f32)))       # end-to-end accuracy
    err_tiles = float(jnp.max(jnp.abs(out - out_mt)))         # tiling-invariance

    assert out.shape == (N, Cout, H, W), out.shape
    assert err_vs_bf16 < 2e-2, f"kernel-math error too large: {err_vs_bf16}"
    assert err_vs_f32 < 7e-2, f"bf16-path error too large: {err_vs_f32}"
    assert err_tiles < 2e-2, f"tile-count dependence too large: {err_tiles}"

    print("KERNEL_OK")
</pallas_src>

<mosaic_0001>
module attributes {stable_mosaic.version = 11 : i64} {
  func.func @deform_gn_relu_kernel(%arg0: i32, %arg1: i32, %arg2: memref<1x1024x72xbf16, #tpu.memory_space<vmem>>, %arg3: memref<72x64xbf16, #tpu.memory_space<vmem>>, %arg4: memref<64x32xf32, #tpu.memory_space<vmem>>, %arg5: memref<32x64xf32, #tpu.memory_space<vmem>>, %arg6: memref<1x64xf32, #tpu.memory_space<vmem>>, %arg7: memref<1x64xf32, #tpu.memory_space<vmem>>, %arg8: memref<1x1024x64xbf16, #tpu.memory_space<vmem>>, %arg9: memref<1024x64xf32, #tpu.memory_space<vmem>>, %arg10: memref<1x64xf32, #tpu.memory_space<vmem>>) attributes {dimension_semantics = [#tpu.dimension_semantics<parallel>, #tpu.dimension_semantics<arbitrary>], iteration_bounds = array<i64: 2, 1>, scalar_prefetch = 0 : i64, scratch_operands = 2 : i64, tpu.core_type = #tpu.core_type<tc>, window_params = [{transform_indices = @transform_0, window_bounds = array<i64: 1, 1024, 72>}, {pipeline_mode = #tpu.pipeline_mode<synchronous>, transform_indices = @transform_1, window_bounds = array<i64: 72, 64>}, {pipeline_mode = #tpu.pipeline_mode<synchronous>, transform_indices = @transform_2, window_bounds = array<i64: 64, 32>}, {pipeline_mode = #tpu.pipeline_mode<synchronous>, transform_indices = @transform_3, window_bounds = array<i64: 32, 64>}, {pipeline_mode = #tpu.pipeline_mode<synchronous>, transform_indices = @transform_4, window_bounds = array<i64: 1, 64>}, {pipeline_mode = #tpu.pipeline_mode<synchronous>, transform_indices = @transform_5, window_bounds = array<i64: 1, 64>}, {transform_indices = @transform_6, window_bounds = array<i64: 1, 1024, 64>}]} {
    %c0_i32 = arith.constant 0 : i32
    %0 = arith.cmpi eq, %arg1, %c0_i32 : i32
    %1 = arith.extui %0 : i1 to i32
    %c0_i32_0 = arith.constant 0 : i32
    %2 = arith.cmpi ne, %1, %c0_i32_0 : i32
    scf.if %2 {
      %cst_13 = arith.constant 0.000000e+00 : f32
      %19 = vector.broadcast %cst_13 : f32 to vector<1x64xf32>
      %c0_14 = arith.constant 0 : index
      %c0_15 = arith.constant 0 : index
      %20 = vector.load %arg10[%c0_14, %c0_15] : memref<1x64xf32, #tpu.memory_space<vmem>>, vector<1x64xf32>
      tpu.vector_store %arg10[%c0_14, %c0_15], %19 {strides = array<i32>} : memref<1x64xf32, #tpu.memory_space<vmem>>, vector<1x64xf32>,
    } else {
    }
    %c0 = arith.constant 0 : index
    %c0_1 = arith.constant 0 : index
    %c0_2 = arith.constant 0 : index
    %3 = vector.load %arg2[%c0, %c0_1, %c0_2] : memref<1x1024x72xbf16, #tpu.memory_space<vmem>>, vector<1x1024x72xbf16>
    %4 = vector.shape_cast %3 : vector<1x1024x72xbf16> to vector<1024x72xbf16>
    %c0_3 = arith.constant 0 : index
    %c0_4 = arith.constant 0 : index
    %5 = vector.load %arg3[%c0_3, %c0_4] : memref<72x64xbf16, #tpu.memory_space<vmem>>, vector<72x64xbf16>
    %cst = arith.constant dense<0.000000e+00> : vector<1024x64xf32>
    %6 = tpu.matmul %4, %5, %cst {dimension_numbers = #tpu.dot_dimension_numbers<[1], [0], [0], [1], [0, 0, 1, 1], [], []>} : vector<1024x72xbf16>, vector<72x64xbf16>, vector<1024x64xf32> -> vector<1024x64xf32>
    %c0_5 = arith.constant 0 : index
    %c0_6 = arith.constant 0 : index
    %7 = vector.load %arg10[%c0_5, %c0_6] : memref<1x64xf32, #tpu.memory_space<vmem>>, vector<1x64xf32>
    %cst_7 = arith.constant dense<0.000000e+00> : vector<64xf32>
    %8 = vector.multi_reduction <add>, %6, %cst_7 [0] : vector<1024x64xf32> to vector<64xf32>
    %9 = vector.shape_cast %8 : vector<64xf32> to vector<1x64xf32>
    %10 = arith.addf %7, %9 : vector<1x64xf32>
    %c0_8 = arith.constant 0 : index
    %c0_9 = arith.constant 0 : index
    %11 = vector.load %arg10[%c0_8, %c0_9] : memref<1x64xf32, #tpu.memory_space<vmem>>, vector<1x64xf32>
    tpu.vector_store %arg10[%c0_8, %c0_9], %10 {strides = array<i32>} : memref<1x64xf32, #tpu.memory_space<vmem>>, vector<1x64xf32>,
    %c1024_i32 = arith.constant 1024 : i32
    %12 = arith.muli %arg1, %c1024_i32 : i32
    %13 = tpu.assume_multiple %12, 1024 : i32
    %14 = arith.index_cast %13 : i32 to index
    %c0_10 = arith.constant 0 : index
    %15 = vector.load %arg9[%14, %c0_10] : memref<1024x64xf32, #tpu.memory_space<vmem>>, vector<1024x64xf32>
    tpu.vector_store %arg9[%14, %c0_10], %6 {strides = array<i32>} : memref<1024x64xf32, #tpu.memory_space<vmem>>, vector<1024x64xf32>,
    %c0_i32_11 = arith.constant 0 : i32
    %16 = arith.cmpi eq, %arg1, %c0_i32_11 : i32
    %17 = arith.extui %16 : i1 to i32
    %c0_i32_12 = arith.constant 0 : i32
    %18 = arith.cmpi ne, %17, %c0_i32_12 : i32
    scf.if %18 {
      %c0_13 = arith.constant 0 : index
      %c0_14 = arith.constant 0 : index
      %19 = vector.load %arg10[%c0_13, %c0_14] : memref<1x64xf32, #tpu.memory_space<vmem>>, vector<1x64xf32>
      %c0_15 = arith.constant 0 : index
      %c0_16 = arith.constant 0 : index
      %20 = vector.load %arg4[%c0_15, %c0_16] : memref<64x32xf32, #tpu.memory_space<vmem>>, vector<64x32xf32>
      %cst_17 = arith.constant dense<0.000000e+00> : vector<1x32xf32>
      %21 = tpu.matmul %19, %20, %cst_17 {dimension_numbers = #tpu.dot_dimension_numbers<[1], [0], [0], [1], [0, 0, 1, 1], [], []>} : vector<1x64xf32>, vector<64x32xf32>, vector<1x32xf32> -> vector<1x32xf32>
      %c0_18 = arith.constant 0 : index
      %c0_19 = arith.constant 0 : index
      %22 = vector.load %arg5[%c0_18, %c0_19] : memref<32x64xf32, #tpu.memory_space<vmem>>, vector<32x64xf32>
      %cst_20 = arith.constant dense<0.000000e+00> : vector<1x64xf32>
      %23 = tpu.matmul %21, %22, %cst_20 {dimension_numbers = #tpu.dot_dimension_numbers<[1], [0], [0], [1], [0, 0, 1, 1], [], []>} : vector<1x32xf32>, vector<32x64xf32>, vector<1x64xf32> -> vector<1x64xf32>
      %cst_21 = arith.constant 0.000000e+00 : f32
      %24 = vector.broadcast %cst_21 : f32 to vector<1x64xf32>
      %c0_i32_22 = arith.constant 0 : i32
      %c1024_i32_23 = arith.constant 1024 : i32
      %25 = arith.muli %c0_i32_22, %c1024_i32_23 : i32
      %26 = tpu.assume_multiple %25, 1024 : i32
      %27 = arith.index_cast %26 : i32 to index
      %c0_24 = arith.constant 0 : index
      %28 = vector.load %arg9[%27, %c0_24] : memref<1024x64xf32, #tpu.memory_space<vmem>>, vector<1024x64xf32>
      %29 = vector.broadcast %23 : vector<1x64xf32> to vector<1024x64xf32>
      %30 = arith.subf %28, %29 : vector<1024x64xf32>
      %31 = arith.mulf %30, %30 : vector<1024x64xf32>
      %cst_25 = arith.constant dense<0.000000e+00> : vector<64xf32>
      %32 = vector.multi_reduction <add>, %31, %cst_25 [0] : vector<1024x64xf32> to vector<64xf32>
      %33 = vector.shape_cast %32 : vector<64xf32> to vector<1x64xf32>
      %34 = arith.addf %24, %33 : vector<1x64xf32>
      %c1_i32 = arith.constant 1 : i32
      %c0_26 = arith.constant 0 : index
      %c0_27 = arith.constant 0 : index
      %35 = vector.load %arg4[%c0_26, %c0_27] : memref<64x32xf32, #tpu.memory_space<vmem>>, vector<64x32xf32>
      %cst_28 = arith.constant dense<0.000000e+00> : vector<1x32xf32>
      %36 = tpu.matmul %34, %35, %cst_28 {dimension_numbers = #tpu.dot_dimension_numbers<[1], [0], [0], [1], [0, 0, 1, 1], [], []>} : vector<1x64xf32>, vector<64x32xf32>, vector<1x32xf32> -> vector<1x32xf32>
      %c0_29 = arith.constant 0 : index
      %c0_30 = arith.constant 0 : index
      %37 = vector.load %arg5[%c0_29, %c0_30] : memref<32x64xf32, #tpu.memory_space<vmem>>, vector<32x64xf32>
      %cst_31 = arith.constant dense<0.000000e+00> : vector<1x64xf32>
      %38 = tpu.matmul %36, %37, %cst_31 {dimension_numbers = #tpu.dot_dimension_numbers<[1], [0], [0], [1], [0, 0, 1, 1], [], []>} : vector<1x32xf32>, vector<32x64xf32>, vector<1x64xf32> -> vector<1x64xf32>
      %cst_32 = arith.constant 9.99999974E-6 : f32
      %39 = vector.broadcast %cst_32 : f32 to vector<1x64xf32>
      %40 = arith.addf %38, %39 : vector<1x64xf32>
      %41 = math.rsqrt %40 : vector<1x64xf32>
      %c0_33 = arith.constant 0 : index
      %c0_34 = arith.constant 0 : index
      %42 = vector.load %arg6[%c0_33, %c0_34] : memref<1x64xf32, #tpu.memory_space<vmem>>, vector<1x64xf32>
      %43 = arith.mulf %41, %42 : vector<1x64xf32>
      %c0_35 = arith.constant 0 : index
      %c0_36 = arith.constant 0 : index
      %44 = vector.load %arg7[%c0_35, %c0_36] : memref<1x64xf32, #tpu.memory_space<vmem>>, vector<1x64xf32>
      %45 = arith.mulf %23, %43 : vector<1x64xf32>
      %46 = arith.subf %44, %45 : vector<1x64xf32>
      %c0_i32_37 = arith.constant 0 : i32
      %c1024_i32_38 = arith.constant 1024 : i32
      %47 = arith.muli %c0_i32_37, %c1024_i32_38 : i32
      %48 = tpu.assume_multiple %47, 1024 : i32
      %49 = arith.index_cast %48 : i32 to index
      %c0_39 = arith.constant 0 : index
      %50 = vector.load %arg9[%49, %c0_39] : memref<1024x64xf32, #tpu.memory_space<vmem>>, vector<1024x64xf32>
      %51 = vector.broadcast %43 : vector<1x64xf32> to vector<1024x64xf32>
      %52 = arith.mulf %50, %51 : vector<1024x64xf32>
      %53 = vector.broadcast %46 : vector<1x64xf32> to vector<1024x64xf32>
      %54 = arith.addf %52, %53 : vector<1024x64xf32>
      %cst_40 = arith.constant 0.000000e+00 : f32
      %55 = vector.broadcast %cst_40 : f32 to vector<1024x64xf32>
      %56 = arith.maximumf %54, %55 : vector<1024x64xf32>
      %57 = arith.truncf %56 : vector<1024x64xf32> to vector<1024x64xbf16>
      %c0_41 = arith.constant 0 : index
      %58 = arith.index_cast %48 : i32 to index
      %c0_42 = arith.constant 0 : index
      %59 = vector.load %arg8[%c0_41, %58, %c0_42] : memref<1x1024x64xbf16, #tpu.memory_space<vmem>>, vector<1x1024x64xbf16>
      %60 = vector.shape_cast %59 : vector<1x1024x64xbf16> to vector<1024x64xbf16>
      %61 = vector.shape_cast %57 : vector<1024x64xbf16> to vector<1x1024x64xbf16>
      tpu.vector_store %arg8[%c0_41, %58, %c0_42], %61 {strides = array<i32>} : memref<1x1024x64xbf16, #tpu.memory_space<vmem>>, vector<1x1024x64xbf16>,
      %c1_i32_43 = arith.constant 1 : i32
    } else {
    }
    return
  }
  func.func @transform_0(%arg0: i32, %arg1: i32) -> (i32, i32, i32) {
    %c0_i32 = arith.constant 0 : i32
    %c0_i32_0 = arith.constant 0 : i32
    return %arg0, %arg1, %c0_i32 : i32, i32, i32
  }
  func.func @transform_1(%arg0: i32, %arg1: i32) -> (i32, i32) {
    %c0_i32 = arith.constant 0 : i32
    %c0_i32_0 = arith.constant 0 : i32
    %c0_i32_1 = arith.constant 0 : i32
    return %c0_i32, %c0_i32_0 : i32, i32
  }
  func.func @transform_2(%arg0: i32, %arg1: i32) -> (i32, i32) {
    %c0_i32 = arith.constant 0 : i32
    %c0_i32_0 = arith.constant 0 : i32
    %c0_i32_1 = arith.constant 0 : i32
    return %c0_i32, %c0_i32_0 : i32, i32
  }
  func.func @transform_3(%arg0: i32, %arg1: i32) -> (i32, i32) {
    %c0_i32 = arith.constant 0 : i32
    %c0_i32_0 = arith.constant 0 : i32
    %c0_i32_1 = arith.constant 0 : i32
    return %c0_i32, %c0_i32_0 : i32, i32
  }
  func.func @transform_4(%arg0: i32, %arg1: i32) -> (i32, i32) {
    %c0_i32 = arith.constant 0 : i32
    %c0_i32_0 = arith.constant 0 : i32
    %c0_i32_1 = arith.constant 0 : i32
    return %c0_i32, %c0_i32_0 : i32, i32
  }
  func.func @transform_5(%arg0: i32, %arg1: i32) -> (i32, i32) {
    %c0_i32 = arith.constant 0 : i32
    %c0_i32_0 = arith.constant 0 : i32
    %c0_i32_1 = arith.constant 0 : i32
    return %c0_i32, %c0_i32_0 : i32, i32
  }
  func.func @transform_6(%arg0: i32, %arg1: i32) -> (i32, i32, i32) {
    %c0_i32 = arith.constant 0 : i32
    %c0_i32_0 = arith.constant 0 : i32
    %c0_i32_1 = arith.constant 0 : i32
    return %arg0, %c0_i32, %c0_i32_0 : i32, i32, i32
  }
}

</mosaic_0001>

<bundles_post_ra>
// kernel: conv_module_forward.1
= control target key start
LH: loop header
LB: loop body
LE: loop exit
PB: predicated region body
PF: predicated region fallthrough
CT: control target
= control target key end

     0   :  { %s4931_s21 = smov 0   ;;  %s4933_s22 = smov 0   ;;  %s7963_s0 = inlined_call_operand.vmem [shape: bf16[2,1024,72], index: 0, kind: input, shape index: {}]   ;;  %s7964_s1 = inlined_call_operand.vmem [shape: bf16[72,64], index: 1, kind: input, shape index: {}]   ;;  %s7965_s2 = inlined_call_operand.vmem [shape: f32[64,32], index: 2, kind: input, shape index: {}]   ;;  %s7966_s3 = inlined_call_operand.vmem [shape: f32[32,64], index: 3, kind: input, shape index: {}]   ;;  %s7967_s4 = inlined_call_operand.vmem [shape: f32[1,64], index: 4, kind: input, shape index: {}]   ;;  %s7968_s5 = inlined_call_operand.vmem [shape: f32[1,64], index: 5, kind: input, shape index: {}]   ;;  %s7969_s6 = inlined_call_operand.vmem [shape: bf16[2,1024,64], index: 6, kind: output, shape index: {}]  }
   0x1   :  { %s4935_s23 = smov 0  }
   0x2 LB: > { %s28_s24 = sadd.s32 1, %s4887_s22  ;;  %p3984_p0 = scmp.ge.s32.totalorder %s4891_s23, 1  ;;  %s4891_s23 = sphi %s4935_s23, %s16_s23   ;;  %s4887_s22 = sphi %s4933_s22, %s8793_s22   ;;  %s4883_s21 = sphi %s4931_s21, %s8792_s21  }
   0x3   : > { %p30_p1 = scmp.ge.s32.totalorder %s28_s24, 2  ;;  %p231_p2 = scmp.lt.s32.totalorder %s4891_s23, 3 }
   0x5   : > { %s8795_s24 = smov (%p30_p1, %s28_s24), 0  ;;  %p232_p3 = pnand %p3984_p0, %p231_p2 }
   0x7   : > { %235 = sbr.rel (%p232_p3) target bundleno = 1856 (0x740), region = 44 }
   0xe   : > { %v4756_v0 = vld [vmem:[%s7964_s1] sm:$0xff]   ;;  %v4757_v1 = vld [vmem:[%s7964_s1 + $0x8] sm:$0xff]   ;;  %p266_p4 = scmp.lt.s32.totalorder %s4883_s21, 1  ;;  %v4758_v2 = vld [vmem:[%s7964_s1 + $0x10] sm:$0xff]   ;;  %vm771_vm0 = vcmask 588800   ;;  %vm964_vm1 = vcmask 1043456  }
   0xf   : > { %4483 = vmatprep.subr.bf16.mxu0 %v4756_v0  ;;  %4717 = vmatprep.subr.bf16.mxu1 %v4756_v0  ;;  %v4759_v4 = vld [vmem:[%s7964_s1 + $0x18] sm:$0xff]   ;;  %v4760_v5 = vld [vmem:[%s7964_s1 + $0x20] ss:$0 sps:$4 sm:$0xff]   ;;  %vm1514_vm2 = vcmask 523264   ;;  %vm285_vm3 = vcmask 516096   ;;  %vm4895_vm4 = vmmov 0  }
  0x10   : > { %4484 = vmatpush3.bf16.msra.mxu0 %v4756_v0  ;;  %s8797_s21 = smov (!%p266_p4, %s4883_s21), 1  ;;  %4722 = vmatpush3.bf16.msra.mxu1 %v4756_v0  ;;  %v966_v6 = vsel %vm964_vm1, %v4760_v5, 0  ;;  %vm1998_vm5 = vcmask 261120   ;;  %vm3780_vm6 = vcmask 519168  }
  0x11   : > { %4485 = vmatprep.subr.bf16.mxu0 %v4757_v1  ;;  %4718 = vmatprep.subr.bf16.mxu1 %v4757_v1  ;;  %s4256_s7 = sshll.u32 %s8797_s21, 9 }
  0x12   : > { %s4966_s10 = scalar_lea.vmem %s7963_s0, %s4256_s7  ;;  %s7308_s30 = scalar_lea.vmem %s7969_s6, %s4256_s7 }
  0x13   : > { %v4761_v3 = vld [vmem:[%s4966_s10] sm:$0xff]   ;;  %v4762_v7 = vld [vmem:[%s4966_s10 + $0x8] sm:$0xff]   ;;  %v4763_v8 = vld [vmem:[%s4966_s10 + $0x10] sm:$0xff]  }
  0x14   : > { %4486 = vmatpush3.bf16.msra.mxu0 %v4757_v1  ;;  %4723 = vmatpush3.bf16.msra.mxu1 %v4757_v1  ;;  %v4764_v9 = vld [vmem:[%s4966_s10 + $0x18] sm:$0xff]   ;;  %v4765_v10 = vld [vmem:[%s4966_s10 + $0x20] sm:$0xff]   ;;  %v4766_v11 = vld [vmem:[%s4966_s10 + $0x28] sm:$0xff]  }
  0x15   : > { %4487 = vmatprep.subr.bf16.mxu0 %v4758_v2  ;;  %4719 = vmatprep.subr.bf16.mxu1 %v4758_v2  ;;  %v4767_v12 = vld [vmem:[%s4966_s10 + $0x30] sm:$0xff]   ;;  %v4768_v13 = vld [vmem:[%s4966_s10 + $0x38] sm:$0xff]   ;;  %v4769_v14 = vld [vmem:[%s4966_s10 + $0x40] sm:$0xff]  }
  0x16   : > { %4493 = vmatprep.mubr.msk.bf16.mxu0 %vm771_vm0, %v4761_v3  ;;  %v4799_v15 = vld [vmem:[%s4966_s10 + $0x130] sm:$0xff]   ;;  %v4800_v16 = vld [vmem:[%s4966_s10 + $0x138] sm:$0xff]   ;;  %v4801_v17 = vld [vmem:[%s4966_s10 + $0x140] sm:$0xff]  }
  0x17   : > { %4569 = vmatprep.mubr.msk.bf16.mxu1 %vm771_vm0, %v4799_v15  ;;  %v4770_v18 = vld [vmem:[%s4966_s10 + $0x48] sm:$0xff]   ;;  %v4771_v19 = vld [vmem:[%s4966_s10 + $0x50] sm:$0xff]   ;;  %v4772_v22 = vld [vmem:[%s4966_s10 + $0x58] sm:$0xff]  }
  0x18   : > { %4488 = vmatpush3.bf16.msra.mxu0 %v4758_v2  ;;  %4724 = vmatpush3.bf16.msra.mxu1 %v4758_v2  ;;  %v4802_v20 = vld [vmem:[%s4966_s10 + $0x148] sm:$0xff]   ;;  %v4803_v21 = vld [vmem:[%s4966_s10 + $0x150] sm:$0xff]   ;;  %v4773_v23 = vld [vmem:[%s4966_s10 + $0x60] sm:$0xff]  }
  0x19   : > { %4489 = vmatprep.subr.bf16.mxu0 %v4759_v4  ;;  %4720 = vmatprep.subr.bf16.mxu1 %v4759_v4  ;;  %v4804_v24 = vld [vmem:[%s4966_s10 + $0x158] sm:$0xff]   ;;  %v4805_v25 = vld [vmem:[%s4966_s10 + $0x160] sm:$0xff]   ;;  %v4774_v26 = vld [vmem:[%s4966_s10 + $0x68] sm:$0xff]  }
  0x1a   : > { %v4775_v27 = vld [vmem:[%s4966_s10 + $0x70] sm:$0xff]   ;;  %v4806_v28 = vld [vmem:[%s4966_s10 + $0x168] sm:$0xff]   ;;  %v4776_v30 = vld [vmem:[%s4966_s10 + $0x78] sm:$0xff]  }
  0x1b   : > { %v4807_v29 = vld [vmem:[%s4966_s10 + $0x170] sm:$0xff]   ;;  %v4777_v31 = vld [vmem:[%s4966_s10 + $0x80] sm:$0xff]   ;;  %v4808_v32 = vld [vmem:[%s4966_s10 + $0x178] sm:$0xff]  }
  0x1c   : > { %4490 = vmatpush3.bf16.msra.mxu0 %v4759_v4  ;;  %4725 = vmatpush3.bf16.msra.mxu1 %v4759_v4  ;;  %v4809_v33 = vld [vmem:[%s4966_s10 + $0x180] sm:$0xff]   ;;  %v4778_v34 = vld [vmem:[%s4966_s10 + $0x88] sm:$0xff]   ;;  %v4779_v35 = vld [vmem:[%s4966_s10 + $0x90] sm:$0xff]  }
  0x1d   : > { %4727 = vmatprep.subr.msk.bf16.mxu0 %vm964_vm1, %v4760_v5  ;;  %4728 = vmatprep.subr.msk.bf16.mxu1 %vm964_vm1, %v4760_v5  ;;  %v4810_v36 = vld [vmem:[%s4966_s10 + $0x188] sm:$0xff]   ;;  %v4811_v37 = vld [vmem:[%s4966_s10 + $0x190] sm:$0xff]   ;;  %v4780_v38 = vld [vmem:[%s4966_s10 + $0x98] sm:$0xff]  }
  0x1e   : > { %v4781_v39 = vld [vmem:[%s4966_s10 + $0xa0] sm:$0xff]   ;;  %v4812_v40 = vld [vmem:[%s4966_s10 + $0x198] sm:$0xff]   ;;  %v4782_v42 = vld [vmem:[%s4966_s10 + $0xa8] sm:$0xff]  }
  0x1f   : > { %v4813_v41 = vld [vmem:[%s4966_s10 + $0x1a0] sm:$0xff]   ;;  %v4783_v43 = vld [vmem:[%s4966_s10 + $0xb0] sm:$0xff]   ;;  %v4814_v44 = vld [vmem:[%s4966_s10 + $0x1a8] sm:$0xff]  }
  0x20   : > { %4492 = vmatpush3.bf16.msra.mxu0 %v966_v6  ;;  %4726 = vmatpush3.bf16.msra.mxu1 %v966_v6  ;;  %v4815_v45 = vld [vmem:[%s4966_s10 + $0x1b0] sm:$0xff]   ;;  %v4784_v46 = vld [vmem:[%s4966_s10 + $0xb8] sm:$0xff]   ;;  %v4785_v47 = vld [vmem:[%s4966_s10 + $0xc0] sm:$0xff]  }
  0x21   : > { %v4816_v48 = vld [vmem:[%s4966_s10 + $0x1b8] sm:$0xff]   ;;  %v4817_v49 = vld [vmem:[%s4966_s10 + $0x1c0] sm:$0xff]   ;;  %v4786_v50 = vld [vmem:[%s4966_s10 + $0xc8] sm:$0xff]  }
  0x22   : > { %v4787_v51 = vld [vmem:[%s4966_s10 + $0xd0] sm:$0xff]   ;;  %v4818_v52 = vld [vmem:[%s4966_s10 + $0x1c8] sm:$0xff]   ;;  %v4788_v54 = vld [vmem:[%s4966_s10 + $0xd8] sm:$0xff]  }
  0x23   : > { %4494 = vmatmul.mubr.msk.bf16.vlgmr.msra.gmra.mrb[0].mxu0 %vm771_vm0, %v4762_v7  ;;  %4570 = vmatmul.mubr.msk.bf16.vlgmr.msra.gmra.mrb[0].mxu1 %vm771_vm0, %v4800_v16  ;;  %v4819_v53 = vld [vmem:[%s4966_s10 + $0x1d0] sm:$0xff]   ;;  %v4789_v55 = vld [vmem:[%s4966_s10 + $0xe0] sm:$0xff]   ;;  %v4820_v56 = vld [vmem:[%s4966_s10 + $0x1d8] sm:$0xff]  }
  0x24   : > { %4497 = vmatprep.mubr.msk.bf16.mxu0 %vm771_vm0, %v4763_v8  ;;  %4573 = vmatprep.mubr.msk.bf16.mxu1 %vm771_vm0, %v4801_v17  ;;  %v4821_v57 = vld [vmem:[%s4966_s10 + $0x1e0] sm:$0xff]   ;;  %v4790_v58 = vld [vmem:[%s4966_s10 + $0xe8] sm:$0xff]   ;;  %v4791_v59 = vld [vmem:[%s4966_s10 + $0xf0] sm:$0xff]  }
  0x25   : > { %v4822_v60 = vld [vmem:[%s4966_s10 + $0x1e8] sm:$0xff]   ;;  %v4823_v61 = vld [vmem:[%s4966_s10 + $0x1f0] sm:$0xff]   ;;  %v4792_v62 = vld [vmem:[%s4966_s10 + $0xf8] sm:$0xff]  }
  0x26   : > { %v4793_v63 = vld [vmem:[%s4966_s10 + $0x100] sm:$0xff]   ;;  %v4824_v0 = vld [vmem:[%s4966_s10 + $0x1f8] sm:$0xff]   ;;  %v4794_v1 = vld [vmem:[%s4966_s10 + $0x108] sm:$0xff]  }
  0x27   : > { %v4795_v2 = vld [vmem:[%s4966_s10 + $0x110] sm:$0xff]   ;;  %v4796_v3 = vld [vmem:[%s4966_s10 + $0x118] sm:$0xff]   ;;  %v4797_v4 = vld [vmem:[%s4966_s10 + $0x120] sm:$0xff]  }
  0x28   : > { %v4798_v5 = vld [vmem:[%s4966_s10 + $0x128] sm:$0xff]  }
  0x2b   : > { %4498 = vmatmul.mubr.msk.bf16.gmra.mrb[4].mxu0 %vm771_vm0, %v4764_v9  ;;  %4574 = vmatmul.mubr.msk.bf16.gmra.mrb[4].mxu1 %vm771_vm0, %v4802_v20 }
  0x2c   : > { %4501 = vmatprep.mubr.msk.bf16.mxu0 %vm771_vm0, %v4765_v10  ;;  %4577 = vmatprep.mubr.msk.bf16.mxu1 %vm771_vm0, %v4803_v21 }
  0x33   : > { %4502 = vmatmul.mubr.msk.bf16.gmra.mrb[8].mxu0 %vm771_vm0, %v4766_v11  ;;  %4578 = vmatmul.mubr.msk.bf16.gmra.mrb[8].mxu1 %vm771_vm0, %v4804_v24 }
  0x34   : > { %4505 = vmatprep.mubr.msk.bf16.mxu0 %vm771_vm0, %v4767_v12  ;;  %4581 = vmatprep.mubr.msk.bf16.mxu1 %vm771_vm0, %v4805_v25 }
  0x3b   : > { %4506 = vmatmul.mubr.msk.bf16.gmra.mrb[12].mxu0 %vm771_vm0, %v4768_v13  ;;  %4582 = vmatmul.mubr.msk.bf16.gmra.mrb[12].mxu1 %vm771_vm0, %v4806_v28 }
  0x3c   : > { %4509 = vmatprep.mubr.msk.bf16.mxu0 %vm771_vm0, %v4769_v14  ;;  %4585 = vmatprep.mubr.msk.bf16.mxu1 %vm771_vm0, %v4807_v29 }
  0x43   : > { %4510 = vmatmul.mubr.msk.bf16.gmra.mrb[16].mxu0 %vm771_vm0, %v4770_v18  ;;  %4586 = vmatmul.mubr.msk.bf16.gmra.mrb[16].mxu1 %vm771_vm0, %v4808_v32 }
  0x44   : > { %4513 = vmatprep.mubr.msk.bf16.mxu0 %vm771_vm0, %v4771_v19  ;;  %4589 = vmatprep.mubr.msk.bf16.mxu1 %vm771_vm0, %v4809_v33 }
  0x4b   : > { %4514 = vmatmul.mubr.msk.bf16.gmra.mrb[20].mxu0 %vm771_vm0, %v4772_v22  ;;  %4590 = vmatmul.mubr.msk.bf16.gmra.mrb[20].mxu1 %vm771_vm0, %v4810_v36 }
  0x4c   : > { %4517 = vmatprep.mubr.msk.bf16.mxu0 %vm771_vm0, %v4773_v23  ;;  %4593 = vmatprep.mubr.msk.bf16.mxu1 %vm771_vm0, %v4811_v37 }
  0x53   : > { %4518 = vmatmul.mubr.msk.bf16.gmra.mrb[24].mxu0 %vm771_vm0, %v4774_v26  ;;  %4594 = vmatmul.mubr.msk.bf16.gmra.mrb[24].mxu1 %vm771_vm0, %v4812_v40 }
  0x54   : > { %4521 = vmatprep.mubr.msk.bf16.mxu0 %vm771_vm0, %v4775_v27  ;;  %4597 = vmatprep.mubr.msk.bf16.mxu1 %vm771_vm0, %v4813_v41 }
  0x5b   : > { %4522 = vmatmul.mubr.msk.bf16.gmra.mrb[28].mxu0 %vm771_vm0, %v4776_v30  ;;  %4598 = vmatmul.mubr.msk.bf16.gmra.mrb[28].mxu1 %vm771_vm0, %v4814_v44 }
  0x5c   : > { %4525 = vmatprep.mubr.msk.bf16.mxu0 %vm771_vm0, %v4777_v31  ;;  %4601 = vmatprep.mubr.msk.bf16.mxu1 %vm771_vm0, %v4815_v45 }
  0x63   : > { %4526 = vmatmul.mubr.msk.bf16.gmra.mrb[32].mxu0 %vm771_vm0, %v4778_v34  ;;  %4602 = vmatmul.mubr.msk.bf16.gmra.mrb[32].mxu1 %vm771_vm0, %v4816_v48 }
  0x64   : > { %4529 = vmatprep.mubr.msk.bf16.mxu0 %vm771_vm0, %v4779_v35  ;;  %4605 = vmatprep.mubr.msk.bf16.mxu1 %vm771_vm0, %v4817_v49 }
  0x6b   : > { %4530 = vmatmul.mubr.msk.bf16.gmra.mrb[36].mxu0 %vm771_vm0, %v4780_v38  ;;  %4606 = vmatmul.mubr.msk.bf16.gmra.mrb[36].mxu1 %vm771_vm0, %v4818_v52 }
  0x6c   : > { %4533 = vmatprep.mubr.msk.bf16.mxu0 %vm771_vm0, %v4781_v39  ;;  %4609 = vmatprep.mubr.msk.bf16.mxu1 %vm771_vm0, %v4819_v53 }
  0x73   : > { %4534 = vmatmul.mubr.msk.bf16.gmra.mrb[40].mxu0 %vm771_vm0, %v4782_v42  ;;  %4610 = vmatmul.mubr.msk.bf16.gmra.mrb[40].mxu1 %vm771_vm0, %v4820_v56 }
  0x74   : > { %4537 = vmatprep.mubr.msk.bf16.mxu0 %vm771_vm0, %v4783_v43  ;;  %4613 = vmatprep.mubr.msk.bf16.mxu1 %vm771_vm0, %v4821_v57 }
  0x7b   : > { %4538 = vmatmul.mubr.msk.bf16.gmra.mrb[44].mxu0 %vm771_vm0, %v4784_v46  ;;  %4614 = vmatmul.mubr.msk.bf16.gmra.mrb[44].mxu1 %vm771_vm0, %v4822_v60 }
  0x7c   : > { %4541 = vmatprep.mubr.msk.bf16.mxu0 %vm771_vm0, %v4785_v47  ;;  %4617 = vmatprep.mubr.msk.bf16.mxu1 %vm771_vm0, %v4823_v61 }
  0x83   : > { %4542 = vmatmul.mubr.msk.bf16.gmra.mrb[48].mxu0 %vm771_vm0, %v4786_v50  ;;  %4618 = vmatmul.mubr.msk.bf16.gmra.mrb[48].mxu1 %vm771_vm0, %v4824_v0 }
  0x84   : > { %4545 = vmatprep.mubr.msk.bf16.mxu0 %vm771_vm0, %v4787_v51 }
  0x8b   : > { %4546 = vmatmul.mubr.msk.bf16.gmra.mrb[52].mxu0 %vm771_vm0, %v4788_v54 }
  0x8c   : > { %4549 = vmatprep.mubr.msk.bf16.mxu0 %vm771_vm0, %v4789_v55 }
  0x93   : > { %4550 = vmatmul.mubr.msk.bf16.gmra.mrb[56].mxu0 %vm771_vm0, %v4790_v58 }
  0x94   : > { %4553 = vmatprep.mubr.msk.bf16.mxu0 %vm771_vm0, %v4791_v59 }
  0x9b   : > { %4554 = vmatmul.mubr.msk.bf16.gmra.mrb[60].mxu0 %vm771_vm0, %v4792_v62 }
  0x9c   : > { %4557 = vmatprep.mubr.msk.bf16.mxu0 %vm771_vm0, %v4793_v63 }
  0xa3   : > { %4558 = vmatmul.mubr.msk.bf16.gmra.mrb[64].mxu0 %vm771_vm0, %v4794_v1 }
  0xa4   : > { %4561 = vmatprep.mubr.msk.bf16.mxu0 %vm771_vm0, %v4795_v2 }
  0xab   : > { %4562 = vmatmul.mubr.msk.bf16.gmra.mrb[68].mxu0 %vm771_vm0, %v4796_v3 }
  0xac   : > { %4565 = vmatprep.mubr.msk.bf16.mxu0 %vm771_vm0, %v4797_v4 }
  0xb3   : > { %4566 = vmatmul.mubr.msk.bf16.gmra.mrb[72].mxu0 %vm771_vm0, %v4798_v5 }
  0xf6   : > { %v4495_v6 = vpop.f32.mrb[0].mxu0  ;;  %v5129_v45 = vpop.f32.mrb[0].mxu1 }
  0xf7   : > { %1783 = vst.msk [vmem:[#allocation2 + $0x10] sm:$0xff] %vm1514_vm2, %v4495_v6  ;;  %v1002_v7 = vpop.f32.mrb[1].mxu0  ;;  %v1518_v13 = vsel %vm1514_vm2, %v4495_v6, 0.0  ;;  %1859 = vst.msk [vmem:[#allocation2 + $0x270] sm:$0xff] %vm1514_vm2, %v5129_v45  ;;  %v5134_v48 = vpop.f32.mrb[1].mxu1 }
  0xf8   : > { %1781 = vst.msk [vmem:[#allocation2] sm:$0xff] %vm1514_vm2, %v1002_v7  ;;  %v4496_v8 = vpop.f32.mrb[2].mxu0  ;;  %v1515_v10 = vsel %vm1514_vm2, %v1002_v7, 0.0  ;;  %1857 = vst.msk [vmem:[#allocation2 + $0x260] sm:$0xff] %vm1514_vm2, %v5134_v48  ;;  %v5140_v50 = vpop.f32.mrb[2].mxu1 }
  0xf9   : > { %1784 = vst.msk [vmem:[#allocation2 + $0x18] sm:$0xff] %vm1514_vm2, %v4496_v8  ;;  %v1005_v9 = vpop.f32.mrb[3].mxu0  ;;  %v1520_v15 = vsel %vm1514_vm2, %v4496_v8, 0.0  ;;  %1860 = vst.msk [vmem:[#allocation2 + $0x278] sm:$0xff] %vm1514_vm2, %v5140_v50  ;;  %v5144_v52 = vpop.f32.mrb[3].mxu1 }
  0xfa   : > { %v1516_v11 = vsel %vm1514_vm2, %v1005_v9, 0.0  ;;  %1782 = vst.msk [vmem:[#allocation2 + $0x8] sm:$0xff] %vm1514_vm2, %v1005_v9  ;;  %1858 = vst.msk [vmem:[#allocation2 + $0x268] sm:$0xff] %vm1514_vm2, %v5144_v52 }
  0xfb   : > { %v1517_v12 = vadd.f32 %v1516_v11, %v1515_v10 }
  0xfd   : > { %v1519_v14 = vadd.f32 %v1518_v13, %v1517_v12 }
  0xfe   : > { %v4499_v16 = vpop.f32.mrb[4].mxu0  ;;  %v5153_v61 = vpop.f32.mrb[4].mxu1 }
  0xff   : > { %v1521_v17 = vadd.f32 %v1520_v15, %v1519_v14  ;;  %1787 = vst.msk [vmem:[#allocation2 + $0x30] sm:$0xff] %vm1514_vm2, %v4499_v16  ;;  %v1018_v18 = vpop.f32.mrb[5].mxu0  ;;  %v1526_v25 = vsel %vm1514_vm2, %v4499_v16, 0.0  ;;  %1863 = vst.msk [vmem:[#allocation2 + $0x290] sm:$0xff] %vm1514_vm2, %v5153_v61  ;;  %v5158_v0 = vpop.f32.mrb[5].mxu1 }
 0x100   : > { %v1522_v19 = vsel %vm1514_vm2, %v1018_v18, 0.0  ;;  %1785 = vst.msk [vmem:[#allocation2 + $0x20] sm:$0xff] %vm1514_vm2, %v1018_v18  ;;  %v4500_v20 = vpop.f32.mrb[6].mxu0  ;;  %1861 = vst.msk [vmem:[#allocation2 + $0x280] sm:$0xff] %vm1514_vm2, %v5158_v0  ;;  %v5164_v2 = vpop.f32.mrb[6].mxu1 }
 0x101   : > { %v1523_v21 = vadd.f32 %v1522_v19, %v1521_v17  ;;  %1788 = vst.msk [vmem:[#allocation2 + $0x38] sm:$0xff] %vm1514_vm2, %v4500_v20  ;;  %v1021_v22 = vpop.f32.mrb[7].mxu0  ;;  %v1528_v27 = vsel %vm1514_vm2, %v4500_v20, 0.0  ;;  %1864 = vst.msk [vmem:[#allocation2 + $0x298] sm:$0xff] %vm1514_vm2, %v5164_v2  ;;  %v5168_v4 = vpop.f32.mrb[7].mxu1 }
 0x102   : > { %v1524_v23 = vsel %vm1514_vm2, %v1021_v22, 0.0  ;;  %1786 = vst.msk [vmem:[#allocation2 + $0x28] sm:$0xff] %vm1514_vm2, %v1021_v22  ;;  %1862 = vst.msk [vmem:[#allocation2 + $0x288] sm:$0xff] %vm1514_vm2, %v5168_v4 }
 0x103   : > { %v1525_v24 = vadd.f32 %v1524_v23, %v1523_v21 }
 0x105   : > { %v1527_v26 = vadd.f32 %v1526_v25, %v1525_v24 }
 0x106   : > { %v4503_v28 = vpop.f32.mrb[8].mxu0  ;;  %v5177_v13 = vpop.f32.mrb[8].mxu1 }
 0x107   : > { %v1529_v29 = vadd.f32 %v1528_v27, %v1527_v26  ;;  %1791 = vst.msk [vmem:[#allocation2 + $0x50] sm:$0xff] %vm1514_vm2, %v4503_v28  ;;  %v1034_v30 = vpop.f32.mrb[9].mxu0  ;;  %v1534_v37 = vsel %vm1514_vm2, %v4503_v28, 0.0  ;;  %1867 = vst.msk [vmem:[#allocation2 + $0x2b0] sm:$0xff] %vm1514_vm2, %v5177_v13  ;;  %v5182_v16 = vpop.f32.mrb[9].mxu1 }
 0x108   : > { %v1530_v31 = vsel %vm1514_vm2, %v1034_v30, 0.0  ;;  %1789 = vst.msk [vmem:[#allocation2 + $0x40] sm:$0xff] %vm1514_vm2, %v1034_v30  ;;  %v4504_v32 = vpop.f32.mrb[10].mxu0  ;;  %1865 = vst.msk [vmem:[#allocation2 + $0x2a0] sm:$0xff] %vm1514_vm2, %v5182_v16  ;;  %v5188_v18 = vpop.f32.mrb[10].mxu1 }
 0x109   : > { %v1531_v33 = vadd.f32 %v1530_v31, %v1529_v29  ;;  %1792 = vst.msk [vmem:[#allocation2 + $0x58] sm:$0xff] %vm1514_vm2, %v4504_v32  ;;  %v1037_v34 = vpop.f32.mrb[11].mxu0  ;;  %v1536_v39 = vsel %vm1514_vm2, %v4504_v32, 0.0  ;;  %1868 = vst.msk [vmem:[#allocation2 + $0x2b8] sm:$0xff] %vm1514_vm2, %v5188_v18  ;;  %v5192_v20 = vpop.f32.mrb[11].mxu1 }
 0x10a   : > { %v1532_v35 = vsel %vm1514_vm2, %v1037_v34, 0.0  ;;  %1790 = vst.msk [vmem:[#allocation2 + $0x48] sm:$0xff] %vm1514_vm2, %v1037_v34  ;;  %1866 = vst.msk [vmem:[#allocation2 + $0x2a8] sm:$0xff] %vm1514_vm2, %v5192_v20 }
 0x10b   : > { %v1533_v36 = vadd.f32 %v1532_v35, %v1531_v33 }
 0x10d   : > { %v1535_v38 = vadd.f32 %v1534_v37, %v1533_v36 }
 0x10e   : > { %v4507_v40 = vpop.f32.mrb[12].mxu0  ;;  %v5201_v29 = vpop.f32.mrb[12].mxu1 }
 0x10f   : > { %v1537_v41 = vadd.f32 %v1536_v39, %v1535_v38  ;;  %1795 = vst.msk [vmem:[#allocation2 + $0x70] sm:$0xff] %vm1514_vm2, %v4507_v40  ;;  %v1050_v42 = vpop.f32.mrb[13].mxu0  ;;  %v1542_v53 = vsel %vm1514_vm2, %v4507_v40, 0.0  ;;  %1871 = vst.msk [vmem:[#allocation2 + $0x2d0] sm:$0xff] %vm1514_vm2, %v5201_v29  ;;  %v5206_v32 = vpop.f32.mrb[13].mxu1  ;;  %v1913_v39 = vld [vmem:[%s7965_s2] sm:$0xff] }
 0x110   : > { %v1538_v43 = vsel %vm1514_vm2, %v1050_v42, 0.0  ;;  %1793 = vst.msk [vmem:[#allocation2 + $0x60] sm:$0xff] %vm1514_vm2, %v1050_v42  ;;  %v4508_v44 = vpop.f32.mrb[14].mxu0  ;;  %1869 = vst.msk [vmem:[#allocation2 + $0x2c0] sm:$0xff] %vm1514_vm2, %v5206_v32  ;;  %v5212_v34 = vpop.f32.mrb[14].mxu1  ;;  %v1914_v40 = vld [vmem:[%s7965_s2 + $0x8] sm:$0xff] }
 0x111   : > { %v1539_v46 = vadd.f32 %v1538_v43, %v1537_v41  ;;  %1796 = vst.msk [vmem:[#allocation2 + $0x78] sm:$0xff] %vm1514_vm2, %v4508_v44  ;;  %v1053_v47 = vpop.f32.mrb[15].mxu0  ;;  %v1544_v55 = vsel %vm1514_vm2, %v4508_v44, 0.0  ;;  %1872 = vst.msk [vmem:[#allocation2 + $0x2d8] sm:$0xff] %vm1514_vm2, %v5212_v34  ;;  %v5216_v36 = vpop.f32.mrb[15].mxu1  ;;  %v7970_v43 = vmov 0.0|0.0   ;;  %v5229_v44 = vpack.c.bf16 %v1914_v40, %v1913_v39 }
 0x112   : > { %v1540_v49 = vsel %vm1514_vm2, %v1053_v47, 0.0  ;;  %1794 = vst.msk [vmem:[#allocation2 + $0x68] sm:$0xff] %vm1514_vm2, %v1053_v47  ;;  %1870 = vst.msk [vmem:[#allocation2 + $0x2c8] sm:$0xff] %vm1514_vm2, %v5216_v36  ;;  %4681 = vmatprep.subr.bf16.mxu1 %v7970_v43 }
 0x113   : > { %v1541_v51 = vadd.f32 %v1540_v49, %v1539_v46  ;;  %8134 = vst [vmem:[#allocation4_spill] sm:$0xff] %v5229_v44  ;;  %4683 = vmatpush3.bf16.msra.mxu1 %v5229_v44 }
 0x114   : > { %4684 = vmatprep.subr.bf16.mxu1 %v7970_v43 }
 0x115   : > { %v1543_v54 = vadd.f32 %v1542_v53, %v1541_v51 }
 0x116   : > { %v4511_v56 = vpop.f32.mrb[16].mxu0  ;;  %v5235_v53 = vpop.f32.mrb[16].mxu1 }
 0x117   : > { %1799 = vst.msk [vmem:[#allocation2 + $0x90] sm:$0xff] %vm1514_vm2, %v4511_v56  ;;  %v1066_v57 = vpop.f32.mrb[17].mxu0  ;;  %v1545_v58 = vadd.f32 %v1544_v55, %v1543_v54  ;;  %v1550_v5 = vsel %vm1514_vm2, %v4511_v56, 0.0  ;;  %1875 = vst.msk [vmem:[#allocation2 + $0x2f0] sm:$0xff] %vm1514_vm2, %v5235_v53  ;;  %v5240_v56 = vpop.f32.mrb[17].mxu1 }
 0x118   : > { %v1546_v59 = vsel %vm1514_vm2, %v1066_v57, 0.0  ;;  %1797 = vst.msk [vmem:[#allocation2 + $0x80] sm:$0xff] %vm1514_vm2, %v1066_v57  ;;  %v4512_v60 = vpop.f32.mrb[18].mxu0  ;;  %1873 = vst.msk [vmem:[#allocation2 + $0x2e0] sm:$0xff] %vm1514_vm2, %v5240_v56 }
 0x119   : > { %v1547_v62 = vadd.f32 %v1546_v59, %v1545_v58  ;;  %1800 = vst.msk [vmem:[#allocation2 + $0x98] sm:$0xff] %vm1514_vm2, %v4512_v60  ;;  %v1069_v63 = vpop.f32.mrb[19].mxu0  ;;  %v1552_v7 = vsel %vm1514_vm2, %v4512_v60, 0.0  ;;  %v5247_v58 = vpop.f32.mrb[18].mxu1 }
 0x11a   : > { %v1548_v1 = vsel %vm1514_vm2, %v1069_v63, 0.0  ;;  %1798 = vst.msk [vmem:[#allocation2 + $0x88] sm:$0xff] %vm1514_vm2, %v1069_v63  ;;  %1876 = vst.msk [vmem:[#allocation2 + $0x2f8] sm:$0xff] %vm1514_vm2, %v5247_v58  ;;  %v5251_v60 = vpop.f32.mrb[19].mxu1 }
 0x11b   : > { %v1549_v3 = vadd.f32 %v1548_v1, %v1547_v62  ;;  %1874 = vst.msk [vmem:[#allocation2 + $0x2e8] sm:$0xff] %vm1514_vm2, %v5251_v60 }
 0x11d   : > { %v1551_v6 = vadd.f32 %v1550_v5, %v1549_v3 }
 0x11e   : > { %v4515_v8 = vpop.f32.mrb[20].mxu0 }
 0x11f   : > { %1803 = vst.msk [vmem:[#allocation2 + $0xb0] sm:$0xff] %vm1514_vm2, %v4515_v8  ;;  %v1082_v9 = vpop.f32.mrb[21].mxu0  ;;  %v1553_v10 = vadd.f32 %v1552_v7, %v1551_v6  ;;  %v1558_v21 = vsel %vm1514_vm2, %v4515_v8, 0.0 }
 0x120   : > { %v1554_v11 = vsel %vm1514_vm2, %v1082_v9, 0.0  ;;  %1801 = vst.msk [vmem:[#allocation2 + $0xa0] sm:$0xff] %vm1514_vm2, %v1082_v9  ;;  %v4516_v12 = vpop.f32.mrb[22].mxu0  ;;  %v5260_v9 = vpop.f32.mrb[20].mxu1 }
 0x121   : > { %v1555_v14 = vadd.f32 %v1554_v11, %v1553_v10  ;;  %1804 = vst.msk [vmem:[#allocation2 + $0xb8] sm:$0xff] %vm1514_vm2, %v4516_v12  ;;  %v1085_v15 = vpop.f32.mrb[23].mxu0  ;;  %v1560_v23 = vsel %vm1514_vm2, %v4516_v12, 0.0  ;;  %1879 = vst.msk [vmem:[#allocation2 + $0x310] sm:$0xff] %vm1514_vm2, %v5260_v9  ;;  %v5265_v12 = vpop.f32.mrb[21].mxu1 }
 0x122   : > { %v1556_v17 = vsel %vm1514_vm2, %v1085_v15, 0.0  ;;  %1802 = vst.msk [vmem:[#allocation2 + $0xa8] sm:$0xff] %vm1514_vm2, %v1085_v15  ;;  %1877 = vst.msk [vmem:[#allocation2 + $0x300] sm:$0xff] %vm1514_vm2, %v5265_v12  ;;  %v5271_v15 = vpop.f32.mrb[22].mxu1 }
 0x123   : > { %v1557_v19 = vadd.f32 %v1556_v17, %v1555_v14  ;;  %1880 = vst.msk [vmem:[#allocation2 + $0x318] sm:$0xff] %vm1514_vm2, %v5271_v15 }
 0x125   : > { %v1559_v22 = vadd.f32 %v1558_v21, %v1557_v19  ;;  %v5275_v19 = vpop.f32.mrb[23].mxu1 }
 0x126   : > { %v4519_v24 = vpop.f32.mrb[24].mxu0  ;;  %1878 = vst.msk [vmem:[#allocation2 + $0x308] sm:$0xff] %vm1514_vm2, %v5275_v19 }
 0x127   : > { %1807 = vst.msk [vmem:[#allocation2 + $0xd0] sm:$0xff] %vm1514_vm2, %v4519_v24  ;;  %v1098_v25 = vpop.f32.mrb[25].mxu0  ;;  %v1561_v26 = vadd.f32 %v1560_v23, %v1559_v22  ;;  %v1566_v37 = vsel %vm1514_vm2, %v4519_v24, 0.0 }
 0x128   : > { %v1562_v27 = vsel %vm1514_vm2, %v1098_v25, 0.0  ;;  %1805 = vst.msk [vmem:[#allocation2 + $0xc0] sm:$0xff] %vm1514_vm2, %v1098_v25  ;;  %v4520_v28 = vpop.f32.mrb[26].mxu0 }
 0x129   : > { %v1563_v30 = vadd.f32 %v1562_v27, %v1561_v26  ;;  %1808 = vst.msk [vmem:[#allocation2 + $0xd8] sm:$0xff] %vm1514_vm2, %v4520_v28  ;;  %v1101_v31 = vpop.f32.mrb[27].mxu0  ;;  %v1568_v41 = vsel %vm1514_vm2, %v4520_v28, 0.0 }
 0x12a   : > { %v1564_v33 = vsel %vm1514_vm2, %v1101_v31, 0.0  ;;  %1806 = vst.msk [vmem:[#allocation2 + $0xc8] sm:$0xff] %vm1514_vm2, %v1101_v31 }
 0x12b   : > { %v1565_v35 = vadd.f32 %v1564_v33, %v1563_v30  ;;  %v5284_v30 = vpop.f32.mrb[24].mxu1 }
 0x12c   : > { %1883 = vst.msk [vmem:[#allocation2 + $0x330] sm:$0xff] %vm1514_vm2, %v5284_v30 }
 0x12d   : > { %v1567_v38 = vadd.f32 %v1566_v37, %v1565_v35  ;;  %v5289_v35 = vpop.f32.mrb[25].mxu1 }
 0x12e   : > { %v4523_v42 = vpop.f32.mrb[28].mxu0  ;;  %1881 = vst.msk [vmem:[#allocation2 + $0x320] sm:$0xff] %vm1514_vm2, %v5289_v35 }
 0x12f   : > { %1811 = vst.msk [vmem:[#allocation2 + $0xf0] sm:$0xff] %vm1514_vm2, %v4523_v42  ;;  %v1114_v46 = vpop.f32.mrb[29].mxu0  ;;  %v1569_v47 = vadd.f32 %v1568_v41, %v1567_v38  ;;  %v1574_v62 = vsel %vm1514_vm2, %v4523_v42, 0.0  ;;  %v5295_v38 = vpop.f32.mrb[26].mxu1 }
 0x130   : > { %v1570_v49 = vsel %vm1514_vm2, %v1114_v46, 0.0  ;;  %1809 = vst.msk [vmem:[#allocation2 + $0xe0] sm:$0xff] %vm1514_vm2, %v1114_v46  ;;  %v4524_v51 = vpop.f32.mrb[30].mxu0  ;;  %1884 = vst.msk [vmem:[#allocation2 + $0x338] sm:$0xff] %vm1514_vm2, %v5295_v38  ;;  %v5299_v40 = vpop.f32.mrb[27].mxu1  ;;  %v1915_v46 = vld [vmem:[%s7965_s2 + $0x10] sm:$0xff] }
 0x131   : > { %v1571_v54 = vadd.f32 %v1570_v49, %v1569_v47  ;;  %1812 = vst.msk [vmem:[#allocation2 + $0xf8] sm:$0xff] %vm1514_vm2, %v4524_v51  ;;  %v1117_v55 = vpop.f32.mrb[31].mxu0  ;;  %v1576_v1 = vsel %vm1514_vm2, %v4524_v51, 0.0  ;;  %1882 = vst.msk [vmem:[#allocation2 + $0x328] sm:$0xff] %vm1514_vm2, %v5299_v40  ;;  %v1916_v47 = vld [vmem:[%s7965_s2 + $0x18] sm:$0xff] }
 0x132   : > { %v1572_v57 = vsel %vm1514_vm2, %v1117_v55, 0.0  ;;  %1810 = vst.msk [vmem:[#allocation2 + $0xe8] sm:$0xff] %vm1514_vm2, %v1117_v55 }
 0x133   : > { %v1573_v59 = vadd.f32 %v1572_v57, %v1571_v54  ;;  %v5311_v54 = vpack.c.bf16 %v1916_v47, %v1915_v46 }
 0x135   : > { %v1575_v63 = vadd.f32 %v1574_v62, %v1573_v59  ;;  %8135 = vst [vmem:[#allocation5_spill] sm:$0xff] %v5311_v54  ;;  %4686 = vmatpush3.bf16.msra.mxu1 %v5311_v54 }
 0x136   : > { %v4527_v3 = vpop.f32.mrb[32].mxu0  ;;  %4687 = vmatprep.subr.bf16.mxu1 %v7970_v43 }
 0x137   : > { %1815 = vst.msk [vmem:[#allocation2 + $0x110] sm:$0xff] %vm1514_vm2, %v4527_v3  ;;  %v1130_v5 = vpop.f32.mrb[33].mxu0  ;;  %v1577_v6 = vadd.f32 %v1576_v1, %v1575_v63  ;;  %v1582_v21 = vsel %vm1514_vm2, %v4527_v3, 0.0  ;;  %v5317_v63 = vpop.f32.mrb[28].mxu1 }
 0x138   : > { %v1578_v7 = vsel %vm1514_vm2, %v1130_v5, 0.0  ;;  %1813 = vst.msk [vmem:[#allocation2 + $0x100] sm:$0xff] %vm1514_vm2, %v1130_v5  ;;  %v4528_v8 = vpop.f32.mrb[34].mxu0  ;;  %1887 = vst.msk [vmem:[#allocation2 + $0x350] sm:$0xff] %vm1514_vm2, %v5317_v63  ;;  %v5322_v5 = vpop.f32.mrb[29].mxu1 }
 0x139   : > { %v1579_v10 = vadd.f32 %v1578_v7, %v1577_v6  ;;  %1816 = vst.msk [vmem:[#allocation2 + $0x118] sm:$0xff] %vm1514_vm2, %v4528_v8  ;;  %v1133_v11 = vpop.f32.mrb[35].mxu0  ;;  %v1584_v23 = vsel %vm1514_vm2, %v4528_v8, 0.0  ;;  %1885 = vst.msk [vmem:[#allocation2 + $0x340] sm:$0xff] %vm1514_vm2, %v5322_v5  ;;  %v5329_v7 = vpop.f32.mrb[30].mxu1 }
 0x13a   : > { %v1580_v14 = vsel %vm1514_vm2, %v1133_v11, 0.0  ;;  %1814 = vst.msk [vmem:[#allocation2 + $0x108] sm:$0xff] %vm1514_vm2, %v1133_v11  ;;  %1888 = vst.msk [vmem:[#allocation2 + $0x358] sm:$0xff] %vm1514_vm2, %v5329_v7 }
 0x13b   : > { %v1581_v17 = vadd.f32 %v1580_v14, %v1579_v10  ;;  %v5333_v10 = vpop.f32.mrb[31].mxu1 }
 0x13c   : > { %1886 = vst.msk [vmem:[#allocation2 + $0x348] sm:$0xff] %vm1514_vm2, %v5333_v10 }
 0x13d   : > { %v1583_v22 = vadd.f32 %v1582_v21, %v1581_v17 }
 0x13e   : > { %v4531_v24 = vpop.f32.mrb[36].mxu0 }
 0x13f   : > { %1819 = vst.msk [vmem:[#allocation2 + $0x130] sm:$0xff] %vm1514_vm2, %v4531_v24  ;;  %v1146_v25 = vpop.f32.mrb[37].mxu0  ;;  %v1585_v26 = vadd.f32 %v1584_v23, %v1583_v22  ;;  %v1590_v41 = vsel %vm1514_vm2, %v4531_v24, 0.0 }
 0x140   : > { %v1586_v27 = vsel %vm1514_vm2, %v1146_v25, 0.0  ;;  %1817 = vst.msk [vmem:[#allocation2 + $0x120] sm:$0xff] %vm1514_vm2, %v1146_v25  ;;  %v4532_v28 = vpop.f32.mrb[38].mxu0 }
 0x141   : > { %v1587_v31 = vadd.f32 %v1586_v27, %v1585_v26  ;;  %1820 = vst.msk [vmem:[#allocation2 + $0x138] sm:$0xff] %vm1514_vm2, %v4532_v28  ;;  %v1149_v33 = vpop.f32.mrb[39].mxu0  ;;  %v1592_v49 = vsel %vm1514_vm2, %v4532_v28, 0.0  ;;  %v5342_v26 = vpop.f32.mrb[32].mxu1 }
 0x142   : > { %v1588_v37 = vsel %vm1514_vm2, %v1149_v33, 0.0  ;;  %1818 = vst.msk [vmem:[#allocation2 + $0x128] sm:$0xff] %vm1514_vm2, %v1149_v33  ;;  %1891 = vst.msk [vmem:[#allocation2 + $0x370] sm:$0xff] %vm1514_vm2, %v5342_v26 }
 0x143   : > { %v1589_v39 = vadd.f32 %v1588_v37, %v1587_v31  ;;  %v5347_v31 = vpop.f32.mrb[33].mxu1 }
 0x144   : > { %1889 = vst.msk [vmem:[#allocation2 + $0x360] sm:$0xff] %vm1514_vm2, %v5347_v31  ;;  %v5353_v37 = vpop.f32.mrb[34].mxu1 }
 0x145   : > { %v1591_v42 = vadd.f32 %v1590_v41, %v1589_v39  ;;  %1892 = vst.msk [vmem:[#allocation2 + $0x378] sm:$0xff] %vm1514_vm2, %v5353_v37  ;;  %v5357_v41 = vpop.f32.mrb[35].mxu1 }
 0x146   : > { %v4535_v51 = vpop.f32.mrb[40].mxu0  ;;  %1890 = vst.msk [vmem:[#allocation2 + $0x368] sm:$0xff] %vm1514_vm2, %v5357_v41 }
 0x147   : > { %1823 = vst.msk [vmem:[#allocation2 + $0x150] sm:$0xff] %vm1514_vm2, %v4535_v51  ;;  %v1162_v55 = vpop.f32.mrb[41].mxu0  ;;  %v1593_v57 = vadd.f32 %v1592_v49, %v1591_v42  ;;  %v1598_v11 = vsel %vm1514_vm2, %v4535_v51, 0.0 }
 0x148   : > { %v1594_v59 = vsel %vm1514_vm2, %v1162_v55, 0.0  ;;  %1821 = vst.msk [vmem:[#allocation2 + $0x140] sm:$0xff] %vm1514_vm2, %v1162_v55  ;;  %v4536_v62 = vpop.f32.mrb[42].mxu0 }
 0x149   : > { %v1595_v1 = vadd.f32 %v1594_v59, %v1593_v57  ;;  %1824 = vst.msk [vmem:[#allocation2 + $0x158] sm:$0xff] %vm1514_vm2, %v4536_v62  ;;  %v1165_v3 = vpop.f32.mrb[43].mxu0  ;;  %v1600_v17 = vsel %vm1514_vm2, %v4536_v62, 0.0  ;;  %v5366_v62 = vpop.f32.mrb[36].mxu1 }
 0x14a   : > { %v1596_v6 = vsel %vm1514_vm2, %v1165_v3, 0.0  ;;  %1822 = vst.msk [vmem:[#allocation2 + $0x148] sm:$0xff] %vm1514_vm2, %v1165_v3  ;;  %1895 = vst.msk [vmem:[#allocation2 + $0x390] sm:$0xff] %vm1514_vm2, %v5366_v62 }
 0x14b   : > { %v1597_v8 = vadd.f32 %v1596_v6, %v1595_v1  ;;  %v5371_v6 = vpop.f32.mrb[37].mxu1 }
 0x14c   : > { %1893 = vst.msk [vmem:[#allocation2 + $0x380] sm:$0xff] %vm1514_vm2, %v5371_v6 }
 0x14d   : > { %v1599_v14 = vadd.f32 %v1598_v11, %v1597_v8  ;;  %v5377_v11 = vpop.f32.mrb[38].mxu1 }
 0x14e   : > { %v4539_v21 = vpop.f32.mrb[44].mxu0  ;;  %1896 = vst.msk [vmem:[#allocation2 + $0x398] sm:$0xff] %vm1514_vm2, %v5377_v11 }
 0x14f   : > { %1827 = vst.msk [vmem:[#allocation2 + $0x170] sm:$0xff] %vm1514_vm2, %v4539_v21  ;;  %v1178_v22 = vpop.f32.mrb[45].mxu0  ;;  %v1601_v23 = vadd.f32 %v1600_v17, %v1599_v14  ;;  %v1606_v42 = vsel %vm1514_vm2, %v4539_v21, 0.0  ;;  %v5381_v17 = vpop.f32.mrb[39].mxu1 }
 0x150   : > { %v1602_v24 = vsel %vm1514_vm2, %v1178_v22, 0.0  ;;  %1825 = vst.msk [vmem:[#allocation2 + $0x160] sm:$0xff] %vm1514_vm2, %v1178_v22  ;;  %v4540_v25 = vpop.f32.mrb[46].mxu0  ;;  %1894 = vst.msk [vmem:[#allocation2 + $0x388] sm:$0xff] %vm1514_vm2, %v5381_v17 }
 0x151   : > { %v1603_v27 = vadd.f32 %v1602_v24, %v1601_v23  ;;  %1828 = vst.msk [vmem:[#allocation2 + $0x178] sm:$0xff] %vm1514_vm2, %v4540_v25  ;;  %v1181_v28 = vpop.f32.mrb[47].mxu0  ;;  %v1608_v47 = vsel %vm1514_vm2, %v4540_v25, 0.0  ;;  %v1917_v23 = vld [vmem:[%s7965_s2 + $0x20] sm:$0xff]  ;;  %v1918_v24 = vld [vmem:[%s7965_s2 + $0x28] sm:$0xff] }
 0x152   : > { %v1604_v33 = vsel %vm1514_vm2, %v1181_v28, 0.0  ;;  %1826 = vst.msk [vmem:[#allocation2 + $0x168] sm:$0xff] %vm1514_vm2, %v1181_v28  ;;  %v5393_v28 = vpack.c.bf16 %v1918_v24, %v1917_v23 }
 0x153   : > { %v1605_v39 = vadd.f32 %v1604_v33, %v1603_v27 }
 0x154   : > { %8136 = vst [vmem:[#allocation6_spill] sm:$0xff] %v5393_v28  ;;  %4689 = vmatpush3.bf16.msra.mxu1 %v5393_v28 }
 0x155   : > { %v1607_v46 = vadd.f32 %v1606_v42, %v1605_v39  ;;  %4690 = vmatprep.subr.bf16.mxu1 %v7970_v43 }
 0x156   : > { %v4543_v49 = vpop.f32.mrb[48].mxu0 }
 0x157   : > { %1831 = vst.msk [vmem:[#allocation2 + $0x190] sm:$0xff] %vm1514_vm2, %v4543_v49  ;;  %v1194_v51 = vpop.f32.mrb[49].mxu0  ;;  %v1609_v55 = vadd.f32 %v1608_v47, %v1607_v46  ;;  %v1614_v21 = vsel %vm1514_vm2, %v4543_v49, 0.0  ;;  %v5398_v47 = vpop.f32.mrb[40].mxu1 }
 0x158   : > { %v1610_v57 = vsel %vm1514_vm2, %v1194_v51, 0.0  ;;  %1829 = vst.msk [vmem:[#allocation2 + $0x180] sm:$0xff] %vm1514_vm2, %v1194_v51  ;;  %v4544_v59 = vpop.f32.mrb[50].mxu0  ;;  %1899 = vst.msk [vmem:[#allocation2 + $0x3b0] sm:$0xff] %vm1514_vm2, %v5398_v47 }
 0x159   : > { %v1611_v1 = vadd.f32 %v1610_v57, %v1609_v55  ;;  %1832 = vst.msk [vmem:[#allocation2 + $0x198] sm:$0xff] %vm1514_vm2, %v4544_v59  ;;  %v1197_v3 = vpop.f32.mrb[51].mxu0  ;;  %v1616_v25 = vsel %vm1514_vm2, %v4544_v59, 0.0  ;;  %v5404_v55 = vpop.f32.mrb[41].mxu1 }
 0x15a   : > { %v1612_v8 = vsel %vm1514_vm2, %v1197_v3, 0.0  ;;  %1830 = vst.msk [vmem:[#allocation2 + $0x188] sm:$0xff] %vm1514_vm2, %v1197_v3  ;;  %1897 = vst.msk [vmem:[#allocation2 + $0x3a0] sm:$0xff] %vm1514_vm2, %v5404_v55  ;;  %v5411_v59 = vpop.f32.mrb[42].mxu1 }
 0x15b   : > { %v1613_v14 = vadd.f32 %v1612_v8, %v1611_v1  ;;  %1900 = vst.msk [vmem:[#allocation2 + $0x3b8] sm:$0xff] %vm1514_vm2, %v5411_v59  ;;  %v5415_v3 = vpop.f32.mrb[43].mxu1 }
 0x15c   : > { %1898 = vst.msk [vmem:[#allocation2 + $0x3a8] sm:$0xff] %vm1514_vm2, %v5415_v3 }
 0x15d   : > { %v1615_v22 = vadd.f32 %v1614_v21, %v1613_v14 }
 0x15e   : > { %v4547_v27 = vpop.f32.mrb[52].mxu0 }
 0x15f   : > { %1835 = vst.msk [vmem:[#allocation2 + $0x1b0] sm:$0xff] %vm1514_vm2, %v4547_v27  ;;  %v1210_v33 = vpop.f32.mrb[53].mxu0  ;;  %v1617_v39 = vadd.f32 %v1616_v25, %v1615_v22  ;;  %v1622_v8 = vsel %vm1514_vm2, %v4547_v27, 0.0 }
 0x160   : > { %v1618_v42 = vsel %vm1514_vm2, %v1210_v33, 0.0  ;;  %1833 = vst.msk [vmem:[#allocation2 + $0x1a0] sm:$0xff] %vm1514_vm2, %v1210_v33  ;;  %v4548_v46 = vpop.f32.mrb[54].mxu0 }
 0x161   : > { %v1619_v49 = vadd.f32 %v1618_v42, %v1617_v39  ;;  %1836 = vst.msk [vmem:[#allocation2 + $0x1b8] sm:$0xff] %vm1514_vm2, %v4548_v46  ;;  %v1213_v51 = vpop.f32.mrb[55].mxu0  ;;  %v1624_v21 = vsel %vm1514_vm2, %v4548_v46, 0.0  ;;  %v5424_v39 = vpop.f32.mrb[44].mxu1 }
 0x162   : > { %v1620_v57 = vsel %vm1514_vm2, %v1213_v51, 0.0  ;;  %1834 = vst.msk [vmem:[#allocation2 + $0x1a8] sm:$0xff] %vm1514_vm2, %v1213_v51  ;;  %1903 = vst.msk [vmem:[#allocation2 + $0x3d0] sm:$0xff] %vm1514_vm2, %v5424_v39  ;;  %v5429_v46 = vpop.f32.mrb[45].mxu1 }
 0x163   : > { %v1621_v1 = vadd.f32 %v1620_v57, %v1619_v49  ;;  %1901 = vst.msk [vmem:[#allocation2 + $0x3c0] sm:$0xff] %vm1514_vm2, %v5429_v46  ;;  %v5435_v51 = vpop.f32.mrb[46].mxu1 }
 0x164   : > { %1904 = vst.msk [vmem:[#allocation2 + $0x3d8] sm:$0xff] %vm1514_vm2, %v5435_v51 }
 0x165   : > { %v1623_v14 = vadd.f32 %v1622_v8, %v1621_v1  ;;  %v5439_v1 = vpop.f32.mrb[47].mxu1 }
 0x166   : > { %v4551_v22 = vpop.f32.mrb[56].mxu0  ;;  %1902 = vst.msk [vmem:[#allocation2 + $0x3c8] sm:$0xff] %vm1514_vm2, %v5439_v1 }
 0x167   : > { %1839 = vst.msk [vmem:[#allocation2 + $0x1d0] sm:$0xff] %vm1514_vm2, %v4551_v22  ;;  %v1226_v23 = vpop.f32.mrb[57].mxu0  ;;  %v1625_v24 = vadd.f32 %v1624_v21, %v1623_v14  ;;  %v1630_v8 = vsel %vm1514_vm2, %v4551_v22, 0.0 }
 0x168   : > { %v1626_v25 = vsel %vm1514_vm2, %v1226_v23, 0.0  ;;  %1837 = vst.msk [vmem:[#allocation2 + $0x1c0] sm:$0xff] %vm1514_vm2, %v1226_v23  ;;  %v4552_v33 = vpop.f32.mrb[58].mxu0 }
 0x169   : > { %v1627_v42 = vadd.f32 %v1626_v25, %v1625_v24  ;;  %1840 = vst.msk [vmem:[#allocation2 + $0x1d8] sm:$0xff] %vm1514_vm2, %v4552_v33  ;;  %v1229_v27 = vpop.f32.mrb[59].mxu0  ;;  %v1632_v21 = vsel %vm1514_vm2, %v4552_v33, 0.0 }
 0x16a   : > { %v1628_v49 = vsel %vm1514_vm2, %v1229_v27, 0.0  ;;  %1838 = vst.msk [vmem:[#allocation2 + $0x1c8] sm:$0xff] %vm1514_vm2, %v1229_v27 }
 0x16b   : > { %v1629_v57 = vadd.f32 %v1628_v49, %v1627_v42  ;;  %v5448_v49 = vpop.f32.mrb[48].mxu1 }
 0x16c   : > { %8137 = vst [vmem:[#allocation7_spill] sm:$0xff] %v5448_v49  ;;  %1907 = vst.msk [vmem:[#allocation2 + $0x3f0] sm:$0xff] %vm1514_vm2, %v5448_v49  ;;  %v5453_v33 = vpop.f32.mrb[49].mxu1  ;;  %v7977_v49 = vmov 0.0  }
 0x16d   : > { %v1631_v14 = vadd.f32 %v1630_v8, %v1629_v57  ;;  %8138 = vst [vmem:[#allocation8_spill] sm:$0xff] %v5453_v33  ;;  %1905 = vst.msk [vmem:[#allocation2 + $0x3e0] sm:$0xff] %vm1514_vm2, %v5453_v33  ;;  %v5459_v8 = vpop.f32.mrb[50].mxu1 }
 0x16e   : > { %v4555_v23 = vpop.f32.mrb[60].mxu0  ;;  %8139 = vst [vmem:[#allocation9_spill] sm:$0xff] %v5459_v8  ;;  %1908 = vst.msk [vmem:[#allocation2 + $0x3f8] sm:$0xff] %vm1514_vm2, %v5459_v8 }
 0x16f   : > { %1843 = vst.msk [vmem:[#allocation2 + $0x1f0] sm:$0xff] %vm1514_vm2, %v4555_v23  ;;  %v1242_v24 = vpop.f32.mrb[61].mxu0  ;;  %v1633_v25 = vadd.f32 %v1632_v21, %v1631_v14  ;;  %v5463_v21 = vpop.f32.mrb[51].mxu1 }
 0x170   : > { %v1634_v42 = vsel %vm1514_vm2, %v1242_v24, 0.0  ;;  %1841 = vst.msk [vmem:[#allocation2 + $0x1e0] sm:$0xff] %vm1514_vm2, %v1242_v24  ;;  %v4556_v27 = vpop.f32.mrb[62].mxu0  ;;  %8140 = vst [vmem:[#allocation10_spill] sm:$0xff] %v5463_v21  ;;  %v1638_v24 = vsel %vm1514_vm2, %v4555_v23, 0.0 }
 0x171   : > { %v1635_v43 = vadd.f32 %v1634_v42, %v1633_v25  ;;  %1844 = vst.msk [vmem:[#allocation2 + $0x1f8] sm:$0xff] %vm1514_vm2, %v4556_v27  ;;  %v1245_v22 = vpop.f32.mrb[63].mxu0  ;;  %1906 = vst.msk [vmem:[#allocation2 + $0x3e8] sm:$0xff] %vm1514_vm2, %v5463_v21  ;;  %v1640_v42 = vsel %vm1514_vm2, %v4556_v27, 0.0 }
 0x172   : > { %v1636_v57 = vsel %vm1514_vm2, %v1245_v22, 0.0  ;;  %1842 = vst.msk [vmem:[#allocation2 + $0x1e8] sm:$0xff] %vm1514_vm2, %v1245_v22 }
 0x173   : > { %v1637_v14 = vadd.f32 %v1636_v57, %v1635_v43  ;;  %286 = vst.msk [vmem:[#allocation3] sm:$0x1] %vm285_vm3, %v7977_v49 }
 0x175   : > { %v1639_v25 = vadd.f32 %v1638_v24, %v1637_v14 }
 0x176   : > { %v4559_v22 = vpop.f32.mrb[64].mxu0 }
 0x177   : > { %1847 = vst.msk [vmem:[#allocation2 + $0x210] sm:$0xff] %vm1514_vm2, %v4559_v22  ;;  %v1258_v28 = vpop.f32.mrb[65].mxu0  ;;  %v1641_v54 = vadd.f32 %v1640_v42, %v1639_v25  ;;  %v1646_v27 = vsel %vm1514_vm2, %v4559_v22, 0.0 }
 0x178   : > { %v1642_v43 = vsel %vm1514_vm2, %v1258_v28, 0.0  ;;  %1845 = vst.msk [vmem:[#allocation2 + $0x200] sm:$0xff] %vm1514_vm2, %v1258_v28  ;;  %v4560_v57 = vpop.f32.mrb[66].mxu0 }
 0x179   : > { %v1643_v44 = vadd.f32 %v1642_v43, %v1641_v54  ;;  %1848 = vst.msk [vmem:[#allocation2 + $0x218] sm:$0xff] %vm1514_vm2, %v4560_v57  ;;  %v1261_v23 = vpop.f32.mrb[67].mxu0  ;;  %v1648_v28 = vsel %vm1514_vm2, %v4560_v57, 0.0  ;;  %v1919_v57 = vld [vmem:[%s7965_s2 + $0x30] sm:$0xff] }
 0x17a   : > { %v1644_v8 = vsel %vm1514_vm2, %v1261_v23, 0.0  ;;  %1846 = vst.msk [vmem:[#allocation2 + $0x208] sm:$0xff] %vm1514_vm2, %v1261_v23 }
 0x17b   : > { %v1645_v14 = vadd.f32 %v1644_v8, %v1643_v44 }
 0x17d   : > { %v1647_v24 = vadd.f32 %v1646_v27, %v1645_v14  ;;  %v1920_v27 = vld [vmem:[%s7965_s2 + $0x38] sm:$0xff] }
 0x17e   : > { %v4563_v25 = vpop.f32.mrb[68].mxu0 }
 0x17f   : > { %1851 = vst.msk [vmem:[#allocation2 + $0x230] sm:$0xff] %vm1514_vm2, %v4563_v25  ;;  %v1274_v54 = vpop.f32.mrb[69].mxu0  ;;  %v1649_v42 = vadd.f32 %v1648_v28, %v1647_v24  ;;  %v1654_v24 = vsel %vm1514_vm2, %v4563_v25, 0.0  ;;  %v5492_v28 = vpack.c.bf16 %v1920_v27, %v1919_v57  ;;  %v8143_v25 = vmov 0.0  }
 0x180   : > { %v1650_v43 = vsel %vm1514_vm2, %v1274_v54, 0.0  ;;  %1849 = vst.msk [vmem:[#allocation2 + $0x220] sm:$0xff] %vm1514_vm2, %v1274_v54  ;;  %v4564_v44 = vpop.f32.mrb[70].mxu0  ;;  %4637 = vmatprep.mubr.msk.f32.mxu1 %vm4895_vm4, %v8143_v25  ;;  %v1670_v25 = vsel %vm1514_vm2, %v5129_v45, 0.0  ;;  %v1680_v45 = vsel %vm1514_vm2, %v5164_v2, 0.0 }
 0x181   : > { %v1651_v8 = vadd.f32 %v1650_v43, %v1649_v42  ;;  %1852 = vst.msk [vmem:[#allocation2 + $0x238] sm:$0xff] %vm1514_vm2, %v4564_v44  ;;  %v1277_v22 = vpop.f32.mrb[71].mxu0  ;;  %8141 = vst [vmem:[#allocation11_spill] sm:$0xff] %v5492_v28  ;;  %v1656_v42 = vsel %vm1514_vm2, %v4564_v44, 0.0  ;;  %4692 = vmatpush3.bf16.msra.mxu1 %v5492_v28 }
 0x182   : > { %v1652_v23 = vsel %vm1514_vm2, %v1277_v22, 0.0  ;;  %1850 = vst.msk [vmem:[#allocation2 + $0x228] sm:$0xff] %vm1514_vm2, %v1277_v22 }
 0x183   : > { %v1653_v14 = vadd.f32 %v1652_v23, %v1651_v8  ;;  %v8142_v23 = vmov 0.0|0.0  }
 0x184   : > { %4693 = vmatprep.subr.bf16.mxu1 %v8142_v23 }
 0x185   : > { %v1655_v54 = vadd.f32 %v1654_v24, %v1653_v14 }
 0x186   : > { %v4567_v43 = vpop.f32.mrb[72].mxu0 }
 0x187   : > { %1855 = vst.msk [vmem:[#allocation2 + $0x250] sm:$0xff] %vm1514_vm2, %v4567_v43  ;;  %v1290_v8 = vpop.f32.mrb[73].mxu0  ;;  %v1657_v22 = vadd.f32 %v1656_v42, %v1655_v54  ;;  %v1662_v24 = vsel %vm1514_vm2, %v4567_v43, 0.0  ;;  %v1674_v43 = vsel %vm1514_vm2, %v5158_v0, 0.0  ;;  %v1684_v0 = vsel %vm1514_vm2, %v5192_v20, 0.0 }
 0x188   : > { %v1658_v49 = vsel %vm1514_vm2, %v1290_v8, 0.0  ;;  %1853 = vst.msk [vmem:[#allocation2 + $0x240] sm:$0xff] %vm1514_vm2, %v1290_v8  ;;  %v4568_v21 = vpop.f32.mrb[74].mxu0  ;;  %v1666_v8 = vsel %vm1514_vm2, %v5134_v48, 0.0  ;;  %v1676_v48 = vsel %vm1514_vm2, %v5168_v4, 0.0  ;;  %v1686_v4 = vsel %vm1514_vm2, %v5177_v13, 0.0 }
 0x189   : > { %v1659_v14 = vadd.f32 %v1658_v49, %v1657_v22  ;;  %1856 = vst.msk [vmem:[#allocation2 + $0x258] sm:$0xff] %vm1514_vm2, %v4568_v21  ;;  %v1293_v44 = vpop.f32.mrb[75].mxu0  ;;  %v1664_v42 = vsel %vm1514_vm2, %v4568_v21, 0.0  ;;  %v1668_v49 = vsel %vm1514_vm2, %v5144_v52, 0.0  ;;  %v1678_v52 = vsel %vm1514_vm2, %v5153_v61, 0.0 }
 0x18a   : > { %v1660_v57 = vsel %vm1514_vm2, %v1293_v44, 0.0  ;;  %1854 = vst.msk [vmem:[#allocation2 + $0x248] sm:$0xff] %vm1514_vm2, %v1293_v44  ;;  %v1688_v61 = vsel %vm1514_vm2, %v5188_v18, 0.0  ;;  %v1694_v20 = vsel %vm1514_vm2, %v5201_v29, 0.0  ;;  %v1696_v13 = vsel %vm1514_vm2, %v5212_v34, 0.0 }
 0x18b   : > { %v1661_v27 = vadd.f32 %v1660_v57, %v1659_v14  ;;  %v1672_v14 = vsel %vm1514_vm2, %v5140_v50, 0.0  ;;  %v1704_v29 = vsel %vm1514_vm2, %v5247_v58, 0.0 }
 0x18d   : > { %v1663_v54 = vadd.f32 %v1662_v24, %v1661_v27  ;;  %v1690_v24 = vsel %vm1514_vm2, %v5206_v32, 0.0  ;;  %v1700_v32 = vsel %vm1514_vm2, %v5251_v60, 0.0  ;;  %v1710_v60 = vsel %vm1514_vm2, %v5260_v9, 0.0 }
 0x18e   : > { %v1720_v9 = vsel %vm1514_vm2, %v5295_v38, 0.0 }
 0x18f   : > { %v1665_v28 = vadd.f32 %v1664_v42, %v1663_v54 }
 0x191   : > { %v1667_v23 = vadd.f32 %v1666_v8, %v1665_v28 }
 0x193   : > { %v1669_v22 = vadd.f32 %v1668_v49, %v1667_v23  ;;  %v1698_v49 = vsel %vm1514_vm2, %v5240_v56, 0.0  ;;  %v1708_v56 = vsel %vm1514_vm2, %v5275_v19, 0.0  ;;  %v1718_v19 = vsel %vm1514_vm2, %v5284_v30, 0.0 }
 0x194   : > { %v1728_v30 = vsel %vm1514_vm2, %v5329_v7, 0.0 }
 0x195   : > { %v1671_v33 = vadd.f32 %v1670_v25, %v1669_v22  ;;  %v1682_v25 = vsel %vm1514_vm2, %v5182_v16, 0.0  ;;  %v1692_v16 = vsel %vm1514_vm2, %v5216_v36, 0.0  ;;  %v1702_v36 = vsel %vm1514_vm2, %v5235_v53, 0.0 }
 0x196   : > { %v1712_v53 = vsel %vm1514_vm2, %v5271_v15, 0.0 }
 0x197   : > { %v1673_v21 = vadd.f32 %v1672_v14, %v1671_v33 }
 0x199   : > { %v1675_v44 = vadd.f32 %v1674_v43, %v1673_v21  ;;  %v1706_v21 = vsel %vm1514_vm2, %v5265_v12, 0.0  ;;  %v1716_v12 = vsel %vm1514_vm2, %v5299_v40, 0.0  ;;  %v1726_v40 = vsel %vm1514_vm2, %v5317_v63, 0.0 }
 0x19a   : > { %v1736_v63 = vsel %vm1514_vm2, %v5353_v37, 0.0 }
 0x19b   : > { %v1677_v28 = vadd.f32 %v1676_v48, %v1675_v44 }
 0x19d   : > { %v1679_v23 = vadd.f32 %v1678_v52, %v1677_v28  ;;  %v1714_v52 = vsel %vm1514_vm2, %v5289_v35, 0.0  ;;  %v1724_v35 = vsel %vm1514_vm2, %v5333_v10, 0.0  ;;  %v1734_v10 = vsel %vm1514_vm2, %v5342_v26, 0.0 }
 0x19e   : > { %v1744_v26 = vsel %vm1514_vm2, %v5377_v11, 0.0 }
 0x19f   : > { %v1681_v50 = vadd.f32 %v1680_v45, %v1679_v23 }
 0x1a1   : > { %v1683_v57 = vadd.f32 %v1682_v25, %v1681_v50  ;;  %v1722_v50 = vsel %vm1514_vm2, %v5322_v5, 0.0  ;;  %v1732_v5 = vsel %vm1514_vm2, %v5357_v41, 0.0  ;;  %v1742_v41 = vsel %vm1514_vm2, %v5366_v62, 0.0 }
 0x1a2   : > { %v1752_v62 = vsel %vm1514_vm2, %v5411_v59, 0.0 }
 0x1a3   : > { %v1685_v33 = vadd.f32 %v1684_v0, %v1683_v57 }
 0x1a5   : > { %v1687_v27 = vadd.f32 %v1686_v4, %v1685_v33  ;;  %v1730_v4 = vsel %vm1514_vm2, %v5347_v31, 0.0  ;;  %v1740_v31 = vsel %vm1514_vm2, %v5381_v17, 0.0  ;;  %v1750_v17 = vsel %vm1514_vm2, %v5398_v47, 0.0 }
 0x1a6   : > { %v1760_v47 = vsel %vm1514_vm2, %v5435_v51, 0.0 }
 0x1a7   : > { %v1689_v2 = vadd.f32 %v1688_v61, %v1687_v27 }
 0x1a9   : > { %v1691_v54 = vadd.f32 %v1690_v24, %v1689_v2  ;;  %v1738_v2 = vsel %vm1514_vm2, %v5371_v6, 0.0  ;;  %v1748_v6 = vsel %vm1514_vm2, %v5415_v3, 0.0  ;;  %v1758_v3 = vsel %vm1514_vm2, %v5424_v39, 0.0 }
 0x1ab   : > { %v1693_v42 = vadd.f32 %v1692_v16, %v1691_v54 }
 0x1ad   : > { %v1695_v8 = vadd.f32 %v1694_v20, %v1693_v42  ;;  %v1746_v20 = vsel %vm1514_vm2, %v5404_v55, 0.0  ;;  %v1756_v55 = vsel %vm1514_vm2, %v5439_v1, 0.0 }
 0x1af   : > { %v1697_v18 = vadd.f32 %v1696_v13, %v1695_v8 }
 0x1b1   : > { %v1699_v22 = vadd.f32 %v1698_v49, %v1697_v18  ;;  %v1754_v18 = vsel %vm1514_vm2, %v5429_v46, 0.0 }
 0x1b3   : > { %v1701_v14 = vadd.f32 %v1700_v32, %v1699_v22 }
 0x1b5   : > { %v1703_v43 = vadd.f32 %v1702_v36, %v1701_v14  ;;  %v8144_v36 = vld [vmem:[#allocation8_spill] sm:$0xff] }
 0x1b7   : > { %v1705_v34 = vadd.f32 %v1704_v29, %v1703_v43  ;;  %v1762_v43 = vsel %vm1514_vm2, %v8144_v36, 0.0 }
 0x1b9   : > { %v1707_v44 = vadd.f32 %v1706_v21, %v1705_v34  ;;  %v8145_v21 = vld [vmem:[#allocation10_spill] sm:$0xff] }
 0x1ba   : > { %v1764_v46 = vsel %vm1514_vm2, %v8145_v21, 0.0 }
 0x1bb   : > { %v1709_v48 = vadd.f32 %v1708_v56, %v1707_v44  ;;  %v8146_v44 = vld [vmem:[#allocation7_spill] sm:$0xff] }
 0x1bc   : > { %v1766_v1 = vsel %vm1514_vm2, %v8146_v44, 0.0 }
 0x1bd   : > { %v1711_v28 = vadd.f32 %v1710_v60, %v1709_v48  ;;  %v8147_v48 = vld [vmem:[#allocation9_spill] sm:$0xff] }
 0x1be   : > { %v1768_v39 = vsel %vm1514_vm2, %v8147_v48, 0.0 }
 0x1bf   : > { %v1713_v58 = vadd.f32 %v1712_v53, %v1711_v28 }
 0x1c1   : > { %v1715_v23 = vadd.f32 %v1714_v52, %v1713_v58 }
 0x1c3   : > { %v1717_v45 = vadd.f32 %v1716_v12, %v1715_v23  ;;  %v1513_v23 = vld [vmem:[#allocation3] sm:$0x1] }
 0x1c5   : > { %v1719_v25 = vadd.f32 %v1718_v19, %v1717_v45  ;;  %v1994_v19 = vld [vmem:[%s7966_s3] sm:$0xff] }
 0x1c7   : > { %v1721_v15 = vadd.f32 %v1720_v9, %v1719_v25  ;;  %v1995_v25 = vld [vmem:[%s7966_s3 + $0x8] sm:$0xff] }
 0x1c8   : > { %v5618_v9 = vpack.c.bf16 %v1995_v25, %v1994_v19  ;;  %v2083_v19 = vld [vmem:[#allocation2 + $0x58] sm:$0xff] }
 0x1c9   : > { %v1723_v57 = vadd.f32 %v1722_v50, %v1721_v15  ;;  %v1996_v50 = vld [vmem:[%s7966_s3 + $0x10] sm:$0xff]  ;;  %v1997_v15 = vld [vmem:[%s7966_s3 + $0x18] sm:$0xff] }
 0x1cb   : > { %v1725_v0 = vadd.f32 %v1724_v35, %v1723_v57  ;;  %v5628_v35 = vpack.c.bf16 %v1997_v15, %v1996_v50 }
 0x1cd   : > { %v1727_v33 = vadd.f32 %v1726_v40, %v1725_v0  ;;  %v8148_v0 = vmov 0.0   ;;  %v8149_v40 = vmov 0.0|0.0  }
 0x1cf   : > { %v1729_v38 = vadd.f32 %v1728_v30, %v1727_v33 }
 0x1d1   : > { %v1731_v27 = vadd.f32 %v1730_v4, %v1729_v38  ;;  %v8150_v4 = vld [vmem:[#allocation4_spill] sm:$0xff]  ;;  %v8151_v38 = vld [vmem:[#allocation5_spill] sm:$0xff] }
 0x1d3   : > { %v1733_v61 = vadd.f32 %v1732_v5, %v1731_v27  ;;  %v8152_v27 = vld [vmem:[#allocation6_spill] sm:$0xff]  ;;  %v8153_v5 = vld [vmem:[#allocation11_spill] sm:$0xff] }
 0x1d5   : > { %v1735_v24 = vadd.f32 %v1734_v10, %v1733_v61 }
 0x1d7   : > { %v1737_v7 = vadd.f32 %v1736_v63, %v1735_v24  ;;  %v2200_v24 = vlaneseq }
 0x1d9   : > { %v1739_v54 = vadd.f32 %v1738_v2, %v1737_v7  ;;  %v2201_v63 = vshrl.u32 %v2200_v24, 7 }
 0x1db   : > { %v1741_v16 = vadd.f32 %v1740_v31, %v1739_v54  ;;  %v5648_v2 = vsub.s32 0, %v2201_v63  ;;  %v2072_v54 = vld [vmem:[#allocation2] sm:$0xff]  ;;  %v2073_v31 = vld [vmem:[#allocation2 + $0x8] sm:$0xff] }
 0x1dd   : > { %v1743_v42 = vadd.f32 %v1742_v41, %v1741_v16 }
 0x1df   : > { %v1745_v37 = vadd.f32 %v1744_v26, %v1743_v42  ;;  %v2074_v42 = vld [vmem:[#allocation2 + $0x10] sm:$0xff] }
 0x1e1   : > { %v1747_v8 = vadd.f32 %v1746_v20, %v1745_v37  ;;  %v2075_v20 = vld [vmem:[#allocation2 + $0x18] sm:$0xff] }
 0x1e3   : > { %v1749_v13 = vadd.f32 %v1748_v6, %v1747_v8 }
 0x1e5   : > { %v1751_v49 = vadd.f32 %v1750_v17, %v1749_v13  ;;  %v2076_v13 = vld [vmem:[#allocation2 + $0x20] sm:$0xff] }
 0x1e7   : > { %v1753_v11 = vadd.f32 %v1752_v62, %v1751_v49  ;;  %v2077_v62 = vld [vmem:[#allocation2 + $0x28] sm:$0xff] }
 0x1e9   : > { %v1755_v22 = vadd.f32 %v1754_v18, %v1753_v11 }
 0x1eb   : > { %v1757_v32 = vadd.f32 %v1756_v55, %v1755_v22 }
 0x1ed   : > { %v1759_v14 = vadd.f32 %v1758_v3, %v1757_v32  ;;  %v2078_v32 = vld [vmem:[#allocation2 + $0x30] sm:$0xff] }
 0x1ef   : > { %v1761_v59 = vadd.f32 %v1760_v47, %v1759_v14 }
 0x1f1   : > { %v1763_v29 = vadd.f32 %v1762_v43, %v1761_v59  ;;  %v2079_v43 = vld [vmem:[#allocation2 + $0x38] sm:$0xff] }
 0x1f3   : > { %v1765_v34 = vadd.f32 %v1764_v46, %v1763_v29 }
 0x1f5   : > { %v1767_v56 = vadd.f32 %v1766_v1, %v1765_v34  ;;  %v2080_v34 = vld [vmem:[#allocation2 + $0x40] sm:$0xff] }
 0x1f7   : > { %v1769_v60 = vadd.f32 %v1768_v39, %v1767_v56  ;;  %v2081_v39 = vld [vmem:[#allocation2 + $0x48] sm:$0xff] }
 0x1f9   : > { %v1770_v28 = vrot.slane %v1769_v60, 4 }
 0x1fb   : > { %v1771_v53 = vadd.f32 %v1770_v28, %v1769_v60 }
 0x1fd   : > { %v1772_v51 = vrot.slane %v1771_v53, 2 }
 0x1ff   : > { %v1773_v52 = vadd.f32 %v1772_v51, %v1771_v53 }
 0x201   : > { %v1774_v58 = vrot.slane %v1773_v52, 1 }
 0x203   : > { %v1775_v12 = vadd.f32 %v1774_v58, %v1773_v52  ;;  %v2082_v52 = vld [vmem:[#allocation2 + $0x50] sm:$0xff] }
 0x205   : > { %v1776_v45 = vadd.f32 %v1775_v12, %v1513_v23 }
 0x207   : > { %1778 = vst.msk [vmem:[#allocation3] sm:$0x1] %vm285_vm3, %v1776_v45 }
 0x20e   : > { %v1912_v57 = vld [vmem:[#allocation3] sm:$0x1] }
 0x20f   : > { %4638 = vmatmul.mubr.msk.f32.vlgmr.msra.gmra.mrb[52].mxu1 %vm1514_vm2, %v1912_v57 }
 0x210   : > { %4695 = vmatpush3.bf16.msra.mxu1 %v5618_v9  ;;  %4648 = vmatprep.mubr.msk.f32.mxu1 %vm4895_vm4, %v8148_v0 }
 0x211   : > { %4696 = vmatprep.subr.bf16.mxu1 %v8149_v40 }
 0x214   : > { %4698 = vmatpush3.bf16.msra.mxu1 %v5628_v35 }
 0x215   : > { %4699 = vmatprep.subr.bf16.mxu1 %v8149_v40 }
 0x2e2   : > { %v1990_v33 = vpop.f32.mrb[52].mxu1 }
 0x2e3   : > { %v4639_v30 = vpop.f32.mrb[53].mxu1  ;;  %4649 = vmatmul.mubr.msk.f32.vlgmr.msra.gmra.mrb[54].mxu1 %vm1998_vm5, %v1990_v33  ;;  %v2084_v33 = vld [vmem:[#allocation2 + $0x60] sm:$0xff] }
 0x2e4   : > { %4701 = vmatpush3.bf16.msra.mxu1 %v8150_v4  ;;  %4667 = vmatprep.mubr.msk.f32.mxu1 %vm4895_vm4, %v8148_v0 }
 0x2e5   : > { %4702 = vmatprep.subr.bf16.mxu1 %v8149_v40 }
 0x2e8   : > { %4704 = vmatpush3.bf16.msra.mxu1 %v8151_v38 }
 0x2e9   : > { %4705 = vmatprep.subr.bf16.mxu1 %v8149_v40 }
 0x2ec   : > { %4707 = vmatpush3.bf16.msra.mxu1 %v8152_v27 }
 0x2ed   : > { %4708 = vmatprep.subr.bf16.mxu1 %v8149_v40 }
 0x2f0   : > { %4710 = vmatpush3.bf16.msra.mxu1 %v8153_v5  ;;  %v2085_v5 = vld [vmem:[#allocation2 + $0x68] sm:$0xff] }
 0x2f1   : > { %4711 = vmatprep.subr.bf16.mxu1 %v8149_v40 }
 0x3b6   : > { %v5646_v61 = vpop.f32.mrb[54].mxu1 }
 0x3b7   : > { %v4650_v10 = vpop.f32.mrb[55].mxu1  ;;  %v5652_v7 = vrot.slane %v5646_v61, %v5648_v2 }
 0x3b9   : > { %v2204_v16 = vsub.f32 %v2072_v54, %v5652_v7  ;;  %v2205_v41 = vsub.f32 %v2073_v31, %v5652_v7  ;;  %v2206_v26 = vsub.f32 %v2074_v42, %v5652_v7  ;;  %v2207_v37 = vsub.f32 %v2075_v20, %v5652_v7  ;;  %v2086_v31 = vld [vmem:[#allocation2 + $0x70] sm:$0xff]  ;;  %v2087_v20 = vld [vmem:[#allocation2 + $0x78] sm:$0xff] }
 0x3ba   : > { %v2208_v17 = vsub.f32 %v2076_v13, %v5652_v7  ;;  %v2209_v18 = vsub.f32 %v2077_v62, %v5652_v7  ;;  %v2210_v14 = vsub.f32 %v2078_v32, %v5652_v7  ;;  %v2211_v29 = vsub.f32 %v2079_v43, %v5652_v7 }
 0x3bb   : > { %v2332_v8 = vmul.f32 %v2204_v16, %v2204_v16  ;;  %v2333_v6 = vmul.f32 %v2205_v41, %v2205_v41  ;;  %v2334_v49 = vmul.f32 %v2206_v26, %v2206_v26  ;;  %v2335_v11 = vmul.f32 %v2207_v37, %v2207_v37 }
 0x3bc   : > { %v2336_v47 = vmul.f32 %v2208_v17, %v2208_v17  ;;  %v2337_v21 = vmul.f32 %v2209_v18, %v2209_v18  ;;  %v2212_v1 = vsub.f32 %v2080_v34, %v5652_v7  ;;  %v2338_v56 = vmul.f32 %v2210_v14, %v2210_v14  ;;  %v2088_v17 = vld [vmem:[#allocation2 + $0x80] sm:$0xff] }
 0x3bd   : > { %v2460_v22 = vsel %vm1514_vm2, %v2332_v8, 0.0  ;;  %v2461_v55 = vsel %vm1514_vm2, %v2333_v6, 0.0  ;;  %v2463_v36 = vsel %vm1514_vm2, %v2334_v49, 0.0  ;;  %v2465_v46 = vsel %vm1514_vm2, %v2335_v11, 0.0 }
 0x3be   : > { %v2462_v3 = vadd.f32 %v2461_v55, %v2460_v22  ;;  %v2467_v48 = vsel %vm1514_vm2, %v2336_v47, 0.0  ;;  %v2213_v28 = vsub.f32 %v2081_v39, %v5652_v7  ;;  %v2339_v53 = vmul.f32 %v2211_v29, %v2211_v29  ;;  %v2089_v22 = vld [vmem:[#allocation2 + $0x88] sm:$0xff]  ;;  %v2090_v47 = vld [vmem:[#allocation2 + $0x90] sm:$0xff] }
 0x3bf   : > { %v2469_v51 = vsel %vm1514_vm2, %v2337_v21, 0.0  ;;  %v2214_v23 = vsub.f32 %v2082_v52, %v5652_v7  ;;  %v2340_v12 = vmul.f32 %v2212_v1, %v2212_v1  ;;  %v2471_v45 = vsel %vm1514_vm2, %v2338_v56, 0.0  ;;  %v2091_v21 = vld [vmem:[#allocation2 + $0x98] sm:$0xff]  ;;  %v2092_v56 = vld [vmem:[#allocation2 + $0xa0] sm:$0xff] }
 0x3c0   : > { %v2464_v59 = vadd.f32 %v2463_v36, %v2462_v3  ;;  %v2215_v50 = vsub.f32 %v2083_v19, %v5652_v7  ;;  %v2341_v15 = vmul.f32 %v2213_v28, %v2213_v28  ;;  %v2473_v57 = vsel %vm1514_vm2, %v2339_v53, 0.0  ;;  %v2093_v53 = vld [vmem:[#allocation2 + $0xa8] sm:$0xff] }
 0x3c1   : > { %v2216_v4 = vsub.f32 %v2084_v33, %v5652_v7  ;;  %v2342_v38 = vmul.f32 %v2214_v23, %v2214_v23  ;;  %v2475_v27 = vsel %vm1514_vm2, %v2340_v12, 0.0  ;;  %v2217_v24 = vsub.f32 %v2085_v5, %v5652_v7  ;;  %v2094_v12 = vld [vmem:[#allocation2 + $0xb0] sm:$0xff] }
 0x3c2   : > { %v2466_v44 = vadd.f32 %v2465_v46, %v2464_v59  ;;  %v2343_v63 = vmul.f32 %v2215_v50, %v2215_v50  ;;  %v2477_v54 = vsel %vm1514_vm2, %v2341_v15, 0.0  ;;  %v2218_v41 = vsub.f32 %v2086_v31, %v5652_v7  ;;  %v2095_v15 = vld [vmem:[#allocation2 + $0xb8] sm:$0xff] }
 0x3c3   : > { %v2344_v42 = vmul.f32 %v2216_v4, %v2216_v4  ;;  %v2479_v26 = vsel %vm1514_vm2, %v2342_v38, 0.0  ;;  %v2219_v8 = vsub.f32 %v2087_v20, %v5652_v7  ;;  %v2345_v6 = vmul.f32 %v2217_v24, %v2217_v24  ;;  %v2096_v38 = vld [vmem:[#allocation2 + $0xc0] sm:$0xff] }
 0x3c4   : > { %v2468_v60 = vadd.f32 %v2467_v48, %v2466_v44  ;;  %v2481_v13 = vsel %vm1514_vm2, %v2343_v63, 0.0  ;;  %v2220_v62 = vsub.f32 %v2088_v17, %v5652_v7  ;;  %v2346_v18 = vmul.f32 %v2218_v41, %v2218_v41  ;;  %v2097_v63 = vld [vmem:[#allocation2 + $0xc8] sm:$0xff] }
 0x3c5   : > { %v2483_v11 = vsel %vm1514_vm2, %v2344_v42, 0.0  ;;  %v2221_v32 = vsub.f32 %v2089_v22, %v5652_v7  ;;  %v2347_v3 = vmul.f32 %v2219_v8, %v2219_v8  ;;  %v2485_v14 = vsel %vm1514_vm2, %v2345_v6, 0.0  ;;  %v2098_v42 = vld [vmem:[#allocation2 + $0xd0] sm:$0xff]  ;;  %v2099_v6 = vld [vmem:[#allocation2 + $0xd8] sm:$0xff] }
 0x3c6   : > { %v2470_v58 = vadd.f32 %v2469_v51, %v2468_v60  ;;  %v2222_v43 = vsub.f32 %v2090_v47, %v5652_v7  ;;  %v2348_v59 = vmul.f32 %v2220_v62, %v2220_v62  ;;  %v2487_v29 = vsel %vm1514_vm2, %v2346_v18, 0.0  ;;  %v2100_v18 = vld [vmem:[#allocation2 + $0xe0] sm:$0xff] }
 0x3c7   : > { %v2223_v34 = vsub.f32 %v2091_v21, %v5652_v7  ;;  %v2349_v44 = vmul.f32 %v2221_v32, %v2221_v32  ;;  %v2489_v1 = vsel %vm1514_vm2, %v2347_v3, 0.0  ;;  %v2224_v39 = vsub.f32 %v2092_v56, %v5652_v7  ;;  %v2101_v3 = vld [vmem:[#allocation2 + $0xe8] sm:$0xff] }
 0x3c8   : > { %v2472_v25 = vadd.f32 %v2471_v45, %v2470_v58  ;;  %v2350_v60 = vmul.f32 %v2222_v43, %v2222_v43  ;;  %v2491_v28 = vsel %vm1514_vm2, %v2348_v59, 0.0  ;;  %v2225_v52 = vsub.f32 %v2093_v53, %v5652_v7  ;;  %v2102_v59 = vld [vmem:[#allocation2 + $0xf0] sm:$0xff] }
 0x3c9   : > { %v2351_v58 = vmul.f32 %v2223_v34, %v2223_v34  ;;  %v2493_v23 = vsel %vm1514_vm2, %v2349_v44, 0.0  ;;  %v2226_v19 = vsub.f32 %v2094_v12, %v5652_v7  ;;  %v2227_v33 = vsub.f32 %v2095_v15, %v5652_v7  ;;  %v2103_v44 = vld [vmem:[#allocation2 + $0xf8] sm:$0xff] }
 0x3ca   : > { %v2474_v30 = vadd.f32 %v2473_v57, %v2472_v25  ;;  %v2352_v25 = vmul.f32 %v2224_v39, %v2224_v39  ;;  %v2495_v50 = vsel %vm1514_vm2, %v2350_v60, 0.0  ;;  %v2228_v5 = vsub.f32 %v2096_v38, %v5652_v7  ;;  %v2104_v60 = vld [vmem:[#allocation2 + $0x100] sm:$0xff] }
 0x3cb   : > { %v2497_v4 = vsel %vm1514_vm2, %v2351_v58, 0.0  ;;  %v2229_v31 = vsub.f32 %v2097_v63, %v5652_v7  ;;  %v2230_v20 = vsub.f32 %v2098_v42, %v5652_v7  ;;  %v2231_v17 = vsub.f32 %v2099_v6, %v5652_v7  ;;  %v2105_v58 = vld [vmem:[#allocation2 + $0x108] sm:$0xff] }
 0x3cc   : > { %v2476_v10 = vadd.f32 %v2475_v27, %v2474_v30  ;;  %v2353_v30 = vmul.f32 %v2225_v52, %v2225_v52  ;;  %v2499_v24 = vsel %vm1514_vm2, %v2352_v25, 0.0  ;;  %v2232_v22 = vsub.f32 %v2100_v18, %v5652_v7  ;;  %v2106_v25 = vld [vmem:[#allocation2 + $0x110] sm:$0xff] }
 0x3cd   : > { %v2233_v47 = vsub.f32 %v2101_v3, %v5652_v7  ;;  %v2234_v21 = vsub.f32 %v2102_v59, %v5652_v7  ;;  %v2235_v56 = vsub.f32 %v2103_v44, %v5652_v7  ;;  %v2236_v53 = vsub.f32 %v2104_v60, %v5652_v7 }
 0x3ce   : > { %v2478_v16 = vadd.f32 %v2477_v54, %v2476_v10  ;;  %v2354_v10 = vmul.f32 %v2226_v19, %v2226_v19  ;;  %v2501_v41 = vsel %vm1514_vm2, %v2353_v30, 0.0  ;;  %v2237_v12 = vsub.f32 %v2105_v58, %v5652_v7  ;;  %v2107_v30 = vld [vmem:[#allocation2 + $0x118] sm:$0xff] }
 0x3cf   : > { %v2238_v15 = vsub.f32 %v2106_v25, %v5652_v7  ;;  %v2239_v38 = vsub.f32 %v2107_v30, %v5652_v7 }
 0x3d0   : > { %v2480_v37 = vadd.f32 %v2479_v26, %v2478_v16  ;;  %v2355_v16 = vmul.f32 %v2227_v33, %v2227_v33  ;;  %v2503_v8 = vsel %vm1514_vm2, %v2354_v10, 0.0  ;;  %v2108_v10 = vld [vmem:[#allocation2 + $0x120] sm:$0xff] }
 0x3d1   : > { %v2240_v63 = vsub.f32 %v2108_v10, %v5652_v7 }
 0x3d2   : > { %v2482_v49 = vadd.f32 %v2481_v13, %v2480_v37  ;;  %v2356_v37 = vmul.f32 %v2228_v5, %v2228_v5  ;;  %v2505_v62 = vsel %vm1514_vm2, %v2355_v16, 0.0  ;;  %v2109_v16 = vld [vmem:[#allocation2 + $0x128] sm:$0xff] }
 0x3d3   : > { %v2241_v42 = vsub.f32 %v2109_v16, %v5652_v7 }
 0x3d4   : > { %v2484_v55 = vadd.f32 %v2483_v11, %v2482_v49  ;;  %v2357_v49 = vmul.f32 %v2229_v31, %v2229_v31  ;;  %v2507_v32 = vsel %vm1514_vm2, %v2356_v37, 0.0  ;;  %v2110_v37 = vld [vmem:[#allocation2 + $0x130] sm:$0xff] }
 0x3d5   : > { %v2242_v6 = vsub.f32 %v2110_v37, %v5652_v7 }
 0x3d6   : > { %v2486_v36 = vadd.f32 %v2485_v14, %v2484_v55  ;;  %v2358_v55 = vmul.f32 %v2230_v20, %v2230_v20  ;;  %v2509_v43 = vsel %vm1514_vm2, %v2357_v49, 0.0  ;;  %v2111_v49 = vld [vmem:[#allocation2 + $0x138] sm:$0xff] }
 0x3d7   : > { %v2243_v18 = vsub.f32 %v2111_v49, %v5652_v7 }
 0x3d8   : > { %v2488_v46 = vadd.f32 %v2487_v29, %v2486_v36  ;;  %v2359_v36 = vmul.f32 %v2231_v17, %v2231_v17  ;;  %v2511_v34 = vsel %vm1514_vm2, %v2358_v55, 0.0  ;;  %v2112_v55 = vld [vmem:[#allocation2 + $0x140] sm:$0xff] }
 0x3d9   : > { %v2244_v3 = vsub.f32 %v2112_v55, %v5652_v7 }
 0x3da   : > { %v2490_v48 = vadd.f32 %v2489_v1, %v2488_v46  ;;  %v2360_v46 = vmul.f32 %v2232_v22, %v2232_v22  ;;  %v2513_v39 = vsel %vm1514_vm2, %v2359_v36, 0.0  ;;  %v2113_v36 = vld [vmem:[#allocation2 + $0x148] sm:$0xff] }
 0x3db   : > { %v2245_v59 = vsub.f32 %v2113_v36, %v5652_v7 }
 0x3dc   : > { %v2492_v51 = vadd.f32 %v2491_v28, %v2490_v48  ;;  %v2361_v48 = vmul.f32 %v2233_v47, %v2233_v47  ;;  %v2515_v52 = vsel %vm1514_vm2, %v2360_v46, 0.0  ;;  %v5734_v46 = vld [vmem:[#allocation2 + $0x150] sm:$0xff] }
 0x3dd   : > { %v2246_v44 = vsub.f32 %v5734_v46, %v5652_v7 }
 0x3de   : > { %v2494_v45 = vadd.f32 %v2493_v23, %v2492_v51  ;;  %v2362_v51 = vmul.f32 %v2234_v21, %v2234_v21  ;;  %v2517_v19 = vsel %vm1514_vm2, %v2361_v48, 0.0  ;;  %v5739_v48 = vld [vmem:[#allocation2 + $0x158] sm:$0xff] }
 0x3df   : > { %v2247_v60 = vsub.f32 %v5739_v48, %v5652_v7 }
 0x3e0   : > { %v2496_v57 = vadd.f32 %v2495_v50, %v2494_v45  ;;  %v2363_v45 = vmul.f32 %v2235_v56, %v2235_v56  ;;  %v2519_v33 = vsel %vm1514_vm2, %v2362_v51, 0.0  ;;  %v5744_v51 = vld [vmem:[#allocation2 + $0x160] sm:$0xff] }
 0x3e1   : > { %v2248_v58 = vsub.f32 %v5744_v51, %v5652_v7 }
 0x3e2   : > { %v2498_v27 = vadd.f32 %v2497_v4, %v2496_v57  ;;  %v2364_v57 = vmul.f32 %v2236_v53, %v2236_v53  ;;  %v2521_v5 = vsel %vm1514_vm2, %v2363_v45, 0.0  ;;  %v5749_v45 = vld [vmem:[#allocation2 + $0x168] sm:$0xff] }
 0x3e3   : > { %v2249_v25 = vsub.f32 %v5749_v45, %v5652_v7 }
 0x3e4   : > { %v2500_v54 = vadd.f32 %v2499_v24, %v2498_v27  ;;  %v2365_v27 = vmul.f32 %v2237_v12, %v2237_v12  ;;  %v2523_v31 = vsel %vm1514_vm2, %v2364_v57, 0.0  ;;  %v5754_v57 = vld [vmem:[#allocation2 + $0x170] sm:$0xff] }
 0x3e5   : > { %v2250_v30 = vsub.f32 %v5754_v57, %v5652_v7 }
 0x3e6   : > { %v2502_v26 = vadd.f32 %v2501_v41, %v2500_v54  ;;  %v2366_v54 = vmul.f32 %v2238_v15, %v2238_v15  ;;  %v2525_v20 = vsel %vm1514_vm2, %v2365_v27, 0.0  ;;  %v5759_v27 = vld [vmem:[#allocation2 + $0x178] sm:$0xff] }
 0x3e7   : > { %v2251_v10 = vsub.f32 %v5759_v27, %v5652_v7 }
 0x3e8   : > { %v2504_v13 = vadd.f32 %v2503_v8, %v2502_v26  ;;  %v2367_v26 = vmul.f32 %v2239_v38, %v2239_v38  ;;  %v2527_v17 = vsel %vm1514_vm2, %v2366_v54, 0.0  ;;  %v5764_v54 = vld [vmem:[#allocation2 + $0x180] sm:$0xff] }
 0x3e9   : > { %v2252_v16 = vsub.f32 %v5764_v54, %v5652_v7 }
 0x3ea   : > { %v2506_v11 = vadd.f32 %v2505_v62, %v2504_v13  ;;  %v2368_v13 = vmul.f32 %v2240_v63, %v2240_v63  ;;  %v2529_v22 = vsel %vm1514_vm2, %v2367_v26, 0.0  ;;  %v5769_v26 = vld [vmem:[#allocation2 + $0x188] sm:$0xff] }
 0x3eb   : > { %v2253_v37 = vsub.f32 %v5769_v26, %v5652_v7 }
 0x3ec   : > { %v2508_v14 = vadd.f32 %v2507_v32, %v2506_v11  ;;  %v2369_v11 = vmul.f32 %v2241_v42, %v2241_v42  ;;  %v2531_v47 = vsel %vm1514_vm2, %v2368_v13, 0.0  ;;  %v5774_v13 = vld [vmem:[#allocation2 + $0x190] sm:$0xff] }
 0x3ed   : > { %v2254_v49 = vsub.f32 %v5774_v13, %v5652_v7 }
 0x3ee   : > { %v2510_v29 = vadd.f32 %v2509_v43, %v2508_v14  ;;  %v2370_v14 = vmul.f32 %v2242_v6, %v2242_v6  ;;  %v2533_v21 = vsel %vm1514_vm2, %v2369_v11, 0.0  ;;  %v5779_v11 = vld [vmem:[#allocation2 + $0x198] sm:$0xff] }
 0x3ef   : > { %v2255_v55 = vsub.f32 %v5779_v11, %v5652_v7 }
 0x3f0   : > { %v2512_v1 = vadd.f32 %v2511_v34, %v2510_v29  ;;  %v2371_v29 = vmul.f32 %v2243_v18, %v2243_v18  ;;  %v2535_v56 = vsel %vm1514_vm2, %v2370_v14, 0.0  ;;  %v5784_v14 = vld [vmem:[#allocation2 + $0x1a0] sm:$0xff] }
 0x3f1   : > { %v2256_v36 = vsub.f32 %v5784_v14, %v5652_v7 }
 0x3f2   : > { %v2514_v28 = vadd.f32 %v2513_v39, %v2512_v1  ;;  %v2372_v1 = vmul.f32 %v2244_v3, %v2244_v3  ;;  %v2537_v53 = vsel %vm1514_vm2, %v2371_v29, 0.0  ;;  %v5789_v29 = vld [vmem:[#allocation2 + $0x1a8] sm:$0xff] }
 0x3f4   : > { %v2516_v23 = vadd.f32 %v2515_v52, %v2514_v28  ;;  %v2373_v28 = vmul.f32 %v2245_v59, %v2245_v59  ;;  %v2539_v12 = vsel %vm1514_vm2, %v2372_v1, 0.0 }
 0x3f6   : > { %v2518_v50 = vadd.f32 %v2517_v19, %v2516_v23  ;;  %v2374_v23 = vmul.f32 %v2246_v44, %v2246_v44  ;;  %v2541_v15 = vsel %vm1514_vm2, %v2373_v28, 0.0  ;;  %v2383_v44 = vmul.f32 %v2255_v55, %v2255_v55 }
 0x3f7   : > { %v2384_v28 = vmul.f32 %v2256_v36, %v2256_v36 }
 0x3f8   : > { %v2520_v4 = vadd.f32 %v2519_v33, %v2518_v50  ;;  %v2375_v50 = vmul.f32 %v2247_v60, %v2247_v60  ;;  %v2543_v38 = vsel %vm1514_vm2, %v2374_v23, 0.0 }
 0x3fa   : > { %v2522_v24 = vadd.f32 %v2521_v5, %v2520_v4  ;;  %v2376_v4 = vmul.f32 %v2248_v58, %v2248_v58  ;;  %v2545_v63 = vsel %vm1514_vm2, %v2375_v50, 0.0 }
 0x3fc   : > { %v2524_v41 = vadd.f32 %v2523_v31, %v2522_v24  ;;  %v2377_v24 = vmul.f32 %v2249_v25, %v2249_v25  ;;  %v2547_v42 = vsel %vm1514_vm2, %v2376_v4, 0.0  ;;  %v5804_v25 = vld [vmem:[#allocation2 + $0x1c0] sm:$0xff]  ;;  %v5809_v4 = vld [vmem:[#allocation2 + $0x1c8] sm:$0xff] }
 0x3fe   : > { %v2526_v8 = vadd.f32 %v2525_v20, %v2524_v41  ;;  %v2378_v41 = vmul.f32 %v2250_v30, %v2250_v30  ;;  %v2549_v6 = vsel %vm1514_vm2, %v2377_v24, 0.0  ;;  %v2563_v30 = vsel %vm1514_vm2, %v2384_v28, 0.0 }
 0x400   : > { %v2528_v62 = vadd.f32 %v2527_v17, %v2526_v8  ;;  %v2379_v8 = vmul.f32 %v2251_v10, %v2251_v10  ;;  %v2551_v18 = vsel %vm1514_vm2, %v2378_v41, 0.0 }
 0x402   : > { %v2530_v32 = vadd.f32 %v2529_v22, %v2528_v62  ;;  %v2380_v62 = vmul.f32 %v2252_v16, %v2252_v16  ;;  %v2553_v3 = vsel %vm1514_vm2, %v2379_v8, 0.0 }
 0x404   : > { %v2532_v43 = vadd.f32 %v2531_v47, %v2530_v32  ;;  %v2381_v32 = vmul.f32 %v2253_v37, %v2253_v37  ;;  %v2555_v59 = vsel %vm1514_vm2, %v2380_v62, 0.0 }
 0x406   : > { %v2534_v34 = vadd.f32 %v2533_v21, %v2532_v43  ;;  %v2382_v43 = vmul.f32 %v2254_v49, %v2254_v49  ;;  %v2557_v1 = vsel %vm1514_vm2, %v2381_v32, 0.0  ;;  %v5824_v49 = vld [vmem:[#allocation2 + $0x1e0] sm:$0xff]  ;;  %v5829_v32 = vld [vmem:[#allocation2 + $0x1e8] sm:$0xff] }
 0x408   : > { %v2536_v39 = vadd.f32 %v2535_v56, %v2534_v34  ;;  %v2257_v34 = vsub.f32 %v5789_v29, %v5652_v7  ;;  %v5794_v56 = vld [vmem:[#allocation2 + $0x1b0] sm:$0xff] }
 0x409   : > { %v2258_v60 = vsub.f32 %v5794_v56, %v5652_v7 }
 0x40a   : > { %v2538_v52 = vadd.f32 %v2537_v53, %v2536_v39  ;;  %v2559_v53 = vsel %vm1514_vm2, %v2382_v43, 0.0 }
 0x40c   : > { %v2540_v19 = vadd.f32 %v2539_v12, %v2538_v52  ;;  %v5799_v52 = vld [vmem:[#allocation2 + $0x1b8] sm:$0xff]  ;;  %v2385_v12 = vmul.f32 %v2257_v34, %v2257_v34 }
 0x40d   : > { %v2259_v23 = vsub.f32 %v5799_v52, %v5652_v7 }
 0x40e   : > { %v2542_v33 = vadd.f32 %v2541_v15, %v2540_v19  ;;  %v2561_v19 = vsel %vm1514_vm2, %v2383_v44, 0.0  ;;  %v2260_v15 = vsub.f32 %v5804_v25, %v5652_v7  ;;  %v2565_v24 = vsel %vm1514_vm2, %v2385_v12, 0.0 }
 0x40f   : > { %v2387_v10 = vmul.f32 %v2259_v23, %v2259_v23  ;;  %v5844_v23 = vld [vmem:[#allocation2 + $0x200] sm:$0xff] }
 0x410   : > { %v2544_v5 = vadd.f32 %v2543_v38, %v2542_v33  ;;  %v2386_v33 = vmul.f32 %v2258_v60, %v2258_v60  ;;  %v2388_v41 = vmul.f32 %v2260_v15, %v2260_v15 }
 0x412   : > { %v2546_v31 = vadd.f32 %v2545_v63, %v2544_v5  ;;  %v2261_v5 = vsub.f32 %v5809_v4, %v5652_v7  ;;  %v5814_v63 = vld [vmem:[#allocation2 + $0x1d0] sm:$0xff]  ;;  %v2571_v55 = vsel %vm1514_vm2, %v2388_v41, 0.0 }
 0x413   : > { %v2262_v16 = vsub.f32 %v5814_v63, %v5652_v7 }
 0x414   : > { %v2548_v20 = vadd.f32 %v2547_v42, %v2546_v31  ;;  %v2567_v42 = vsel %vm1514_vm2, %v2386_v33, 0.0  ;;  %v5849_v33 = vld [vmem:[#allocation2 + $0x208] sm:$0xff] }
 0x416   : > { %v2550_v17 = vadd.f32 %v2549_v6, %v2548_v20  ;;  %v5819_v20 = vld [vmem:[#allocation2 + $0x1d8] sm:$0xff]  ;;  %v2389_v6 = vmul.f32 %v2261_v5, %v2261_v5 }
 0x417   : > { %v2263_v8 = vsub.f32 %v5819_v20, %v5652_v7 }
 0x418   : > { %v2552_v22 = vadd.f32 %v2551_v18, %v2550_v17  ;;  %v2569_v17 = vsel %vm1514_vm2, %v2387_v10, 0.0  ;;  %v2264_v18 = vsub.f32 %v5824_v49, %v5652_v7  ;;  %v2573_v43 = vsel %vm1514_vm2, %v2389_v6, 0.0 }
 0x419   : > { %v2391_v36 = vmul.f32 %v2263_v8, %v2263_v8 }
 0x41a   : > { %v2554_v47 = vadd.f32 %v2553_v3, %v2552_v22  ;;  %v2390_v22 = vmul.f32 %v2262_v16, %v2262_v16  ;;  %v2392_v44 = vmul.f32 %v2264_v18, %v2264_v18  ;;  %v5864_v18 = vld [vmem:[#allocation2 + $0x220] sm:$0xff] }
 0x41c   : > { %v2556_v21 = vadd.f32 %v2555_v59, %v2554_v47  ;;  %v2265_v47 = vsub.f32 %v5829_v32, %v5652_v7  ;;  %v5834_v59 = vld [vmem:[#allocation2 + $0x1f0] sm:$0xff]  ;;  %v2579_v15 = vsel %vm1514_vm2, %v2392_v44, 0.0 }
 0x41d   : > { %v2266_v34 = vsub.f32 %v5834_v59, %v5652_v7 }
 0x41e   : > { %v2558_v39 = vadd.f32 %v2557_v1, %v2556_v21  ;;  %v2575_v1 = vsel %vm1514_vm2, %v2390_v22, 0.0 }
 0x420   : > { %v2560_v58 = vadd.f32 %v2559_v53, %v2558_v39  ;;  %v5839_v39 = vld [vmem:[#allocation2 + $0x1f8] sm:$0xff]  ;;  %v2393_v53 = vmul.f32 %v2265_v47, %v2265_v47 }
 0x421   : > { %v2267_v28 = vsub.f32 %v5839_v39, %v5652_v7 }
 0x422   : > { %v2562_v50 = vadd.f32 %v2561_v19, %v2560_v58  ;;  %v2577_v58 = vsel %vm1514_vm2, %v2391_v36, 0.0  ;;  %v2268_v19 = vsub.f32 %v5844_v23, %v5652_v7  ;;  %v2581_v10 = vsel %vm1514_vm2, %v2393_v53, 0.0  ;;  %v5869_v36 = vld [vmem:[#allocation2 + $0x228] sm:$0xff] }
 0x423   : > { %v2395_v5 = vmul.f32 %v2267_v28, %v2267_v28 }
 0x424   : > { %v2564_v38 = vadd.f32 %v2563_v30, %v2562_v50  ;;  %v2394_v50 = vmul.f32 %v2266_v34, %v2266_v34  ;;  %v2396_v41 = vmul.f32 %v2268_v19, %v2268_v19 }
 0x426   : > { %v2566_v31 = vadd.f32 %v2565_v24, %v2564_v38  ;;  %v2269_v38 = vsub.f32 %v5849_v33, %v5652_v7  ;;  %v5854_v24 = vld [vmem:[#allocation2 + $0x210] sm:$0xff]  ;;  %v2587_v47 = vsel %vm1514_vm2, %v2396_v41, 0.0  ;;  %v5889_v41 = vld [vmem:[#allocation2 + $0x248] sm:$0xff] }
 0x427   : > { %v2270_v16 = vsub.f32 %v5854_v24, %v5652_v7 }
 0x428   : > { %v2568_v37 = vadd.f32 %v2567_v42, %v2566_v31  ;;  %v2583_v42 = vsel %vm1514_vm2, %v2394_v50, 0.0 }
 0x42a   : > { %v2570_v62 = vadd.f32 %v2569_v17, %v2568_v37  ;;  %v5859_v37 = vld [vmem:[#allocation2 + $0x218] sm:$0xff]  ;;  %v2397_v17 = vmul.f32 %v2269_v38, %v2269_v38  ;;  %v5884_v38 = vld [vmem:[#allocation2 + $0x240] sm:$0xff] }
 0x42b   : > { %v2271_v6 = vsub.f32 %v5859_v37, %v5652_v7 }
 0x42c   : > { %v2572_v3 = vadd.f32 %v2571_v55, %v2570_v62  ;;  %v2585_v62 = vsel %vm1514_vm2, %v2395_v5, 0.0  ;;  %v2272_v55 = vsub.f32 %v5864_v18, %v5652_v7  ;;  %v2589_v44 = vsel %vm1514_vm2, %v2397_v17, 0.0 }
 0x42d   : > { %v2399_v34 = vmul.f32 %v2271_v6, %v2271_v6 }
 0x42e   : > { %v2574_v21 = vadd.f32 %v2573_v43, %v2572_v3  ;;  %v2398_v3 = vmul.f32 %v2270_v16, %v2270_v16  ;;  %v2400_v53 = vmul.f32 %v2272_v55, %v2272_v55 }
 0x430   : > { %v2576_v60 = vadd.f32 %v2575_v1, %v2574_v21  ;;  %v2273_v21 = vsub.f32 %v5869_v36, %v5652_v7  ;;  %v5874_v1 = vld [vmem:[#allocation2 + $0x230] sm:$0xff]  ;;  %v2595_v16 = vsel %vm1514_vm2, %v2400_v53, 0.0 }
 0x431   : > { %v2274_v28 = vsub.f32 %v5874_v1, %v5652_v7 }
 0x432   : > { %v2578_v12 = vadd.f32 %v2577_v58, %v2576_v60  ;;  %v2591_v58 = vsel %vm1514_vm2, %v2398_v3, 0.0 }
 0x434   : > { %v2580_v30 = vadd.f32 %v2579_v15, %v2578_v12  ;;  %v5879_v12 = vld [vmem:[#allocation2 + $0x238] sm:$0xff]  ;;  %v2401_v15 = vmul.f32 %v2273_v21, %v2273_v21 }
 0x435   : > { %v2275_v50 = vsub.f32 %v5879_v12, %v5652_v7 }
 0x436   : > { %v2582_v31 = vadd.f32 %v2581_v10, %v2580_v30  ;;  %v2593_v30 = vsel %vm1514_vm2, %v2399_v34, 0.0  ;;  %v2276_v10 = vsub.f32 %v5884_v38, %v5652_v7  ;;  %v2597_v17 = vsel %vm1514_vm2, %v2401_v15, 0.0  ;;  %v5909_v15 = vld [vmem:[#allocation2 + $0x268] sm:$0xff] }
 0x437   : > { %v2403_v6 = vmul.f32 %v2275_v50, %v2275_v50 }
 0x438   : > { %v2584_v8 = vadd.f32 %v2583_v42, %v2582_v31  ;;  %v2402_v31 = vmul.f32 %v2274_v28, %v2274_v28  ;;  %v2404_v3 = vmul.f32 %v2276_v10, %v2276_v10  ;;  %v5904_v28 = vld [vmem:[#allocation2 + $0x260] sm:$0xff] }
 0x43a   : > { %v2586_v22 = vadd.f32 %v2585_v62, %v2584_v8  ;;  %v2277_v8 = vsub.f32 %v5889_v41, %v5652_v7  ;;  %v5894_v62 = vld [vmem:[#allocation2 + $0x250] sm:$0xff]  ;;  %v2603_v50 = vsel %vm1514_vm2, %v2404_v3, 0.0 }
 0x43b   : > { %v2278_v55 = vsub.f32 %v5894_v62, %v5652_v7 }
 0x43c   : > { %v2588_v43 = vadd.f32 %v2587_v47, %v2586_v22  ;;  %v2599_v47 = vsel %vm1514_vm2, %v2402_v31, 0.0 }
 0x43e   : > { %v2590_v60 = vadd.f32 %v2589_v44, %v2588_v43  ;;  %v5899_v43 = vld [vmem:[#allocation2 + $0x258] sm:$0xff]  ;;  %v2405_v44 = vmul.f32 %v2277_v8, %v2277_v8 }
 0x43f   : > { %v2279_v34 = vsub.f32 %v5899_v43, %v5652_v7 }
 0x440   : > { %v2592_v19 = vadd.f32 %v2591_v58, %v2590_v60  ;;  %v2601_v60 = vsel %vm1514_vm2, %v2403_v6, 0.0  ;;  %v2280_v58 = vsub.f32 %v5904_v28, %v5652_v7  ;;  %v2605_v31 = vsel %vm1514_vm2, %v2405_v44, 0.0 }
 0x441   : > { %v2407_v10 = vmul.f32 %v2279_v34, %v2279_v34  ;;  %v5924_v34 = vld [vmem:[#allocation2 + $0x280] sm:$0xff] }
 0x442   : > { %v2594_v5 = vadd.f32 %v2593_v30, %v2592_v19  ;;  %v2406_v19 = vmul.f32 %v2278_v55, %v2278_v55  ;;  %v2408_v6 = vmul.f32 %v2280_v58, %v2280_v58  ;;  %8156 = vst [vmem:[#allocation7_spill] sm:$0xff] %v5924_v34 }
 0x444   : > { %v2596_v42 = vadd.f32 %v2595_v16, %v2594_v5  ;;  %v2281_v5 = vsub.f32 %v5909_v15, %v5652_v7  ;;  %v5914_v16 = vld [vmem:[#allocation2 + $0x270] sm:$0xff]  ;;  %v2611_v58 = vsel %vm1514_vm2, %v2408_v6, 0.0 }
 0x445   : > { %8154 = vst [vmem:[#allocation8_spill] sm:$0xff] %v5914_v16  ;;  %v2282_v8 = vsub.f32 %v5914_v16, %v5652_v7 }
 0x446   : > { %v2598_v22 = vadd.f32 %v2597_v17, %v2596_v42  ;;  %v2607_v17 = vsel %vm1514_vm2, %v2406_v19, 0.0 }
 0x448   : > { %v2600_v21 = vadd.f32 %v2599_v47, %v2598_v22  ;;  %v5919_v22 = vld [vmem:[#allocation2 + $0x278] sm:$0xff]  ;;  %v2409_v47 = vmul.f32 %v2281_v5, %v2281_v5 }
 0x449   : > { %8155 = vst [vmem:[#allocation10_spill] sm:$0xff] %v5919_v22  ;;  %v2283_v3 = vsub.f32 %v5919_v22, %v5652_v7 }
 0x44a   : > { %v2602_v53 = vadd.f32 %v2601_v60, %v2600_v21  ;;  %v2609_v21 = vsel %vm1514_vm2, %v2407_v10, 0.0  ;;  %v2284_v60 = vsub.f32 %v5924_v34, %v5652_v7  ;;  %v2613_v5 = vsel %vm1514_vm2, %v2409_v47, 0.0 }
 0x44c   : > { %v2604_v30 = vadd.f32 %v2603_v50, %v2602_v53  ;;  %v2410_v53 = vmul.f32 %v2282_v8, %v2282_v8  ;;  %v5929_v50 = vld [vmem:[#allocation2 + $0x288] sm:$0xff] }
 0x44d   : > { %8157 = vst [vmem:[#allocation9_spill] sm:$0xff] %v5929_v50 }
 0x44e   : > { %v2606_v42 = vadd.f32 %v2605_v31, %v2604_v30  ;;  %v2285_v30 = vsub.f32 %v5929_v50, %v5652_v7  ;;  %v2411_v31 = vmul.f32 %v2283_v3, %v2283_v3  ;;  %v2615_v8 = vsel %vm1514_vm2, %v2410_v53, 0.0  ;;  %v5944_v50 = vld [vmem:[#allocation2 + $0x2a0] sm:$0xff] }
 0x44f   : > { %8160 = vst [vmem:[#allocation6_spill] sm:$0xff] %v5944_v50 }
 0x450   : > { %v2608_v55 = vadd.f32 %v2607_v17, %v2606_v42  ;;  %v5934_v42 = vld [vmem:[#allocation2 + $0x290] sm:$0xff]  ;;  %v2617_v3 = vsel %vm1514_vm2, %v2411_v31, 0.0 }
 0x451   : > { %8158 = vst [vmem:[#allocation4_spill] sm:$0xff] %v5934_v42  ;;  %v2286_v17 = vsub.f32 %v5934_v42, %v5652_v7  ;;  %v5949_v42 = vld [vmem:[#allocation2 + $0x2a8] sm:$0xff] }
 0x452   : > { %v2610_v44 = vadd.f32 %v2609_v21, %v2608_v55  ;;  %v2412_v55 = vmul.f32 %v2284_v60, %v2284_v60  ;;  %v5939_v21 = vld [vmem:[#allocation2 + $0x298] sm:$0xff]  ;;  %8161 = vst [vmem:[#allocation11_spill] sm:$0xff] %v5949_v42 }
 0x453   : > { %8159 = vst [vmem:[#allocation5_spill] sm:$0xff] %v5939_v21 }
 0x454   : > { %v2612_v19 = vadd.f32 %v2611_v58, %v2610_v44  ;;  %v2287_v44 = vsub.f32 %v5939_v21, %v5652_v7  ;;  %v2413_v58 = vmul.f32 %v2285_v30, %v2285_v30  ;;  %v2619_v60 = vsel %vm1514_vm2, %v2412_v55, 0.0  ;;  %v5954_v21 = vld [vmem:[#allocation2 + $0x2b0] sm:$0xff] }
 0x455   : > { %8162 = vst [vmem:[#allocation12_spill] sm:$0xff] %v5954_v21 }
 0x456   : > { %v2614_v10 = vadd.f32 %v2613_v5, %v2612_v19  ;;  %v2288_v19 = vsub.f32 %v5944_v50, %v5652_v7  ;;  %v2414_v5 = vmul.f32 %v2286_v17, %v2286_v17  ;;  %v2621_v30 = vsel %vm1514_vm2, %v2413_v58, 0.0  ;;  %v5959_v50 = vld [vmem:[#allocation2 + $0x2b8] sm:$0xff] }
 0x457   : > { %8163 = vst [vmem:[#allocation13_spill] sm:$0xff] %v5959_v50 }
 0x458   : > { %v2616_v6 = vadd.f32 %v2615_v8, %v2614_v10  ;;  %v2289_v10 = vsub.f32 %v5949_v42, %v5652_v7  ;;  %v2415_v8 = vmul.f32 %v2287_v44, %v2287_v44  ;;  %v2623_v17 = vsel %vm1514_vm2, %v2414_v5, 0.0  ;;  %v5964_v42 = vld [vmem:[#allocation2 + $0x2c0] sm:$0xff] }
 0x459   : > { %8164 = vst [vmem:[#allocation14_spill] sm:$0xff] %v5964_v42 }
 0x45a   : > { %v2618_v47 = vadd.f32 %v2617_v3, %v2616_v6  ;;  %v2290_v6 = vsub.f32 %v5954_v21, %v5652_v7  ;;  %v2416_v3 = vmul.f32 %v2288_v19, %v2288_v19  ;;  %v2625_v44 = vsel %vm1514_vm2, %v2415_v8, 0.0  ;;  %v5969_v21 = vld [vmem:[#allocation2 + $0x2c8] sm:$0xff] }
 0x45b   : > { %8165 = vst [vmem:[#allocation15_spill] sm:$0xff] %v5969_v21 }
 0x45c   : > { %v2620_v53 = vadd.f32 %v2619_v60, %v2618_v47  ;;  %v2291_v47 = vsub.f32 %v5959_v50, %v5652_v7  ;;  %v2417_v60 = vmul.f32 %v2289_v10, %v2289_v10  ;;  %v2627_v19 = vsel %vm1514_vm2, %v2416_v3, 0.0  ;;  %v5974_v50 = vld [vmem:[#allocation2 + $0x2d0] sm:$0xff] }
 0x45d   : > { %8166 = vst [vmem:[#allocation16_spill] sm:$0xff] %v5974_v50 }
 0x45e   : > { %v2622_v31 = vadd.f32 %v2621_v30, %v2620_v53  ;;  %v2292_v53 = vsub.f32 %v5964_v42, %v5652_v7  ;;  %v2418_v30 = vmul.f32 %v2290_v6, %v2290_v6  ;;  %v2629_v10 = vsel %vm1514_vm2, %v2417_v60, 0.0  ;;  %v5979_v42 = vld [vmem:[#allocation2 + $0x2d8] sm:$0xff] }
 0x45f   : > { %8167 = vst [vmem:[#allocation17_spill] sm:$0xff] %v5979_v42 }
 0x460   : > { %v2624_v55 = vadd.f32 %v2623_v17, %v2622_v31  ;;  %v2293_v31 = vsub.f32 %v5969_v21, %v5652_v7  ;;  %v2419_v17 = vmul.f32 %v2291_v47, %v2291_v47  ;;  %v2631_v6 = vsel %vm1514_vm2, %v2418_v30, 0.0  ;;  %v5984_v21 = vld [vmem:[#allocation2 + $0x2e0] sm:$0xff] }
 0x461   : > { %8168 = vst [vmem:[#allocation18_spill] sm:$0xff] %v5984_v21 }
 0x462   : > { %v2626_v58 = vadd.f32 %v2625_v44, %v2624_v55  ;;  %v2294_v55 = vsub.f32 %v5974_v50, %v5652_v7  ;;  %v2420_v44 = vmul.f32 %v2292_v53, %v2292_v53  ;;  %v2633_v47 = vsel %vm1514_vm2, %v2419_v17, 0.0  ;;  %v5989_v50 = vld [vmem:[#allocation2 + $0x2e8] sm:$0xff] }
 0x463   : > { %8169 = vst [vmem:[#allocation19_spill] sm:$0xff] %v5989_v50 }
 0x464   : > { %v2628_v5 = vadd.f32 %v2627_v19, %v2626_v58  ;;  %v2295_v58 = vsub.f32 %v5979_v42, %v5652_v7  ;;  %v2421_v19 = vmul.f32 %v2293_v31, %v2293_v31  ;;  %v2635_v53 = vsel %vm1514_vm2, %v2420_v44, 0.0  ;;  %v5994_v42 = vld [vmem:[#allocation2 + $0x2f0] sm:$0xff] }
 0x465   : > { %8170 = vst [vmem:[#allocation20_spill] sm:$0xff] %v5994_v42 }
 0x466   : > { %v2630_v8 = vadd.f32 %v2629_v10, %v2628_v5  ;;  %v2296_v5 = vsub.f32 %v5984_v21, %v5652_v7  ;;  %v2422_v10 = vmul.f32 %v2294_v55, %v2294_v55  ;;  %v2637_v31 = vsel %vm1514_vm2, %v2421_v19, 0.0  ;;  %v5999_v21 = vld [vmem:[#allocation2 + $0x2f8] sm:$0xff] }
 0x467   : > { %8171 = vst [vmem:[#allocation21_spill] sm:$0xff] %v5999_v21 }
 0x468   : > { %v2632_v3 = vadd.f32 %v2631_v6, %v2630_v8  ;;  %v2297_v8 = vsub.f32 %v5989_v50, %v5652_v7  ;;  %v2423_v6 = vmul.f32 %v2295_v58, %v2295_v58  ;;  %v2639_v55 = vsel %vm1514_vm2, %v2422_v10, 0.0  ;;  %v6004_v50 = vld [vmem:[#allocation2 + $0x300] sm:$0xff] }
 0x469   : > { %8172 = vst [vmem:[#allocation22_spill] sm:$0xff] %v6004_v50 }
 0x46a   : > { %v2634_v60 = vadd.f32 %v2633_v47, %v2632_v3  ;;  %v2298_v3 = vsub.f32 %v5994_v42, %v5652_v7  ;;  %v2424_v47 = vmul.f32 %v2296_v5, %v2296_v5  ;;  %v2641_v58 = vsel %vm1514_vm2, %v2423_v6, 0.0  ;;  %v6009_v42 = vld [vmem:[#allocation2 + $0x308] sm:$0xff] }
 0x46b   : > { %8173 = vst [vmem:[#allocation23_spill] sm:$0xff] %v6009_v42 }
 0x46c   : > { %v2636_v30 = vadd.f32 %v2635_v53, %v2634_v60  ;;  %v2299_v60 = vsub.f32 %v5999_v21, %v5652_v7  ;;  %v2425_v53 = vmul.f32 %v2297_v8, %v2297_v8  ;;  %v2643_v5 = vsel %vm1514_vm2, %v2424_v47, 0.0  ;;  %v6014_v21 = vld [vmem:[#allocation2 + $0x310] sm:$0xff] }
 0x46d   : > { %8174 = vst [vmem:[#allocation24_spill] sm:$0xff] %v6014_v21 }
 0x46e   : > { %v2638_v17 = vadd.f32 %v2637_v31, %v2636_v30  ;;  %v2300_v30 = vsub.f32 %v6004_v50, %v5652_v7  ;;  %v2426_v31 = vmul.f32 %v2298_v3, %v2298_v3  ;;  %v2645_v8 = vsel %vm1514_vm2, %v2425_v53, 0.0  ;;  %v6019_v50 = vld [vmem:[#allocation2 + $0x318] sm:$0xff] }
 0x46f   : > { %8175 = vst [vmem:[#allocation25_spill] sm:$0xff] %v6019_v50 }
 0x470   : > { %v2640_v44 = vadd.f32 %v2639_v55, %v2638_v17  ;;  %v2301_v17 = vsub.f32 %v6009_v42, %v5652_v7  ;;  %v2427_v55 = vmul.f32 %v2299_v60, %v2299_v60  ;;  %v2647_v3 = vsel %vm1514_vm2, %v2426_v31, 0.0  ;;  %v6024_v42 = vld [vmem:[#allocation2 + $0x320] sm:$0xff] }
 0x471   : > { %8176 = vst [vmem:[#allocation26_spill] sm:$0xff] %v6024_v42 }
 0x472   : > { %v2642_v19 = vadd.f32 %v2641_v58, %v2640_v44  ;;  %v2302_v44 = vsub.f32 %v6014_v21, %v5652_v7  ;;  %v2428_v58 = vmul.f32 %v2300_v30, %v2300_v30  ;;  %v2649_v60 = vsel %vm1514_vm2, %v2427_v55, 0.0  ;;  %v6029_v21 = vld [vmem:[#allocation2 + $0x328] sm:$0xff] }
 0x473   : > { %8177 = vst [vmem:[#allocation27_spill] sm:$0xff] %v6029_v21 }
 0x474   : > { %v2644_v10 = vadd.f32 %v2643_v5, %v2642_v19  ;;  %v2303_v19 = vsub.f32 %v6019_v50, %v5652_v7  ;;  %v2429_v5 = vmul.f32 %v2301_v17, %v2301_v17  ;;  %v2651_v30 = vsel %vm1514_vm2, %v2428_v58, 0.0  ;;  %v6034_v50 = vld [vmem:[#allocation2 + $0x330] sm:$0xff] }
 0x475   : > { %8178 = vst [vmem:[#allocation28_spill] sm:$0xff] %v6034_v50 }
 0x476   : > { %v2646_v6 = vadd.f32 %v2645_v8, %v2644_v10  ;;  %v2304_v10 = vsub.f32 %v6024_v42, %v5652_v7  ;;  %v2430_v8 = vmul.f32 %v2302_v44, %v2302_v44  ;;  %v2653_v17 = vsel %vm1514_vm2, %v2429_v5, 0.0  ;;  %v6039_v42 = vld [vmem:[#allocation2 + $0x338] sm:$0xff] }
 0x477   : > { %8179 = vst [vmem:[#allocation29_spill] sm:$0xff] %v6039_v42 }
 0x478   : > { %v2648_v47 = vadd.f32 %v2647_v3, %v2646_v6  ;;  %v2305_v6 = vsub.f32 %v6029_v21, %v5652_v7  ;;  %v2431_v3 = vmul.f32 %v2303_v19, %v2303_v19  ;;  %v2655_v44 = vsel %vm1514_vm2, %v2430_v8, 0.0  ;;  %v6044_v21 = vld [vmem:[#allocation2 + $0x340] sm:$0xff] }
 0x479   : > { %8180 = vst [vmem:[#allocation30_spill] sm:$0xff] %v6044_v21 }
 0x47a   : > { %v2650_v53 = vadd.f32 %v2649_v60, %v2648_v47  ;;  %v2306_v47 = vsub.f32 %v6034_v50, %v5652_v7  ;;  %v2432_v60 = vmul.f32 %v2304_v10, %v2304_v10  ;;  %v2657_v19 = vsel %vm1514_vm2, %v2431_v3, 0.0  ;;  %v6049_v50 = vld [vmem:[#allocation2 + $0x348] sm:$0xff] }
 0x47b   : > { %8181 = vst [vmem:[#allocation31_spill] sm:$0xff] %v6049_v50 }
 0x47c   : > { %v2652_v31 = vadd.f32 %v2651_v30, %v2650_v53  ;;  %v2307_v53 = vsub.f32 %v6039_v42, %v5652_v7  ;;  %v2433_v30 = vmul.f32 %v2305_v6, %v2305_v6  ;;  %v2659_v10 = vsel %vm1514_vm2, %v2432_v60, 0.0  ;;  %v6054_v42 = vld [vmem:[#allocation2 + $0x350] sm:$0xff] }
 0x47d   : > { %8182 = vst [vmem:[#allocation32_spill] sm:$0xff] %v6054_v42 }
 0x47e   : > { %v2654_v55 = vadd.f32 %v2653_v17, %v2652_v31  ;;  %v2308_v31 = vsub.f32 %v6044_v21, %v5652_v7  ;;  %v2434_v17 = vmul.f32 %v2306_v47, %v2306_v47  ;;  %v2661_v6 = vsel %vm1514_vm2, %v2433_v30, 0.0  ;;  %v6059_v21 = vld [vmem:[#allocation2 + $0x358] sm:$0xff] }
 0x47f   : > { %8183 = vst [vmem:[#allocation33_spill] sm:$0xff] %v6059_v21 }
 0x480   : > { %v2656_v58 = vadd.f32 %v2655_v44, %v2654_v55  ;;  %v2309_v55 = vsub.f32 %v6049_v50, %v5652_v7  ;;  %v2435_v44 = vmul.f32 %v2307_v53, %v2307_v53  ;;  %v2663_v47 = vsel %vm1514_vm2, %v2434_v17, 0.0  ;;  %v6064_v50 = vld [vmem:[#allocation2 + $0x360] sm:$0xff] }
 0x481   : > { %8184 = vst [vmem:[#allocation34_spill] sm:$0xff] %v6064_v50 }
 0x482   : > { %v2658_v5 = vadd.f32 %v2657_v19, %v2656_v58  ;;  %v2310_v58 = vsub.f32 %v6054_v42, %v5652_v7  ;;  %v2436_v19 = vmul.f32 %v2308_v31, %v2308_v31  ;;  %v2665_v53 = vsel %vm1514_vm2, %v2435_v44, 0.0  ;;  %v6069_v42 = vld [vmem:[#allocation2 + $0x368] sm:$0xff] }
 0x483   : > { %8185 = vst [vmem:[#allocation35_spill] sm:$0xff] %v6069_v42 }
 0x484   : > { %v2660_v8 = vadd.f32 %v2659_v10, %v2658_v5  ;;  %v2311_v5 = vsub.f32 %v6059_v21, %v5652_v7  ;;  %v2437_v10 = vmul.f32 %v2309_v55, %v2309_v55  ;;  %v2667_v31 = vsel %vm1514_vm2, %v2436_v19, 0.0  ;;  %v6074_v21 = vld [vmem:[#allocation2 + $0x370] sm:$0xff] }
 0x485   : > { %8186 = vst [vmem:[#allocation36_spill] sm:$0xff] %v6074_v21 }
 0x486   : > { %v2662_v3 = vadd.f32 %v2661_v6, %v2660_v8  ;;  %v2312_v8 = vsub.f32 %v6064_v50, %v5652_v7  ;;  %v2438_v6 = vmul.f32 %v2310_v58, %v2310_v58  ;;  %v2669_v55 = vsel %vm1514_vm2, %v2437_v10, 0.0  ;;  %v6079_v50 = vld [vmem:[#allocation2 + $0x378] sm:$0xff] }
 0x487   : > { %8187 = vst [vmem:[#allocation37_spill] sm:$0xff] %v6079_v50 }
 0x488   : > { %v2664_v60 = vadd.f32 %v2663_v47, %v2662_v3  ;;  %v2313_v3 = vsub.f32 %v6069_v42, %v5652_v7  ;;  %v2439_v47 = vmul.f32 %v2311_v5, %v2311_v5  ;;  %v2671_v58 = vsel %vm1514_vm2, %v2438_v6, 0.0  ;;  %v6084_v42 = vld [vmem:[#allocation2 + $0x380] sm:$0xff] }
 0x489   : > { %8188 = vst [vmem:[#allocation38_spill] sm:$0xff] %v6084_v42 }
 0x48a   : > { %v2666_v30 = vadd.f32 %v2665_v53, %v2664_v60  ;;  %v2314_v60 = vsub.f32 %v6074_v21, %v5652_v7  ;;  %v2440_v53 = vmul.f32 %v2312_v8, %v2312_v8  ;;  %v2673_v5 = vsel %vm1514_vm2, %v2439_v47, 0.0  ;;  %v6089_v21 = vld [vmem:[#allocation2 + $0x388] sm:$0xff] }
 0x48b   : > { %8189 = vst [vmem:[#allocation39_spill] sm:$0xff] %v6089_v21 }
 0x48c   : > { %v2668_v17 = vadd.f32 %v2667_v31, %v2666_v30  ;;  %v2315_v30 = vsub.f32 %v6079_v50, %v5652_v7  ;;  %v2441_v31 = vmul.f32 %v2313_v3, %v2313_v3  ;;  %v2675_v8 = vsel %vm1514_vm2, %v2440_v53, 0.0  ;;  %v6094_v50 = vld [vmem:[#allocation2 + $0x390] sm:$0xff] }
 0x48d   : > { %8190 = vst [vmem:[#allocation40_spill] sm:$0xff] %v6094_v50 }
 0x48e   : > { %v2670_v44 = vadd.f32 %v2669_v55, %v2668_v17  ;;  %v2316_v17 = vsub.f32 %v6084_v42, %v5652_v7  ;;  %v2442_v55 = vmul.f32 %v2314_v60, %v2314_v60  ;;  %v2677_v3 = vsel %vm1514_vm2, %v2441_v31, 0.0  ;;  %v6099_v42 = vld [vmem:[#allocation2 + $0x398] sm:$0xff] }
 0x48f   : > { %8191 = vst [vmem:[#allocation41_spill] sm:$0xff] %v6099_v42 }
 0x490   : > { %v2672_v19 = vadd.f32 %v2671_v58, %v2670_v44  ;;  %v2317_v44 = vsub.f32 %v6089_v21, %v5652_v7  ;;  %v2443_v58 = vmul.f32 %v2315_v30, %v2315_v30  ;;  %v2679_v60 = vsel %vm1514_vm2, %v2442_v55, 0.0  ;;  %v6104_v21 = vld [vmem:[#allocation2 + $0x3a0] sm:$0xff] }
 0x491   : > { %8192 = vst [vmem:[#allocation42_spill] sm:$0xff] %v6104_v21 }
 0x492   : > { %v2674_v10 = vadd.f32 %v2673_v5, %v2672_v19  ;;  %v2318_v19 = vsub.f32 %v6094_v50, %v5652_v7  ;;  %v2444_v5 = vmul.f32 %v2316_v17, %v2316_v17  ;;  %v2681_v30 = vsel %vm1514_vm2, %v2443_v58, 0.0  ;;  %v6109_v50 = vld [vmem:[#allocation2 + $0x3a8] sm:$0xff] }
 0x493   : > { %8193 = vst [vmem:[#allocation43_spill] sm:$0xff] %v6109_v50 }
 0x494   : > { %v2676_v6 = vadd.f32 %v2675_v8, %v2674_v10  ;;  %v2319_v10 = vsub.f32 %v6099_v42, %v5652_v7  ;;  %v2445_v8 = vmul.f32 %v2317_v44, %v2317_v44  ;;  %v2683_v17 = vsel %vm1514_vm2, %v2444_v5, 0.0  ;;  %v6114_v42 = vld [vmem:[#allocation2 + $0x3b0] sm:$0xff] }
 0x495   : > { %8194 = vst [vmem:[#allocation44_spill] sm:$0xff] %v6114_v42 }
 0x496   : > { %v2678_v47 = vadd.f32 %v2677_v3, %v2676_v6  ;;  %v2320_v6 = vsub.f32 %v6104_v21, %v5652_v7  ;;  %v2446_v3 = vmul.f32 %v2318_v19, %v2318_v19  ;;  %v2685_v44 = vsel %vm1514_vm2, %v2445_v8, 0.0  ;;  %v6119_v21 = vld [vmem:[#allocation2 + $0x3b8] sm:$0xff] }
 0x497   : > { %8195 = vst [vmem:[#allocation45_spill] sm:$0xff] %v6119_v21 }
 0x498   : > { %v2680_v53 = vadd.f32 %v2679_v60, %v2678_v47  ;;  %v2321_v47 = vsub.f32 %v6109_v50, %v5652_v7  ;;  %v2447_v60 = vmul.f32 %v2319_v10, %v2319_v10  ;;  %v2687_v19 = vsel %vm1514_vm2, %v2446_v3, 0.0  ;;  %v6124_v50 = vld [vmem:[#allocation2 + $0x3c0] sm:$0xff] }
 0x499   : > { %8196 = vst [vmem:[#allocation46_spill] sm:$0xff] %v6124_v50 }
 0x49a   : > { %v2682_v31 = vadd.f32 %v2681_v30, %v2680_v53  ;;  %v2322_v53 = vsub.f32 %v6114_v42, %v5652_v7  ;;  %v2448_v30 = vmul.f32 %v2320_v6, %v2320_v6  ;;  %v2689_v10 = vsel %vm1514_vm2, %v2447_v60, 0.0  ;;  %v6129_v42 = vld [vmem:[#allocation2 + $0x3c8] sm:$0xff] }
 0x49b   : > { %8197 = vst [vmem:[#allocation47_spill] sm:$0xff] %v6129_v42 }
 0x49c   : > { %v2684_v55 = vadd.f32 %v2683_v17, %v2682_v31  ;;  %v2323_v31 = vsub.f32 %v6119_v21, %v5652_v7  ;;  %v2449_v17 = vmul.f32 %v2321_v47, %v2321_v47  ;;  %v2691_v6 = vsel %vm1514_vm2, %v2448_v30, 0.0 }
 0x49d   : > { %v2325_v47 = vsub.f32 %v6129_v42, %v5652_v7 }
 0x49e   : > { %v2686_v58 = vadd.f32 %v2685_v44, %v2684_v55  ;;  %v2324_v55 = vsub.f32 %v6124_v50, %v5652_v7  ;;  %v2450_v44 = vmul.f32 %v2322_v53, %v2322_v53  ;;  %v2451_v34 = vmul.f32 %v2323_v31, %v2323_v31  ;;  %v6139_v50 = vld [vmem:[#allocation2 + $0x3d8] sm:$0xff] }
 0x49f   : > { %8199 = vst [vmem:[#allocation49_spill] sm:$0xff] %v6139_v50  ;;  %v2327_v31 = vsub.f32 %v6139_v50, %v5652_v7  ;;  %v6154_v50 = vld [vmem:[#allocation2 + $0x3f0] sm:$0xff] }
 0x4a0   : > { %v2688_v5 = vadd.f32 %v2687_v19, %v2686_v58  ;;  %v2693_v58 = vsel %vm1514_vm2, %v2449_v17, 0.0  ;;  %v6134_v19 = vld [vmem:[#allocation2 + $0x3d0] sm:$0xff]  ;;  %v2695_v53 = vsel %vm1514_vm2, %v2450_v44, 0.0  ;;  %v2697_v17 = vsel %vm1514_vm2, %v2451_v34, 0.0  ;;  %8202 = vst [vmem:[#allocation52_spill] sm:$0xff] %v6154_v50 }
 0x4a1   : > { %8198 = vst [vmem:[#allocation48_spill] sm:$0xff] %v6134_v19 }
 0x4a2   : > { %v2690_v8 = vadd.f32 %v2689_v10, %v2688_v5  ;;  %v2326_v5 = vsub.f32 %v6134_v19, %v5652_v7  ;;  %v2452_v10 = vmul.f32 %v2324_v55, %v2324_v55  ;;  %v6149_v19 = vld [vmem:[#allocation2 + $0x3e8] sm:$0xff] }
 0x4a3   : > { %8201 = vst [vmem:[#allocation51_spill] sm:$0xff] %v6149_v19 }
 0x4a4   : > { %v2692_v3 = vadd.f32 %v2691_v6, %v2690_v8  ;;  %v2453_v8 = vmul.f32 %v2325_v47, %v2325_v47  ;;  %v6144_v6 = vld [vmem:[#allocation2 + $0x3e0] sm:$0xff]  ;;  %v2699_v55 = vsel %vm1514_vm2, %v2452_v10, 0.0 }
 0x4a5   : > { %8200 = vst [vmem:[#allocation50_spill] sm:$0xff] %v6144_v6 }
 0x4a6   : > { %v2694_v60 = vadd.f32 %v2693_v58, %v2692_v3  ;;  %v2328_v3 = vsub.f32 %v6144_v6, %v5652_v7  ;;  %v2454_v58 = vmul.f32 %v2326_v5, %v2326_v5  ;;  %v2701_v47 = vsel %vm1514_vm2, %v2453_v8, 0.0  ;;  %v6159_v6 = vld [vmem:[#allocation2 + $0x3f8] sm:$0xff] }
 0x4a7   : > { %8203 = vst [vmem:[#allocation53_spill] sm:$0xff] %v6159_v6 }
 0x4a8   : > { %v2696_v30 = vadd.f32 %v2695_v53, %v2694_v60  ;;  %v2329_v60 = vsub.f32 %v6149_v19, %v5652_v7  ;;  %v2455_v53 = vmul.f32 %v2327_v31, %v2327_v31  ;;  %v2703_v5 = vsel %vm1514_vm2, %v2454_v58, 0.0 }
 0x4aa   : > { %v2698_v42 = vadd.f32 %v2697_v17, %v2696_v30  ;;  %v2330_v30 = vsub.f32 %v6154_v50, %v5652_v7  ;;  %v2456_v17 = vmul.f32 %v2328_v3, %v2328_v3  ;;  %v2705_v31 = vsel %vm1514_vm2, %v2455_v53, 0.0 }
 0x4ac   : > { %v2700_v44 = vadd.f32 %v2699_v55, %v2698_v42  ;;  %v2331_v42 = vsub.f32 %v6159_v6, %v5652_v7  ;;  %v2457_v55 = vmul.f32 %v2329_v60, %v2329_v60  ;;  %v2458_v8 = vmul.f32 %v2330_v30, %v2330_v30 }
 0x4ad   : > { %v2707_v21 = vsel %vm1514_vm2, %v2456_v17, 0.0  ;;  %v4845_v17 = vld [vmem:[#allocation2 + $0x90] sm:$0xff] }
 0x4ae   : > { %v2702_v34 = vadd.f32 %v2701_v47, %v2700_v44  ;;  %v2459_v47 = vmul.f32 %v2331_v42, %v2331_v42  ;;  %v2709_v50 = vsel %vm1514_vm2, %v2457_v55, 0.0  ;;  %v2711_v58 = vsel %vm1514_vm2, %v2458_v8, 0.0  ;;  %v4827_v42 = vld [vmem:[#allocation2] sm:$0xff] }
 0x4b0   : > { %v2704_v10 = vadd.f32 %v2703_v5, %v2702_v34  ;;  %v2713_v34 = vsel %vm1514_vm2, %v2459_v47, 0.0 }
 0x4b2   : > { %v2706_v19 = vadd.f32 %v2705_v31, %v2704_v10  ;;  %v4828_v31 = vld [vmem:[#allocation2 + $0x8] sm:$0xff] }
 0x4b4   : > { %v2708_v44 = vadd.f32 %v2707_v21, %v2706_v19 }
 0x4b6   : > { %v2710_v3 = vadd.f32 %v2709_v50, %v2708_v44  ;;  %v4829_v44 = vld [vmem:[#allocation2 + $0x10] sm:$0xff] }
 0x4b8   : > { %v2712_v22 = vadd.f32 %v2711_v58, %v2710_v3  ;;  %v4831_v58 = vld [vmem:[#allocation2 + $0x20] sm:$0xff] }
 0x4ba   : > { %v2714_v5 = vadd.f32 %v2713_v34, %v2712_v22 }
 0x4bc   : > { %v2715_v16 = vrot.slane %v2714_v5, 4 }
 0x4be   : > { %v2716_v7 = vadd.f32 %v2715_v16, %v2714_v5  ;;  %v4832_v5 = vld [vmem:[#allocation2 + $0x28] sm:$0xff] }
 0x4c0   : > { %v2717_v60 = vrot.slane %v2716_v7, 2 }
 0x4c2   : > { %v2718_v6 = vadd.f32 %v2717_v60, %v2716_v7  ;;  %v4833_v60 = vld [vmem:[#allocation2 + $0x30] sm:$0xff] }
 0x4c4   : > { %v2719_v53 = vrot.slane %v2718_v6, 1 }
 0x4c6   : > { %v2720_v10 = vadd.f32 %v2719_v53, %v2718_v6  ;;  %v2869_v6 = vld [vmem:[%s7967_s4] sm:$0x1] }
 0x4c8   : > { %4668 = vmatmul.mubr.msk.f32.vlgmr.msra.gmra.mrb[56].mxu1 %vm1514_vm2, %v2720_v10  ;;  %v4834_v10 = vld [vmem:[#allocation2 + $0x38] sm:$0xff] }
 0x4c9   : > { %4713 = vmatpush3.bf16.msra.mxu1 %v5618_v9  ;;  %4678 = vmatprep.mubr.msk.f32.mxu1 %vm4895_vm4, %v8148_v0  ;;  %v6181_v0 = vld [vmem:[%s7968_s5] sm:$0x1] }
 0x4ca   : > { %4714 = vmatprep.subr.bf16.mxu1 %v8149_v40 }
 0x4cd   : > { %4716 = vmatpush3.bf16.msra.mxu1 %v5628_v35 }
 0x59b   : > { %v2791_v50 = vpop.f32.mrb[56].mxu1 }
 0x59c   : > { %v4669_v21 = vpop.f32.mrb[57].mxu1  ;;  %4679 = vmatmul.mubr.msk.f32.vlgmr.msra.gmra.mrb[58].mxu1 %vm1998_vm5, %v2791_v50 }
 0x59d   : > { %v4835_v21 = vld [vmem:[#allocation2 + $0x40] sm:$0xff] }
 0x66f   : > { %v2864_v16 = vpop.f32.mrb[58].mxu1 }
 0x670   : > { %v2865_v22 = vadd.f32 1e-05, %v2864_v16  ;;  %v4680_v19 = vpop.f32.mrb[59].mxu1 }
 0x672   : > { %4825 = vrsqrt.f32 %v2865_v22  ;;  %v4836_v22 = vld [vmem:[#allocation2 + $0x48] sm:$0xff] }
 0x67c   : > { %v4826_v9 = vpop.eup %4825 }
 0x67d   : > { %v2870_v30 = vmul.f32 %v4826_v9, %v2869_v6  ;;  %v4837_v6 = vld [vmem:[#allocation2 + $0x50] sm:$0xff] }
 0x67f   : > { %v6184_v35 = vmul.f32 %v2870_v30, %v5646_v61  ;;  %v6187_v40 = vrot.slane %v2870_v30, %v5648_v2  ;;  %v4830_v61 = vld [vmem:[#allocation2 + $0x18] sm:$0xff] }
 0x680   : > { %v4838_v30 = vld [vmem:[#allocation2 + $0x58] sm:$0xff] }
 0x681   : > { %v6192_v55 = vmul.f32 %v4827_v42, %v6187_v40  ;;  %v6195_v8 = vmul.f32 %v4828_v31, %v6187_v40  ;;  %v6198_v47 = vmul.f32 %v4829_v44, %v6187_v40  ;;  %v6201_v3 = vmul.f32 %v4830_v61, %v6187_v40  ;;  %v4839_v31 = vld [vmem:[#allocation2 + $0x60] sm:$0xff]  ;;  %v4840_v61 = vld [vmem:[#allocation2 + $0x68] sm:$0xff] }
 0x682   : > { %v6204_v34 = vmul.f32 %v4831_v58, %v6187_v40  ;;  %v6207_v7 = vmul.f32 %v4832_v5, %v6187_v40  ;;  %v6210_v53 = vmul.f32 %v4833_v60, %v6187_v40  ;;  %v6213_v50 = vmul.f32 %v4834_v10, %v6187_v40  ;;  %v4841_v5 = vld [vmem:[#allocation2 + $0x70] sm:$0xff]  ;;  %v4842_v10 = vld [vmem:[#allocation2 + $0x78] sm:$0xff] }
 0x683   : > { %v6216_v16 = vmul.f32 %v4835_v21, %v6187_v40  ;;  %v6219_v19 = vmul.f32 %v4836_v22, %v6187_v40  ;;  %v6222_v9 = vmul.f32 %v4837_v6, %v6187_v40  ;;  %v6225_v42 = vmul.f32 %v4838_v30, %v6187_v40  ;;  %v4843_v22 = vld [vmem:[#allocation2 + $0x80] sm:$0xff]  ;;  %v4844_v30 = vld [vmem:[#allocation2 + $0x88] sm:$0xff] }
 0x684   : > { %v6228_v44 = vmul.f32 %v4839_v31, %v6187_v40  ;;  %v6231_v58 = vmul.f32 %v4840_v61, %v6187_v40  ;;  %v6234_v60 = vmul.f32 %v4841_v5, %v6187_v40  ;;  %v6237_v21 = vmul.f32 %v4842_v10, %v6187_v40 }
 0x685   : > { %v6240_v6 = vmul.f32 %v4843_v22, %v6187_v40  ;;  %v6243_v31 = vmul.f32 %v4844_v30, %v6187_v40  ;;  %v6246_v61 = vmul.f32 %v4845_v17, %v6187_v40 }
 0x686   : > { %8204 = vst [vmem:[#allocation54_spill] sm:$0xff] %v6231_v58  ;;  %8205 = vst [vmem:[#allocation55_spill] sm:$0xff] %v6234_v60  ;;  %v4846_v58 = vld [vmem:[#allocation2 + $0x98] sm:$0xff]  ;;  %v4847_v60 = vld [vmem:[#allocation2 + $0xa0] sm:$0xff] }
 0x687   : > { %8206 = vst [vmem:[#allocation56_spill] sm:$0xff] %v6237_v21  ;;  %8207 = vst [vmem:[#allocation57_spill] sm:$0xff] %v6240_v6  ;;  %v6249_v5 = vmul.f32 %v4846_v58, %v6187_v40  ;;  %v6252_v10 = vmul.f32 %v4847_v60, %v6187_v40  ;;  %v4848_v21 = vld [vmem:[#allocation2 + $0xa8] sm:$0xff]  ;;  %v4849_v6 = vld [vmem:[#allocation2 + $0xb0] sm:$0xff] }
 0x688   : > { %8208 = vst [vmem:[#allocation58_spill] sm:$0xff] %v6243_v31  ;;  %8209 = vst [vmem:[#allocation59_spill] sm:$0xff] %v6246_v61  ;;  %v6255_v22 = vmul.f32 %v4848_v21, %v6187_v40  ;;  %v6258_v30 = vmul.f32 %v4849_v6, %v6187_v40  ;;  %v4850_v31 = vld [vmem:[#allocation2 + $0xb8] sm:$0xff]  ;;  %v4851_v61 = vld [vmem:[#allocation2 + $0xc0] sm:$0xff] }
 0x689   : > { %8210 = vst [vmem:[#allocation60_spill] sm:$0xff] %v6249_v5  ;;  %8211 = vst [vmem:[#allocation61_spill] sm:$0xff] %v6252_v10  ;;  %v6261_v17 = vmul.f32 %v4850_v31, %v6187_v40  ;;  %v6264_v58 = vmul.f32 %v4851_v61, %v6187_v40  ;;  %v4852_v5 = vld [vmem:[#allocation2 + $0xc8] sm:$0xff]  ;;  %v4853_v10 = vld [vmem:[#allocation2 + $0xd0] sm:$0xff] }
 0x68a   : > { %8212 = vst [vmem:[#allocation62_spill] sm:$0xff] %v6255_v22  ;;  %8213 = vst [vmem:[#allocation63_spill] sm:$0xff] %v6258_v30  ;;  %v6267_v60 = vmul.f32 %v4852_v5, %v6187_v40  ;;  %v6270_v21 = vmul.f32 %v4853_v10, %v6187_v40  ;;  %v4854_v22 = vld [vmem:[#allocation2 + $0xd8] sm:$0xff]  ;;  %v4855_v30 = vld [vmem:[#allocation2 + $0xe0] sm:$0xff] }
 0x68b   : > { %8214 = vst [vmem:[#allocation64_spill] sm:$0xff] %v6261_v17  ;;  %8215 = vst [vmem:[#allocation65_spill] sm:$0xff] %v6264_v58  ;;  %v6273_v6 = vmul.f32 %v4854_v22, %v6187_v40  ;;  %v6276_v31 = vmul.f32 %v4855_v30, %v6187_v40  ;;  %v4856_v17 = vld [vmem:[#allocation2 + $0xe8] sm:$0xff]  ;;  %v4857_v58 = vld [vmem:[#allocation2 + $0xf0] sm:$0xff] }
 0x68c   : > { %8216 = vst [vmem:[#allocation66_spill] sm:$0xff] %v6267_v60  ;;  %8217 = vst [vmem:[#allocation67_spill] sm:$0xff] %v6270_v21  ;;  %v6279_v61 = vmul.f32 %v4856_v17, %v6187_v40  ;;  %v6282_v5 = vmul.f32 %v4857_v58, %v6187_v40  ;;  %v4858_v60 = vld [vmem:[#allocation2 + $0xf8] sm:$0xff]  ;;  %v4859_v21 = vld [vmem:[#allocation2 + $0x100] sm:$0xff] }
 0x68d   : > { %8218 = vst [vmem:[#allocation68_spill] sm:$0xff] %v6273_v6  ;;  %8219 = vst [vmem:[#allocation69_spill] sm:$0xff] %v6276_v31  ;;  %v6285_v10 = vmul.f32 %v4858_v60, %v6187_v40  ;;  %v6288_v22 = vmul.f32 %v4859_v21, %v6187_v40  ;;  %v4860_v6 = vld [vmem:[#allocation2 + $0x108] sm:$0xff]  ;;  %v4861_v31 = vld [vmem:[#allocation2 + $0x110] sm:$0xff] }
 0x68e   : > { %8220 = vst [vmem:[#allocation70_spill] sm:$0xff] %v6279_v61  ;;  %8221 = vst [vmem:[#allocation71_spill] sm:$0xff] %v6282_v5  ;;  %v6291_v30 = vmul.f32 %v4860_v6, %v6187_v40  ;;  %v6294_v17 = vmul.f32 %v4861_v31, %v6187_v40  ;;  %v4862_v61 = vld [vmem:[#allocation2 + $0x118] sm:$0xff]  ;;  %v4863_v5 = vld [vmem:[#allocation2 + $0x120] sm:$0xff] }
 0x68f   : > { %8222 = vst [vmem:[#allocation72_spill] sm:$0xff] %v6285_v10  ;;  %8223 = vst [vmem:[#allocation73_spill] sm:$0xff] %v6288_v22  ;;  %v6297_v58 = vmul.f32 %v4862_v61, %v6187_v40  ;;  %v6300_v60 = vmul.f32 %v4863_v5, %v6187_v40  ;;  %v4864_v10 = vld [vmem:[#allocation2 + $0x128] sm:$0xff]  ;;  %v4865_v22 = vld [vmem:[#allocation2 + $0x130] sm:$0xff] }
 0x690   : > { %8224 = vst [vmem:[#allocation74_spill] sm:$0xff] %v6291_v30  ;;  %8225 = vst [vmem:[#allocation75_spill] sm:$0xff] %v6294_v17  ;;  %v6303_v21 = vmul.f32 %v4864_v10, %v6187_v40  ;;  %v6306_v6 = vmul.f32 %v4865_v22, %v6187_v40  ;;  %v4866_v30 = vld [vmem:[#allocation2 + $0x138] sm:$0xff]  ;;  %v4867_v17 = vld [vmem:[#allocation2 + $0x140] sm:$0xff]  ;;  %v6319_v10 = vmul.f32 %v6187_v40, %v5734_v46 }
 0x691   : > { %8226 = vst [vmem:[#allocation76_spill] sm:$0xff] %v6297_v58  ;;  %v6309_v31 = vmul.f32 %v4866_v30, %v6187_v40  ;;  %v6312_v61 = vmul.f32 %v4867_v17, %v6187_v40  ;;  %v4868_v58 = vld [vmem:[#allocation2 + $0x148] sm:$0xff]  ;;  %v6323_v22 = vmul.f32 %v6187_v40, %v5739_v48  ;;  %v6327_v30 = vmul.f32 %v6187_v40, %v5744_v51 }
 0x692   : > { %v6315_v5 = vmul.f32 %v4868_v58, %v6187_v40  ;;  %v6331_v17 = vmul.f32 %v6187_v40, %v5749_v45  ;;  %v6335_v58 = vmul.f32 %v6187_v40, %v5754_v57  ;;  %v6339_v46 = vmul.f32 %v6187_v40, %v5759_v27 }
 0x693   : > { %v6343_v48 = vmul.f32 %v6187_v40, %v5764_v54  ;;  %v6347_v51 = vmul.f32 %v6187_v40, %v5769_v26  ;;  %v6351_v45 = vmul.f32 %v6187_v40, %v5774_v13  ;;  %v6355_v57 = vmul.f32 %v6187_v40, %v5779_v11 }
 0x694   : > { %v6359_v27 = vmul.f32 %v6187_v40, %v5784_v14  ;;  %v6363_v54 = vmul.f32 %v6187_v40, %v5789_v29  ;;  %v6367_v26 = vmul.f32 %v6187_v40, %v5794_v56  ;;  %v6371_v13 = vmul.f32 %v6187_v40, %v5799_v52 }
 0x695   : > { %v6375_v11 = vmul.f32 %v6187_v40, %v5804_v25  ;;  %v6379_v14 = vmul.f32 %v6187_v40, %v5809_v4  ;;  %v6383_v29 = vmul.f32 %v6187_v40, %v5814_v63  ;;  %v6387_v56 = vmul.f32 %v6187_v40, %v5819_v20 }
 0x696   : > { %v6391_v52 = vmul.f32 %v6187_v40, %v5824_v49  ;;  %v6395_v25 = vmul.f32 %v6187_v40, %v5829_v32  ;;  %v6399_v4 = vmul.f32 %v6187_v40, %v5834_v59  ;;  %v6403_v63 = vmul.f32 %v6187_v40, %v5839_v39 }
 0x697   : > { %v6407_v20 = vmul.f32 %v6187_v40, %v5844_v23  ;;  %v6411_v49 = vmul.f32 %v6187_v40, %v5849_v33  ;;  %v6415_v32 = vmul.f32 %v6187_v40, %v5854_v24  ;;  %v6419_v59 = vmul.f32 %v6187_v40, %v5859_v37 }
 0x698   : > { %v6423_v39 = vmul.f32 %v6187_v40, %v5864_v18  ;;  %v6427_v23 = vmul.f32 %v6187_v40, %v5869_v36  ;;  %v6431_v33 = vmul.f32 %v6187_v40, %v5874_v1  ;;  %v6435_v24 = vmul.f32 %v6187_v40, %v5879_v12 }
 0x699   : > { %v6439_v37 = vmul.f32 %v6187_v40, %v5884_v38  ;;  %v6443_v18 = vmul.f32 %v6187_v40, %v5889_v41  ;;  %v6447_v36 = vmul.f32 %v6187_v40, %v5894_v62  ;;  %v6451_v1 = vmul.f32 %v6187_v40, %v5899_v43 }
 0x69a   : > { %v6455_v12 = vmul.f32 %v6187_v40, %v5904_v28  ;;  %v6459_v38 = vmul.f32 %v6187_v40, %v5909_v15 }
 0x69b   : > { %8227 = vst [vmem:[#allocation77_spill] sm:$0xff] %v6439_v37  ;;  %8228 = vst [vmem:[#allocation78_spill] sm:$0xff] %v6443_v18  ;;  %v8233_v37 = vld [vmem:[#allocation8_spill] sm:$0xff]  ;;  %v8235_v18 = vld [vmem:[#allocation10_spill] sm:$0xff] }
 0x69c   : > { %8229 = vst [vmem:[#allocation79_spill] sm:$0xff] %v6447_v36  ;;  %8230 = vst [vmem:[#allocation80_spill] sm:$0xff] %v6451_v1  ;;  %v6463_v41 = vmul.f32 %v6187_v40, %v8233_v37  ;;  %v6467_v62 = vmul.f32 %v6187_v40, %v8235_v18  ;;  %v8237_v36 = vld [vmem:[#allocation7_spill] sm:$0xff]  ;;  %v8239_v1 = vld [vmem:[#allocation9_spill] sm:$0xff] }
 0x69d   : > { %8231 = vst [vmem:[#allocation81_spill] sm:$0xff] %v6455_v12  ;;  %8232 = vst [vmem:[#allocation82_spill] sm:$0xff] %v6459_v38  ;;  %v6471_v43 = vmul.f32 %v6187_v40, %v8237_v36  ;;  %v6475_v28 = vmul.f32 %v6187_v40, %v8239_v1  ;;  %v8241_v12 = vld [vmem:[#allocation4_spill] sm:$0xff]  ;;  %v8243_v38 = vld [vmem:[#allocation5_spill] sm:$0xff] }
 0x69e   : > { %8234 = vst [vmem:[#allocation8_spill] sm:$0xff] %v6463_v41  ;;  %8236 = vst [vmem:[#allocation10_spill] sm:$0xff] %v6467_v62  ;;  %v6479_v15 = vmul.f32 %v6187_v40, %v8241_v12  ;;  %v6483_v37 = vmul.f32 %v6187_v40, %v8243_v38  ;;  %v8245_v41 = vld [vmem:[#allocation6_spill] sm:$0xff]  ;;  %v8247_v62 = vld [vmem:[#allocation11_spill] sm:$0xff] }
 0x69f   : > { %8238 = vst [vmem:[#allocation7_spill] sm:$0xff] %v6471_v43  ;;  %8240 = vst [vmem:[#allocation9_spill] sm:$0xff] %v6475_v28  ;;  %v6487_v18 = vmul.f32 %v6187_v40, %v8245_v41  ;;  %v6491_v36 = vmul.f32 %v6187_v40, %v8247_v62  ;;  %v8249_v43 = vld [vmem:[#allocation12_spill] sm:$0xff]  ;;  %v8251_v28 = vld [vmem:[#allocation13_spill] sm:$0xff] }
 0x6a0   : > { %8242 = vst [vmem:[#allocation4_spill] sm:$0xff] %v6479_v15  ;;  %8244 = vst [vmem:[#allocation5_spill] sm:$0xff] %v6483_v37  ;;  %v6495_v1 = vmul.f32 %v6187_v40, %v8249_v43  ;;  %v6499_v12 = vmul.f32 %v6187_v40, %v8251_v28  ;;  %v8253_v15 = vld [vmem:[#allocation14_spill] sm:$0xff]  ;;  %v8255_v37 = vld [vmem:[#allocation15_spill] sm:$0xff] }
 0x6a1   : > { %8246 = vst [vmem:[#allocation6_spill] sm:$0xff] %v6487_v18  ;;  %8248 = vst [vmem:[#allocation11_spill] sm:$0xff] %v6491_v36  ;;  %v6503_v38 = vmul.f32 %v6187_v40, %v8253_v15  ;;  %v6507_v41 = vmul.f32 %v6187_v40, %v8255_v37  ;;  %v8257_v18 = vld [vmem:[#allocation16_spill] sm:$0xff]  ;;  %v8259_v36 = vld [vmem:[#allocation17_spill] sm:$0xff] }
 0x6a2   : > { %8250 = vst [vmem:[#allocation12_spill] sm:$0xff] %v6495_v1  ;;  %8252 = vst [vmem:[#allocation13_spill] sm:$0xff] %v6499_v12  ;;  %v6511_v62 = vmul.f32 %v6187_v40, %v8257_v18  ;;  %v6515_v43 = vmul.f32 %v6187_v40, %v8259_v36  ;;  %v8261_v1 = vld [vmem:[#allocation18_spill] sm:$0xff]  ;;  %v8263_v12 = vld [vmem:[#allocation19_spill] sm:$0xff] }
 0x6a3   : > { %8254 = vst [vmem:[#allocation14_spill] sm:$0xff] %v6503_v38  ;;  %8256 = vst [vmem:[#allocation15_spill] sm:$0xff] %v6507_v41  ;;  %v6519_v28 = vmul.f32 %v6187_v40, %v8261_v1  ;;  %v6523_v15 = vmul.f32 %v6187_v40, %v8263_v12  ;;  %v8265_v38 = vld [vmem:[#allocation20_spill] sm:$0xff]  ;;  %v8267_v41 = vld [vmem:[#allocation21_spill] sm:$0xff] }
 0x6a4   : > { %8258 = vst [vmem:[#allocation16_spill] sm:$0xff] %v6511_v62  ;;  %8260 = vst [vmem:[#allocation17_spill] sm:$0xff] %v6515_v43  ;;  %v6527_v37 = vmul.f32 %v6187_v40, %v8265_v38  ;;  %v6531_v18 = vmul.f32 %v6187_v40, %v8267_v41  ;;  %v8269_v62 = vld [vmem:[#allocation22_spill] sm:$0xff]  ;;  %v8271_v43 = vld [vmem:[#allocation23_spill] sm:$0xff] }
 0x6a5   : > { %8262 = vst [vmem:[#allocation18_spill] sm:$0xff] %v6519_v28  ;;  %8264 = vst [vmem:[#allocation19_spill] sm:$0xff] %v6523_v15  ;;  %v6535_v36 = vmul.f32 %v6187_v40, %v8269_v62  ;;  %v6539_v1 = vmul.f32 %v6187_v40, %v8271_v43  ;;  %v8273_v28 = vld [vmem:[#allocation24_spill] sm:$0xff]  ;;  %v8275_v15 = vld [vmem:[#allocation25_spill] sm:$0xff] }
 0x6a6   : > { %8266 = vst [vmem:[#allocation20_spill] sm:$0xff] %v6527_v37  ;;  %8268 = vst [vmem:[#allocation21_spill] sm:$0xff] %v6531_v18  ;;  %v6543_v12 = vmul.f32 %v6187_v40, %v8273_v28  ;;  %v6547_v38 = vmul.f32 %v6187_v40, %v8275_v15  ;;  %v8277_v37 = vld [vmem:[#allocation26_spill] sm:$0xff]  ;;  %v8279_v18 = vld [vmem:[#allocation27_spill] sm:$0xff] }
 0x6a7   : > { %8270 = vst [vmem:[#allocation22_spill] sm:$0xff] %v6535_v36  ;;  %8272 = vst [vmem:[#allocation23_spill] sm:$0xff] %v6539_v1  ;;  %v6551_v41 = vmul.f32 %v6187_v40, %v8277_v37  ;;  %v6555_v62 = vmul.f32 %v6187_v40, %v8279_v18  ;;  %v8281_v36 = vld [vmem:[#allocation28_spill] sm:$0xff]  ;;  %v8283_v1 = vld [vmem:[#allocation29_spill] sm:$0xff] }
 0x6a8   : > { %8274 = vst [vmem:[#allocation24_spill] sm:$0xff] %v6543_v12  ;;  %8276 = vst [vmem:[#allocation25_spill] sm:$0xff] %v6547_v38  ;;  %v6559_v43 = vmul.f32 %v6187_v40, %v8281_v36  ;;  %v6563_v28 = vmul.f32 %v6187_v40, %v8283_v1  ;;  %v8285_v12 = vld [vmem:[#allocation30_spill] sm:$0xff]  ;;  %v8287_v38 = vld [vmem:[#allocation31_spill] sm:$0xff] }
 0x6a9   : > { %8278 = vst [vmem:[#allocation26_spill] sm:$0xff] %v6551_v41  ;;  %8280 = vst [vmem:[#allocation27_spill] sm:$0xff] %v6555_v62  ;;  %v6567_v15 = vmul.f32 %v6187_v40, %v8285_v12  ;;  %v6571_v37 = vmul.f32 %v6187_v40, %v8287_v38  ;;  %v8289_v41 = vld [vmem:[#allocation32_spill] sm:$0xff]  ;;  %v8291_v62 = vld [vmem:[#allocation33_spill] sm:$0xff] }
 0x6aa   : > { %8282 = vst [vmem:[#allocation28_spill] sm:$0xff] %v6559_v43  ;;  %8284 = vst [vmem:[#allocation29_spill] sm:$0xff] %v6563_v28  ;;  %v6575_v18 = vmul.f32 %v6187_v40, %v8289_v41  ;;  %v6579_v36 = vmul.f32 %v6187_v40, %v8291_v62  ;;  %v8293_v43 = vld [vmem:[#allocation34_spill] sm:$0xff]  ;;  %v8295_v28 = vld [vmem:[#allocation35_spill] sm:$0xff] }
 0x6ab   : > { %8286 = vst [vmem:[#allocation30_spill] sm:$0xff] %v6567_v15  ;;  %8288 = vst [vmem:[#allocation31_spill] sm:$0xff] %v6571_v37  ;;  %v6583_v1 = vmul.f32 %v6187_v40, %v8293_v43  ;;  %v6587_v12 = vmul.f32 %v6187_v40, %v8295_v28  ;;  %v8297_v15 = vld [vmem:[#allocation36_spill] sm:$0xff]  ;;  %v8299_v37 = vld [vmem:[#allocation37_spill] sm:$0xff] }
 0x6ac   : > { %8290 = vst [vmem:[#allocation32_spill] sm:$0xff] %v6575_v18  ;;  %8292 = vst [vmem:[#allocation33_spill] sm:$0xff] %v6579_v36  ;;  %v6591_v38 = vmul.f32 %v6187_v40, %v8297_v15  ;;  %v6595_v41 = vmul.f32 %v6187_v40, %v8299_v37  ;;  %v8301_v18 = vld [vmem:[#allocation38_spill] sm:$0xff]  ;;  %v8303_v36 = vld [vmem:[#allocation39_spill] sm:$0xff] }
 0x6ad   : > { %8294 = vst [vmem:[#allocation34_spill] sm:$0xff] %v6583_v1  ;;  %8296 = vst [vmem:[#allocation35_spill] sm:$0xff] %v6587_v12  ;;  %v6599_v62 = vmul.f32 %v6187_v40, %v8301_v18  ;;  %v6603_v43 = vmul.f32 %v6187_v40, %v8303_v36  ;;  %v8305_v1 = vld [vmem:[#allocation40_spill] sm:$0xff]  ;;  %v8307_v12 = vld [vmem:[#allocation41_spill] sm:$0xff] }
 0x6ae   : > { %8298 = vst [vmem:[#allocation36_spill] sm:$0xff] %v6591_v38  ;;  %8300 = vst [vmem:[#allocation37_spill] sm:$0xff] %v6595_v41  ;;  %v6607_v28 = vmul.f32 %v6187_v40, %v8305_v1  ;;  %v6611_v15 = vmul.f32 %v6187_v40, %v8307_v12  ;;  %v8309_v38 = vld [vmem:[#allocation42_spill] sm:$0xff]  ;;  %v8311_v41 = vld [vmem:[#allocation43_spill] sm:$0xff] }
 0x6af   : > { %8302 = vst [vmem:[#allocation38_spill] sm:$0xff] %v6599_v62  ;;  %8304 = vst [vmem:[#allocation39_spill] sm:$0xff] %v6603_v43  ;;  %v6615_v37 = vmul.f32 %v6187_v40, %v8309_v38  ;;  %v6619_v18 = vmul.f32 %v6187_v40, %v8311_v41  ;;  %v8313_v62 = vld [vmem:[#allocation44_spill] sm:$0xff]  ;;  %v8314_v43 = vld [vmem:[#allocation45_spill] sm:$0xff] }
 0x6b0   : > { %8306 = vst [vmem:[#allocation40_spill] sm:$0xff] %v6607_v28  ;;  %8308 = vst [vmem:[#allocation41_spill] sm:$0xff] %v6611_v15  ;;  %v6623_v36 = vmul.f32 %v6187_v40, %v8313_v62  ;;  %v6627_v1 = vmul.f32 %v6187_v40, %v8314_v43  ;;  %v8316_v28 = vld [vmem:[#allocation46_spill] sm:$0xff]  ;;  %v8318_v15 = vld [vmem:[#allocation47_spill] sm:$0xff]  ;;  %v8324_v43 = vsub.f32 %v6181_v0, %v6184_v35 }
 0x6b1   : > { %8310 = vst [vmem:[#allocation42_spill] sm:$0xff] %v6615_v37  ;;  %8312 = vst [vmem:[#allocation43_spill] sm:$0xff] %v6619_v18  ;;  %v6631_v12 = vmul.f32 %v6187_v40, %v8316_v28  ;;  %v6635_v38 = vmul.f32 %v6187_v40, %v8318_v15  ;;  %v8320_v37 = vld [vmem:[#allocation48_spill] sm:$0xff]  ;;  %v8322_v18 = vld [vmem:[#allocation49_spill] sm:$0xff] }
 0x6b2   : > { %8315 = vst [vmem:[#allocation44_spill] sm:$0xff] %v6627_v1  ;;  %v6639_v41 = vmul.f32 %v6187_v40, %v8320_v37  ;;  %v6643_v62 = vmul.f32 %v6187_v40, %v8322_v18  ;;  %v6649_v1 = vrot.slane %v8324_v43, %v5648_v2  ;;  %v8325_v28 = vld [vmem:[#allocation50_spill] sm:$0xff]  ;;  %v8326_v15 = vld [vmem:[#allocation51_spill] sm:$0xff]  ;;  %v8327_v37 = vld [vmem:[#allocation52_spill] sm:$0xff] }
 0x6b3   : > { %8317 = vst [vmem:[#allocation45_spill] sm:$0xff] %v6631_v12  ;;  %8319 = vst [vmem:[#allocation46_spill] sm:$0xff] %v6635_v38  ;;  %v6653_v12 = vmul.f32 %v6187_v40, %v8325_v28  ;;  %v6657_v38 = vmul.f32 %v6187_v40, %v8326_v15  ;;  %v8328_v18 = vld [vmem:[#allocation53_spill] sm:$0xff]  ;;  %v8341_v28 = vld [vmem:[#allocation54_spill] sm:$0xff] }
 0x6b4   : > { %8321 = vst [vmem:[#allocation47_spill] sm:$0xff] %v6639_v41  ;;  %8323 = vst [vmem:[#allocation48_spill] sm:$0xff] %v6643_v62  ;;  %v6661_v41 = vmul.f32 %v6187_v40, %v8327_v37  ;;  %v6665_v62 = vmul.f32 %v6187_v40, %v8328_v18  ;;  %v6669_v2 = vadd.f32 %v6649_v1, %v6192_v55  ;;  %v8343_v15 = vld [vmem:[#allocation55_spill] sm:$0xff]  ;;  %v8345_v37 = vld [vmem:[#allocation56_spill] sm:$0xff] }
 0x6b5   : > { %v6673_v0 = vadd.f32 %v6649_v1, %v6195_v8  ;;  %v6677_v35 = vadd.f32 %v6649_v1, %v6198_v47  ;;  %v6681_v43 = vadd.f32 %v6649_v1, %v6201_v3  ;;  %v6685_v40 = vadd.f32 %v6649_v1, %v6204_v34  ;;  %v8347_v18 = vld [vmem:[#allocation57_spill] sm:$0xff] }
 0x6b6   : > { %v6689_v55 = vadd.f32 %v6649_v1, %v6207_v7  ;;  %v6693_v8 = vadd.f32 %v6649_v1, %v6210_v53  ;;  %v6697_v47 = vadd.f32 %v6649_v1, %v6213_v50  ;;  %v6701_v3 = vadd.f32 %v6649_v1, %v6216_v16 }
 0x6b7   : > { %8329 = vst [vmem:[#allocation49_spill] sm:$0xff] %v6673_v0  ;;  %8330 = vst [vmem:[#allocation50_spill] sm:$0xff] %v6677_v35  ;;  %v6705_v34 = vadd.f32 %v6649_v1, %v6219_v19  ;;  %v6709_v7 = vadd.f32 %v6649_v1, %v6222_v9  ;;  %v6713_v53 = vadd.f32 %v6649_v1, %v6225_v42 }
 0x6b8   : > { %8331 = vst [vmem:[#allocation51_spill] sm:$0xff] %v6681_v43  ;;  %8332 = vst [vmem:[#allocation52_spill] sm:$0xff] %v6685_v40  ;;  %v6717_v50 = vadd.f32 %v6649_v1, %v6228_v44  ;;  %v6721_v16 = vadd.f32 %v6649_v1, %v8341_v28  ;;  %v6725_v19 = vadd.f32 %v6649_v1, %v8343_v15 }
 0x6b9   : > { %8333 = vst [vmem:[#allocation53_spill] sm:$0xff] %v6689_v55  ;;  %8334 = vst [vmem:[#allocation83_spill] sm:$0xff] %v6693_v8  ;;  %v6729_v9 = vadd.f32 %v6649_v1, %v8345_v37  ;;  %v6733_v42 = vadd.f32 %v6649_v1, %v8347_v18 }
 0x6ba   : > { %8335 = vst [vmem:[#allocation84_spill] sm:$0xff] %v6697_v47  ;;  %8336 = vst [vmem:[#allocation85_spill] sm:$0xff] %v6701_v3 }
 0x6bb   : > { %8337 = vst [vmem:[#allocation86_spill] sm:$0xff] %v6705_v34  ;;  %8338 = vst [vmem:[#allocation87_spill] sm:$0xff] %v6709_v7 }
 0x6bc   : > { %8339 = vst [vmem:[#allocation88_spill] sm:$0xff] %v6713_v53  ;;  %8340 = vst [vmem:[#allocation89_spill] sm:$0xff] %v6717_v50  ;;  %v8349_v53 = vld [vmem:[#allocation58_spill] sm:$0xff]  ;;  %v8351_v50 = vld [vmem:[#allocation59_spill] sm:$0xff] }
 0x6bd   : > { %8342 = vst [vmem:[#allocation54_spill] sm:$0xff] %v6721_v16  ;;  %8344 = vst [vmem:[#allocation55_spill] sm:$0xff] %v6725_v19  ;;  %v6737_v44 = vadd.f32 %v6649_v1, %v8349_v53  ;;  %v6741_v28 = vadd.f32 %v6649_v1, %v8351_v50  ;;  %v8353_v16 = vld [vmem:[#allocation60_spill] sm:$0xff]  ;;  %v8355_v19 = vld [vmem:[#allocation61_spill] sm:$0xff] }
 0x6be   : > { %8346 = vst [vmem:[#allocation56_spill] sm:$0xff] %v6729_v9  ;;  %8348 = vst [vmem:[#allocation57_spill] sm:$0xff] %v6733_v42  ;;  %v6745_v15 = vadd.f32 %v6649_v1, %v8353_v16  ;;  %v6749_v37 = vadd.f32 %v6649_v1, %v8355_v19  ;;  %v8357_v9 = vld [vmem:[#allocation62_spill] sm:$0xff]  ;;  %v8359_v42 = vld [vmem:[#allocation63_spill] sm:$0xff] }
 0x6bf   : > { %8350 = vst [vmem:[#allocation58_spill] sm:$0xff] %v6737_v44  ;;  %8352 = vst [vmem:[#allocation59_spill] sm:$0xff] %v6741_v28  ;;  %v6753_v18 = vadd.f32 %v6649_v1, %v8357_v9  ;;  %v6757_v53 = vadd.f32 %v6649_v1, %v8359_v42  ;;  %v8361_v44 = vld [vmem:[#allocation64_spill] sm:$0xff]  ;;  %v8363_v28 = vld [vmem:[#allocation65_spill] sm:$0xff] }
 0x6c0   : > { %8354 = vst [vmem:[#allocation60_spill] sm:$0xff] %v6745_v15  ;;  %8356 = vst [vmem:[#allocation61_spill] sm:$0xff] %v6749_v37  ;;  %v6761_v50 = vadd.f32 %v6649_v1, %v8361_v44  ;;  %v6765_v16 = vadd.f32 %v6649_v1, %v8363_v28  ;;  %v8365_v15 = vld [vmem:[#allocation66_spill] sm:$0xff]  ;;  %v8367_v37 = vld [vmem:[#allocation67_spill] sm:$0xff] }
 0x6c1   : > { %8358 = vst [vmem:[#allocation62_spill] sm:$0xff] %v6753_v18  ;;  %8360 = vst [vmem:[#allocation63_spill] sm:$0xff] %v6757_v53  ;;  %v6769_v19 = vadd.f32 %v6649_v1, %v8365_v15  ;;  %v6773_v9 = vadd.f32 %v6649_v1, %v8367_v37  ;;  %v8369_v18 = vld [vmem:[#allocation68_spill] sm:$0xff]  ;;  %v8371_v53 = vld [vmem:[#allocation69_spill] sm:$0xff] }
 0x6c2   : > { %8362 = vst [vmem:[#allocation64_spill] sm:$0xff] %v6761_v50  ;;  %8364 = vst [vmem:[#allocation65_spill] sm:$0xff] %v6765_v16  ;;  %v6777_v42 = vadd.f32 %v6649_v1, %v8369_v18  ;;  %v6781_v44 = vadd.f32 %v6649_v1, %v8371_v53  ;;  %v8373_v50 = vld [vmem:[#allocation70_spill] sm:$0xff]  ;;  %v8375_v16 = vld [vmem:[#allocation71_spill] sm:$0xff] }
 0x6c3   : > { %8366 = vst [vmem:[#allocation66_spill] sm:$0xff] %v6769_v19  ;;  %8368 = vst [vmem:[#allocation67_spill] sm:$0xff] %v6773_v9  ;;  %v6785_v28 = vadd.f32 %v6649_v1, %v8373_v50  ;;  %v6789_v15 = vadd.f32 %v6649_v1, %v8375_v16  ;;  %v8376_v19 = vld [vmem:[#allocation72_spill] sm:$0xff]  ;;  %v8377_v9 = vld [vmem:[#allocation73_spill] sm:$0xff] }
 0x6c4   : > { %8370 = vst [vmem:[#allocation68_spill] sm:$0xff] %v6777_v42  ;;  %8372 = vst [vmem:[#allocation69_spill] sm:$0xff] %v6781_v44  ;;  %v6793_v37 = vadd.f32 %v6649_v1, %v8376_v19  ;;  %v6797_v18 = vadd.f32 %v6649_v1, %v8377_v9  ;;  %v8378_v42 = vld [vmem:[#allocation74_spill] sm:$0xff]  ;;  %v8379_v44 = vld [vmem:[#allocation75_spill] sm:$0xff]  ;;  %v6813_v19 = vadd.f32 %v6649_v1, %v6300_v60 }
 0x6c5   : > { %8374 = vst [vmem:[#allocation70_spill] sm:$0xff] %v6785_v28  ;;  %v6801_v53 = vadd.f32 %v6649_v1, %v8378_v42  ;;  %v6805_v50 = vadd.f32 %v6649_v1, %v8379_v44  ;;  %v8380_v28 = vld [vmem:[#allocation76_spill] sm:$0xff]  ;;  %v6817_v9 = vadd.f32 %v6649_v1, %v6303_v21  ;;  %v6821_v42 = vadd.f32 %v6649_v1, %v6306_v6 }
 0x6c6   : > { %v6809_v16 = vadd.f32 %v6649_v1, %v8380_v28  ;;  %v6825_v44 = vadd.f32 %v6649_v1, %v6309_v31  ;;  %v6829_v28 = vadd.f32 %v6649_v1, %v6312_v61  ;;  %v6833_v60 = vadd.f32 %v6649_v1, %v6315_v5 }
 0x6c7   : > { %v6837_v21 = vadd.f32 %v6649_v1, %v6319_v10  ;;  %v6841_v6 = vadd.f32 %v6649_v1, %v6323_v22  ;;  %v6845_v31 = vadd.f32 %v6649_v1, %v6327_v30  ;;  %v6849_v61 = vadd.f32 %v6649_v1, %v6331_v17  ;;  %v8513_v3 = vld [vmem:[#allocation60_spill] sm:$0xff]  ;;  %v8514_v34 = vld [vmem:[#allocation61_spill] sm:$0xff] }
 0x6c8   : > { %v6853_v5 = vadd.f32 %v6649_v1, %v6335_v58  ;;  %v6857_v10 = vadd.f32 %v6649_v1, %v6339_v46  ;;  %v6861_v22 = vadd.f32 %v6649_v1, %v6343_v48  ;;  %v6865_v30 = vadd.f32 %v6649_v1, %v6347_v51  ;;  %v8515_v7 = vld [vmem:[#allocation62_spill] sm:$0xff] }
 0x6c9   : > { %v6869_v17 = vadd.f32 %v6649_v1, %v6351_v45  ;;  %v6873_v58 = vadd.f32 %v6649_v1, %v6355_v57  ;;  %v6877_v46 = vadd.f32 %v6649_v1, %v6359_v27  ;;  %v6881_v48 = vadd.f32 %v6649_v1, %v6363_v54  ;;  %v8517_v0 = vld [vmem:[#allocation64_spill] sm:$0xff]  ;;  %v8518_v35 = vld [vmem:[#allocation65_spill] sm:$0xff] }
 0x6ca   : > { %v6885_v51 = vadd.f32 %v6649_v1, %v6367_v26  ;;  %v6889_v45 = vadd.f32 %v6649_v1, %v6371_v13  ;;  %v6893_v57 = vadd.f32 %v6649_v1, %v6375_v11  ;;  %v6897_v27 = vadd.f32 %v6649_v1, %v6379_v14  ;;  %v8519_v43 = vld [vmem:[#allocation66_spill] sm:$0xff]  ;;  %v8520_v40 = vld [vmem:[#allocation67_spill] sm:$0xff] }
 0x6cb   : > { %v6901_v54 = vadd.f32 %v6649_v1, %v6383_v29  ;;  %v6905_v26 = vadd.f32 %v6649_v1, %v6387_v56  ;;  %v6909_v13 = vadd.f32 %v6649_v1, %v6391_v52  ;;  %v6913_v11 = vadd.f32 %v6649_v1, %v6395_v25  ;;  %v8521_v55 = vld [vmem:[#allocation68_spill] sm:$0xff]  ;;  %v8522_v8 = vld [vmem:[#allocation69_spill] sm:$0xff] }
 0x6cc   : > { %8381 = vst [vmem:[#allocation71_spill] sm:$0xff] %v6889_v45  ;;  %8382 = vst [vmem:[#allocation72_spill] sm:$0xff] %v6893_v57  ;;  %v6917_v14 = vadd.f32 %v6649_v1, %v6399_v4  ;;  %v6921_v29 = vadd.f32 %v6649_v1, %v6403_v63  ;;  %v6925_v56 = vadd.f32 %v6649_v1, %v6407_v20  ;;  %v8523_v47 = vld [vmem:[#allocation70_spill] sm:$0xff]  ;;  %v8585_v45 = vld [vmem:[#allocation51_spill] sm:$0xff] }
 0x6cd   : > { %8383 = vst [vmem:[#allocation73_spill] sm:$0xff] %v6897_v27  ;;  %8384 = vst [vmem:[#allocation74_spill] sm:$0xff] %v6901_v54  ;;  %v6929_v52 = vadd.f32 %v6649_v1, %v6411_v49  ;;  %v6933_v25 = vadd.f32 %v6649_v1, %v6415_v32  ;;  %v6937_v4 = vadd.f32 %v6649_v1, %v6419_v59  ;;  %v8587_v57 = vld [vmem:[#allocation52_spill] sm:$0xff] }
 0x6ce   : > { %8385 = vst [vmem:[#allocation75_spill] sm:$0xff] %v6905_v26  ;;  %8386 = vst [vmem:[#allocation76_spill] sm:$0xff] %v6909_v13  ;;  %v6941_v63 = vadd.f32 %v6649_v1, %v6423_v39  ;;  %v6945_v20 = vadd.f32 %v6649_v1, %v6427_v23  ;;  %v6949_v49 = vadd.f32 %v6649_v1, %v6431_v33  ;;  %v8580_v26 = vmax.f32 %v6669_v2, 0.0  ;;  %v8589_v2 = vld [vmem:[#allocation53_spill] sm:$0xff] }
 0x6cf   : > { %8387 = vst [vmem:[#allocation90_spill] sm:$0xff] %v6913_v11  ;;  %8388 = vst [vmem:[#allocation91_spill] sm:$0xff] %v6917_v14  ;;  %v6953_v32 = vadd.f32 %v6649_v1, %v6435_v24  ;;  %v8601_v14 = vld [vmem:[#allocation88_spill] sm:$0xff] }
 0x6d0   : > { %8389 = vst [vmem:[#allocation92_spill] sm:$0xff] %v6921_v29  ;;  %8390 = vst [vmem:[#allocation93_spill] sm:$0xff] %v6925_v56 }
 0x6d1   : > { %8391 = vst [vmem:[#allocation94_spill] sm:$0xff] %v6929_v52  ;;  %8392 = vst [vmem:[#allocation95_spill] sm:$0xff] %v6933_v25  ;;  %v8398_v25 = vld [vmem:[#allocation77_spill] sm:$0xff] }
 0x6d2   : > { %8393 = vst [vmem:[#allocation96_spill] sm:$0xff] %v6937_v4  ;;  %8394 = vst [vmem:[#allocation97_spill] sm:$0xff] %v6941_v63  ;;  %v6957_v59 = vadd.f32 %v6649_v1, %v8398_v25  ;;  %v8400_v4 = vld [vmem:[#allocation78_spill] sm:$0xff]  ;;  %v8402_v63 = vld [vmem:[#allocation79_spill] sm:$0xff] }
 0x6d3   : > { %8395 = vst [vmem:[#allocation98_spill] sm:$0xff] %v6945_v20  ;;  %8396 = vst [vmem:[#allocation99_spill] sm:$0xff] %v6949_v49  ;;  %v6961_v39 = vadd.f32 %v6649_v1, %v8400_v4  ;;  %v6965_v23 = vadd.f32 %v6649_v1, %v8402_v63  ;;  %v8404_v20 = vld [vmem:[#allocation80_spill] sm:$0xff]  ;;  %v8406_v49 = vld [vmem:[#allocation81_spill] sm:$0xff] }
 0x6d4   : > { %8397 = vst [vmem:[#allocation100_spill] sm:$0xff] %v6953_v32  ;;  %8399 = vst [vmem:[#allocation77_spill] sm:$0xff] %v6957_v59  ;;  %v6969_v33 = vadd.f32 %v6649_v1, %v8404_v20  ;;  %v6973_v24 = vadd.f32 %v6649_v1, %v8406_v49  ;;  %v8408_v32 = vld [vmem:[#allocation82_spill] sm:$0xff]  ;;  %v8410_v59 = vld [vmem:[#allocation8_spill] sm:$0xff] }
 0x6d5   : > { %8401 = vst [vmem:[#allocation78_spill] sm:$0xff] %v6961_v39  ;;  %8403 = vst [vmem:[#allocation79_spill] sm:$0xff] %v6965_v23  ;;  %v6977_v25 = vadd.f32 %v6649_v1, %v8408_v32  ;;  %v6981_v4 = vadd.f32 %v6649_v1, %v8410_v59  ;;  %v8412_v39 = vld [vmem:[#allocation10_spill] sm:$0xff]  ;;  %v8414_v23 = vld [vmem:[#allocation7_spill] sm:$0xff] }
 0x6d6   : > { %8405 = vst [vmem:[#allocation80_spill] sm:$0xff] %v6969_v33  ;;  %8407 = vst [vmem:[#allocation81_spill] sm:$0xff] %v6973_v24  ;;  %v6985_v63 = vadd.f32 %v6649_v1, %v8412_v39  ;;  %v6989_v20 = vadd.f32 %v6649_v1, %v8414_v23  ;;  %v8416_v33 = vld [vmem:[#allocation9_spill] sm:$0xff]  ;;  %v8418_v24 = vld [vmem:[#allocation4_spill] sm:$0xff] }
 0x6d7   : > { %8409 = vst [vmem:[#allocation82_spill] sm:$0xff] %v6977_v25  ;;  %8411 = vst [vmem:[#allocation8_spill] sm:$0xff] %v6981_v4  ;;  %v6993_v49 = vadd.f32 %v6649_v1, %v8416_v33  ;;  %v6997_v32 = vadd.f32 %v6649_v1, %v8418_v24  ;;  %v8420_v25 = vld [vmem:[#allocation5_spill] sm:$0xff]  ;;  %v8422_v4 = vld [vmem:[#allocation6_spill] sm:$0xff] }
 0x6d8   : > { %8413 = vst [vmem:[#allocation10_spill] sm:$0xff] %v6985_v63  ;;  %8415 = vst [vmem:[#allocation7_spill] sm:$0xff] %v6989_v20  ;;  %v7001_v59 = vadd.f32 %v6649_v1, %v8420_v25  ;;  %v7005_v39 = vadd.f32 %v6649_v1, %v8422_v4  ;;  %v8424_v63 = vld [vmem:[#allocation11_spill] sm:$0xff]  ;;  %v8426_v20 = vld [vmem:[#allocation12_spill] sm:$0xff] }
 0x6d9   : > { %8417 = vst [vmem:[#allocation9_spill] sm:$0xff] %v6993_v49  ;;  %8419 = vst [vmem:[#allocation4_spill] sm:$0xff] %v6997_v32  ;;  %v7009_v23 = vadd.f32 %v6649_v1, %v8424_v63  ;;  %v7013_v33 = vadd.f32 %v6649_v1, %v8426_v20  ;;  %v8428_v49 = vld [vmem:[#allocation13_spill] sm:$0xff]  ;;  %v8430_v32 = vld [vmem:[#allocation14_spill] sm:$0xff] }
 0x6da   : > { %8421 = vst [vmem:[#allocation5_spill] sm:$0xff] %v7001_v59  ;;  %8423 = vst [vmem:[#allocation6_spill] sm:$0xff] %v7005_v39  ;;  %v7017_v24 = vadd.f32 %v6649_v1, %v8428_v49  ;;  %v7021_v25 = vadd.f32 %v6649_v1, %v8430_v32  ;;  %v8432_v59 = vld [vmem:[#allocation15_spill] sm:$0xff]  ;;  %v8434_v39 = vld [vmem:[#allocation16_spill] sm:$0xff] }
 0x6db   : > { %8425 = vst [vmem:[#allocation11_spill] sm:$0xff] %v7009_v23  ;;  %8427 = vst [vmem:[#allocation12_spill] sm:$0xff] %v7013_v33  ;;  %v7025_v4 = vadd.f32 %v6649_v1, %v8432_v59  ;;  %v7029_v63 = vadd.f32 %v6649_v1, %v8434_v39  ;;  %v8436_v23 = vld [vmem:[#allocation17_spill] sm:$0xff]  ;;  %v8438_v33 = vld [vmem:[#allocation18_spill] sm:$0xff] }
 0x6dc   : > { %8429 = vst [vmem:[#allocation13_spill] sm:$0xff] %v7017_v24  ;;  %8431 = vst [vmem:[#allocation14_spill] sm:$0xff] %v7021_v25  ;;  %v7033_v20 = vadd.f32 %v6649_v1, %v8436_v23  ;;  %v7037_v49 = vadd.f32 %v6649_v1, %v8438_v33  ;;  %v8440_v24 = vld [vmem:[#allocation19_spill] sm:$0xff]  ;;  %v8442_v25 = vld [vmem:[#allocation20_spill] sm:$0xff] }
 0x6dd   : > { %8433 = vst [vmem:[#allocation15_spill] sm:$0xff] %v7025_v4  ;;  %8435 = vst [vmem:[#allocation16_spill] sm:$0xff] %v7029_v63  ;;  %v7041_v32 = vadd.f32 %v6649_v1, %v8440_v24  ;;  %v7045_v59 = vadd.f32 %v6649_v1, %v8442_v25  ;;  %v8444_v4 = vld [vmem:[#allocation21_spill] sm:$0xff]  ;;  %v8446_v63 = vld [vmem:[#allocation22_spill] sm:$0xff] }
 0x6de   : > { %8437 = vst [vmem:[#allocation17_spill] sm:$0xff] %v7033_v20  ;;  %8439 = vst [vmem:[#allocation18_spill] sm:$0xff] %v7037_v49  ;;  %v7049_v39 = vadd.f32 %v6649_v1, %v8444_v4  ;;  %v7053_v23 = vadd.f32 %v6649_v1, %v8446_v63  ;;  %v8448_v20 = vld [vmem:[#allocation23_spill] sm:$0xff]  ;;  %v8450_v49 = vld [vmem:[#allocation24_spill] sm:$0xff] }
 0x6df   : > { %8441 = vst [vmem:[#allocation19_spill] sm:$0xff] %v7041_v32  ;;  %8443 = vst [vmem:[#allocation20_spill] sm:$0xff] %v7045_v59  ;;  %v7057_v33 = vadd.f32 %v6649_v1, %v8448_v20  ;;  %v7061_v24 = vadd.f32 %v6649_v1, %v8450_v49  ;;  %v8452_v32 = vld [vmem:[#allocation25_spill] sm:$0xff]  ;;  %v8454_v59 = vld [vmem:[#allocation26_spill] sm:$0xff] }
 0x6e0   : > { %8445 = vst [vmem:[#allocation21_spill] sm:$0xff] %v7049_v39  ;;  %8447 = vst [vmem:[#allocation22_spill] sm:$0xff] %v7053_v23  ;;  %v7065_v25 = vadd.f32 %v6649_v1, %v8452_v32  ;;  %v7069_v4 = vadd.f32 %v6649_v1, %v8454_v59  ;;  %v8456_v39 = vld [vmem:[#allocation27_spill] sm:$0xff]  ;;  %v8458_v23 = vld [vmem:[#allocation28_spill] sm:$0xff] }
 0x6e1   : > { %8449 = vst [vmem:[#allocation23_spill] sm:$0xff] %v7057_v33  ;;  %8451 = vst [vmem:[#allocation24_spill] sm:$0xff] %v7061_v24  ;;  %v7073_v63 = vadd.f32 %v6649_v1, %v8456_v39  ;;  %v7077_v20 = vadd.f32 %v6649_v1, %v8458_v23  ;;  %v8460_v33 = vld [vmem:[#allocation29_spill] sm:$0xff]  ;;  %v8462_v24 = vld [vmem:[#allocation30_spill] sm:$0xff] }
 0x6e2   : > { %8453 = vst [vmem:[#allocation25_spill] sm:$0xff] %v7065_v25  ;;  %8455 = vst [vmem:[#allocation26_spill] sm:$0xff] %v7069_v4  ;;  %v7081_v49 = vadd.f32 %v6649_v1, %v8460_v33  ;;  %v7085_v32 = vadd.f32 %v6649_v1, %v8462_v24  ;;  %v8464_v25 = vld [vmem:[#allocation31_spill] sm:$0xff]  ;;  %v8466_v4 = vld [vmem:[#allocation32_spill] sm:$0xff] }
 0x6e3   : > { %8457 = vst [vmem:[#allocation27_spill] sm:$0xff] %v7073_v63  ;;  %8459 = vst [vmem:[#allocation28_spill] sm:$0xff] %v7077_v20  ;;  %v7089_v59 = vadd.f32 %v6649_v1, %v8464_v25  ;;  %v7093_v39 = vadd.f32 %v6649_v1, %v8466_v4  ;;  %v8468_v63 = vld [vmem:[#allocation33_spill] sm:$0xff]  ;;  %v8470_v20 = vld [vmem:[#allocation34_spill] sm:$0xff] }
 0x6e4   : > { %8461 = vst [vmem:[#allocation29_spill] sm:$0xff] %v7081_v49  ;;  %8463 = vst [vmem:[#allocation30_spill] sm:$0xff] %v7085_v32  ;;  %v7097_v23 = vadd.f32 %v6649_v1, %v8468_v63  ;;  %v7101_v33 = vadd.f32 %v6649_v1, %v8470_v20  ;;  %v8472_v49 = vld [vmem:[#allocation35_spill] sm:$0xff]  ;;  %v8474_v32 = vld [vmem:[#allocation36_spill] sm:$0xff] }
 0x6e5   : > { %8465 = vst [vmem:[#allocation31_spill] sm:$0xff] %v7089_v59  ;;  %8467 = vst [vmem:[#allocation32_spill] sm:$0xff] %v7093_v39  ;;  %v7105_v24 = vadd.f32 %v6649_v1, %v8472_v49  ;;  %v7109_v25 = vadd.f32 %v6649_v1, %v8474_v32  ;;  %v8476_v59 = vld [vmem:[#allocation37_spill] sm:$0xff]  ;;  %v8478_v39 = vld [vmem:[#allocation38_spill] sm:$0xff] }
 0x6e6   : > { %8469 = vst [vmem:[#allocation33_spill] sm:$0xff] %v7097_v23  ;;  %8471 = vst [vmem:[#allocation34_spill] sm:$0xff] %v7101_v33  ;;  %v7113_v4 = vadd.f32 %v6649_v1, %v8476_v59  ;;  %v7117_v63 = vadd.f32 %v6649_v1, %v8478_v39  ;;  %v8480_v23 = vld [vmem:[#allocation39_spill] sm:$0xff]  ;;  %v8482_v33 = vld [vmem:[#allocation40_spill] sm:$0xff] }
 0x6e7   : > { %8473 = vst [vmem:[#allocation35_spill] sm:$0xff] %v7105_v24  ;;  %8475 = vst [vmem:[#allocation36_spill] sm:$0xff] %v7109_v25  ;;  %v7121_v20 = vadd.f32 %v6649_v1, %v8480_v23  ;;  %v7125_v49 = vadd.f32 %v6649_v1, %v8482_v33  ;;  %v8484_v24 = vld [vmem:[#allocation41_spill] sm:$0xff]  ;;  %v8486_v25 = vld [vmem:[#allocation42_spill] sm:$0xff]  ;;  %v7141_v23 = vadd.f32 %v6649_v1, %v6623_v36 }
 0x6e8   : > { %8477 = vst [vmem:[#allocation37_spill] sm:$0xff] %v7113_v4  ;;  %8479 = vst [vmem:[#allocation38_spill] sm:$0xff] %v7117_v63  ;;  %v7129_v32 = vadd.f32 %v6649_v1, %v8484_v24  ;;  %v7133_v59 = vadd.f32 %v6649_v1, %v8486_v25  ;;  %v8488_v4 = vld [vmem:[#allocation43_spill] sm:$0xff] }
 0x6e9   : > { %8481 = vst [vmem:[#allocation39_spill] sm:$0xff] %v7121_v20  ;;  %8483 = vst [vmem:[#allocation40_spill] sm:$0xff] %v7125_v49  ;;  %v7137_v39 = vadd.f32 %v6649_v1, %v8488_v4  ;;  %v8491_v20 = vld [vmem:[#allocation44_spill] sm:$0xff]  ;;  %v8493_v49 = vld [vmem:[#allocation45_spill] sm:$0xff] }
 0x6ea   : > { %8485 = vst [vmem:[#allocation41_spill] sm:$0xff] %v7129_v32  ;;  %8487 = vst [vmem:[#allocation42_spill] sm:$0xff] %v7133_v59  ;;  %v7145_v33 = vadd.f32 %v6649_v1, %v8491_v20  ;;  %v7149_v24 = vadd.f32 %v6649_v1, %v8493_v49  ;;  %v8495_v32 = vld [vmem:[#allocation46_spill] sm:$0xff]  ;;  %v8497_v59 = vld [vmem:[#allocation47_spill] sm:$0xff]  ;;  %v7165_v20 = vadd.f32 %v6649_v1, %v6653_v12 }
 0x6eb   : > { %8489 = vst [vmem:[#allocation43_spill] sm:$0xff] %v7137_v39  ;;  %8490 = vst [vmem:[#allocation101_spill] sm:$0xff] %v7141_v23  ;;  %v7153_v25 = vadd.f32 %v6649_v1, %v8495_v32  ;;  %v7157_v4 = vadd.f32 %v6649_v1, %v8497_v59  ;;  %v8499_v39 = vld [vmem:[#allocation48_spill] sm:$0xff]  ;;  %v7169_v49 = vadd.f32 %v6649_v1, %v6657_v38  ;;  %v8586_v38 = vmax.f32 %v8585_v45, 0.0 }
 0x6ec   : > { %8492 = vst [vmem:[#allocation44_spill] sm:$0xff] %v7145_v33  ;;  %8494 = vst [vmem:[#allocation45_spill] sm:$0xff] %v7149_v24  ;;  %v7161_v36 = vadd.f32 %v6649_v1, %v8499_v39  ;;  %v7173_v32 = vadd.f32 %v6649_v1, %v6661_v41  ;;  %v7177_v59 = vadd.f32 %v6649_v1, %v6665_v62  ;;  %v8557_v1 = vld [vmem:[#allocation25_spill] sm:$0xff]  ;;  %v8588_v24 = vmax.f32 %v8587_v57, 0.0 }
 0x6ed   : > { %8496 = vst [vmem:[#allocation46_spill] sm:$0xff] %v7153_v25  ;;  %8498 = vst [vmem:[#allocation47_spill] sm:$0xff] %v7157_v4  ;;  %v8516_v4 = vld [vmem:[#allocation63_spill] sm:$0xff]  ;;  %v8566_v41 = vld [vmem:[#allocation34_spill] sm:$0xff]  ;;  %v4258_v12 = vpack.c.bf16 %v8580_v26, %v8580_v26  ;;  %v4261_v62 = vpack.c.bf16 %v8586_v38, %v8586_v38 }
 0x6ee   : > { %8500 = vst [vmem:[#allocation48_spill] sm:$0xff] %v7161_v36  ;;  %8501 = vst [vmem:[#allocation102_spill] sm:$0xff] %v7165_v20  ;;  %v8560_v36 = vld [vmem:[#allocation28_spill] sm:$0xff]  ;;  %v8581_v20 = vld [vmem:[#allocation49_spill] sm:$0xff]  ;;  %v4262_v39 = vpack.c.bf16 %v8588_v24, %v8588_v24 }
 0x6ef   : > { %8502 = vst [vmem:[#allocation103_spill] sm:$0xff] %v7169_v49  ;;  %8503 = vst [vmem:[#allocation104_spill] sm:$0xff] %v7173_v32  ;;  %v8567_v32 = vld [vmem:[#allocation35_spill] sm:$0xff]  ;;  %v8568_v27 = vld [vmem:[#allocation36_spill] sm:$0xff]  ;;  %v8582_v63 = vmax.f32 %v8581_v20, 0.0 }
 0x6f0   : > { %8504 = vst [vmem:[#allocation105_spill] sm:$0xff] %v7177_v59  ;;  %v8570_v13 = vld [vmem:[#allocation39_spill] sm:$0xff]  ;;  %v8571_v11 = vld [vmem:[#allocation40_spill] sm:$0xff]  ;;  %v8583_v25 = vld [vmem:[#allocation50_spill] sm:$0xff]  ;;  %v8590_v59 = vmax.f32 %v8589_v2, 0.0 }
 0x6f1   : > { %v4259_v54 = vpack.c.bf16 %v8582_v63, %v8582_v63  ;;  %v8584_v49 = vmax.f32 %v8583_v25, 0.0  ;;  %v8591_v20 = vld [vmem:[#allocation83_spill] sm:$0xff]  ;;  %v8593_v25 = vld [vmem:[#allocation84_spill] sm:$0xff]  ;;  %v8595_v38 = vld [vmem:[#allocation85_spill] sm:$0xff]  ;;  %3781 = vst.msk [vmem:[%s7308_s30] sm:$0xf] %vm3780_vm6, %v4258_v12 }
 0x6f2   : > { %v4263_v26 = vpack.c.bf16 %v8590_v59, %v8590_v59  ;;  %v8592_v33 = vmax.f32 %v8591_v20, 0.0  ;;  %v8596_v23 = vmax.f32 %v8595_v38, 0.0  ;;  %v8597_v24 = vld [vmem:[#allocation86_spill] sm:$0xff]  ;;  %v8599_v59 = vld [vmem:[#allocation87_spill] sm:$0xff]  ;;  %3784 = vst.msk [vmem:[%s7308_s30 + $0xc] sm:$0xf] %vm3780_vm6, %v4261_v62 }
 0x6f3   : > { %v4260_v29 = vpack.c.bf16 %v8584_v49, %v8584_v49  ;;  %v8594_v49 = vmax.f32 %v8593_v25, 0.0  ;;  %v8598_v2 = vmax.f32 %v8597_v24, 0.0  ;;  %v8600_v56 = vmax.f32 %v8599_v59, 0.0  ;;  %3782 = vst.msk [vmem:[%s7308_s30 + $0x4] sm:$0xf] %vm3780_vm6, %v4259_v54  ;;  %v8605_v38 = vld [vmem:[#allocation54_spill] sm:$0xff] }
 0x6f4   : > { %v4264_v63 = vpack.c.bf16 %v8592_v33, %v8592_v33  ;;  %v4266_v57 = vpack.c.bf16 %v8596_v23, %v8596_v23  ;;  %v8602_v33 = vmax.f32 %v8601_v14, 0.0  ;;  %v8603_v23 = vld [vmem:[#allocation89_spill] sm:$0xff]  ;;  %v8606_v14 = vmax.f32 %v8605_v38, 0.0  ;;  %v8609_v54 = vld [vmem:[#allocation56_spill] sm:$0xff]  ;;  %3785 = vst.msk [vmem:[%s7308_s30 + $0x10] sm:$0xf] %vm3780_vm6, %v4262_v39 }
 0x6f5   : > { %v4265_v45 = vpack.c.bf16 %v8594_v49, %v8594_v49  ;;  %v4267_v52 = vpack.c.bf16 %v8598_v2, %v8598_v2  ;;  %v4268_v20 = vpack.c.bf16 %v8600_v56, %v8600_v56  ;;  %3783 = vst.msk [vmem:[%s7308_s30 + $0x8] sm:$0xf] %vm3780_vm6, %v4260_v29  ;;  %v8604_v49 = vmax.f32 %v8603_v23, 0.0  ;;  %v8607_v2 = vld [vmem:[#allocation55_spill] sm:$0xff]  ;;  %3786 = vst.msk [vmem:[%s7308_s30 + $0x14] sm:$0xf] %vm3780_vm6, %v4263_v26 }
 0x6f6   : > { %v4269_v25 = vpack.c.bf16 %v8602_v33, %v8602_v33  ;;  %v4271_v24 = vpack.c.bf16 %v8606_v14, %v8606_v14  ;;  %v8608_v12 = vmax.f32 %v8607_v2, 0.0  ;;  %v8610_v33 = vmax.f32 %v8609_v54, 0.0  ;;  %3787 = vst.msk [vmem:[%s7308_s30 + $0x18] sm:$0xf] %vm3780_vm6, %v4264_v63  ;;  %v8611_v62 = vld [vmem:[#allocation57_spill] sm:$0xff]  ;;  %v8613_v38 = vld [vmem:[#allocation58_spill] sm:$0xff] }
 0x6f7   : > { %v4270_v56 = vpack.c.bf16 %v8604_v49, %v8604_v49  ;;  %3788 = vst.msk [vmem:[%s7308_s30 + $0x1c] sm:$0xf] %vm3780_vm6, %v4265_v45  ;;  %v8612_v23 = vmax.f32 %v8611_v62, 0.0  ;;  %v8614_v14 = vmax.f32 %v8613_v38, 0.0  ;;  %v8617_v26 = vmax.f32 %v8513_v3, 0.0 }
 0x6f8   : > { %v4272_v59 = vpack.c.bf16 %v8608_v12, %v8608_v12  ;;  %v4273_v29 = vpack.c.bf16 %v8610_v33, %v8610_v33  ;;  %v8615_v12 = vld [vmem:[#allocation59_spill] sm:$0xff]  ;;  %3789 = vst.msk [vmem:[%s7308_s30 + $0x20] sm:$0xf] %vm3780_vm6, %v4266_v57  ;;  %3790 = vst.msk [vmem:[%s7308_s30 + $0x24] sm:$0xf] %vm3780_vm6, %v4267_v52  ;;  %v8618_v45 = vmax.f32 %v8514_v34, 0.0 }
 0x6f9   : > { %v4274_v49 = vpack.c.bf16 %v8612_v23, %v8612_v23  ;;  %v4275_v2 = vpack.c.bf16 %v8614_v14, %v8614_v14  ;;  %v8616_v39 = vmax.f32 %v8615_v12, 0.0  ;;  %v4277_v63 = vpack.c.bf16 %v8617_v26, %v8617_v26  ;;  %3791 = vst.msk [vmem:[%s7308_s30 + $0x28] sm:$0xf] %vm3780_vm6, %v4268_v20  ;;  %3792 = vst.msk [vmem:[%s7308_s30 + $0x2c] sm:$0xf] %vm3780_vm6, %v4269_v25 }
 0x6fa   : > { %v4278_v33 = vpack.c.bf16 %v8618_v45, %v8618_v45  ;;  %v8619_v3 = vmax.f32 %v8515_v7, 0.0  ;;  %v8620_v57 = vmax.f32 %v8516_v4, 0.0  ;;  %v8621_v52 = vmax.f32 %v8517_v0, 0.0  ;;  %3793 = vst.msk [vmem:[%s7308_s30 + $0x30] sm:$0xf] %vm3780_vm6, %v4270_v56 }
 0x6fb   : > { %v4276_v54 = vpack.c.bf16 %v8616_v39, %v8616_v39  ;;  %3794 = vst.msk [vmem:[%s7308_s30 + $0x34] sm:$0xf] %vm3780_vm6, %v4271_v24  ;;  %3795 = vst.msk [vmem:[%s7308_s30 + $0x38] sm:$0xf] %vm3780_vm6, %v4272_v59  ;;  %v8622_v34 = vmax.f32 %v8518_v35, 0.0  ;;  %v8623_v0 = vmax.f32 %v8519_v43, 0.0 }
 0x6fc   : > { %v4279_v62 = vpack.c.bf16 %v8619_v3, %v8619_v3  ;;  %v4280_v23 = vpack.c.bf16 %v8620_v57, %v8620_v57  ;;  %v4281_v20 = vpack.c.bf16 %v8621_v52, %v8621_v52  ;;  %3796 = vst.msk [vmem:[%s7308_s30 + $0x3c] sm:$0xf] %vm3780_vm6, %v4273_v29  ;;  %v8624_v25 = vmax.f32 %v8520_v40, 0.0  ;;  %3797 = vst.msk [vmem:[%s7308_s30 + $0x40] sm:$0xf] %vm3780_vm6, %v4274_v49 }
 0x6fd   : > { %v4282_v7 = vpack.c.bf16 %v8622_v34, %v8622_v34  ;;  %v4283_v4 = vpack.c.bf16 %v8623_v0, %v8623_v0  ;;  %v8625_v24 = vmax.f32 %v8521_v55, 0.0  ;;  %3798 = vst.msk [vmem:[%s7308_s30 + $0x44] sm:$0xf] %vm3780_vm6, %v4275_v2  ;;  %3799 = vst.msk [vmem:[%s7308_s30 + $0x48] sm:$0xf] %vm3780_vm6, %v4276_v54  ;;  %v8626_v35 = vmax.f32 %v8522_v8, 0.0 }
 0x6fe   : > { %v4284_v56 = vpack.c.bf16 %v8624_v25, %v8624_v25  ;;  %3800 = vst.msk [vmem:[%s7308_s30 + $0x4c] sm:$0xf] %vm3780_vm6, %v4277_v63  ;;  %v8627_v40 = vmax.f32 %v8523_v47, 0.0  ;;  %v8628_v29 = vmax.f32 %v6789_v15, 0.0  ;;  %v8629_v38 = vmax.f32 %v6793_v37, 0.0 }
 0x6ff   : > { %v4285_v59 = vpack.c.bf16 %v8625_v24, %v8625_v24  ;;  %v4286_v43 = vpack.c.bf16 %v8626_v35, %v8626_v35  ;;  %3801 = vst.msk [vmem:[%s7308_s30 + $0x50] sm:$0xf] %vm3780_vm6, %v4278_v33  ;;  %3802 = vst.msk [vmem:[%s7308_s30 + $0x54] sm:$0xf] %vm3780_vm6, %v4279_v62  ;;  %v8630_v8 = vmax.f32 %v6797_v18, 0.0  ;;  %v8631_v15 = vmax.f32 %v6801_v53, 0.0 }
 0x700   : > { %v4287_v55 = vpack.c.bf16 %v8627_v40, %v8627_v40  ;;  %v4288_v49 = vpack.c.bf16 %v8628_v29, %v8628_v29  ;;  %v4289_v14 = vpack.c.bf16 %v8629_v38, %v8629_v38  ;;  %3803 = vst.msk [vmem:[%s7308_s30 + $0x58] sm:$0xf] %vm3780_vm6, %v4280_v23  ;;  %3804 = vst.msk [vmem:[%s7308_s30 + $0x5c] sm:$0xf] %vm3780_vm6, %v4281_v20  ;;  %v8632_v2 = vmax.f32 %v6805_v50, 0.0  ;;  %v8653_v35 = vld [vmem:[#allocation71_spill] sm:$0xff] }
 0x701   : > { %v4290_v47 = vpack.c.bf16 %v8630_v8, %v8630_v8  ;;  %v4291_v37 = vpack.c.bf16 %v8631_v15, %v8631_v15  ;;  %v8633_v39 = vmax.f32 %v6809_v16, 0.0  ;;  %3805 = vst.msk [vmem:[%s7308_s30 + $0x60] sm:$0xf] %vm3780_vm6, %v4282_v7  ;;  %3806 = vst.msk [vmem:[%s7308_s30 + $0x64] sm:$0xf] %vm3780_vm6, %v4283_v4  ;;  %v8634_v18 = vmax.f32 %v6813_v19, 0.0 }
 0x702   : > { %v4292_v12 = vpack.c.bf16 %v8632_v2, %v8632_v2  ;;  %3807 = vst.msk [vmem:[%s7308_s30 + $0x68] sm:$0xf] %vm3780_vm6, %v4284_v56  ;;  %3808 = vst.msk [vmem:[%s7308_s30 + $0x6c] sm:$0xf] %vm3780_vm6, %v4285_v59  ;;  %v8635_v50 = vmax.f32 %v6817_v9, 0.0  ;;  %v8636_v26 = vmax.f32 %v6821_v42, 0.0 }
 0x703   : > { %v4293_v54 = vpack.c.bf16 %v8633_v39, %v8633_v39  ;;  %v4294_v53 = vpack.c.bf16 %v8634_v18, %v8634_v18  ;;  %v8637_v45 = vmax.f32 %v6825_v44, 0.0  ;;  %3809 = vst.msk [vmem:[%s7308_s30 + $0x70] sm:$0xf] %vm3780_vm6, %v4286_v43  ;;  %3810 = vst.msk [vmem:[%s7308_s30 + $0x74] sm:$0xf] %vm3780_vm6, %v4287_v55  ;;  %v8638_v19 = vmax.f32 %v6829_v28, 0.0 }
 0x704   : > { %v4295_v16 = vpack.c.bf16 %v8635_v50, %v8635_v50  ;;  %v4296_v63 = vpack.c.bf16 %v8636_v26, %v8636_v26  ;;  %3811 = vst.msk [vmem:[%s7308_s30 + $0x78] sm:$0xf] %vm3780_vm6, %v4288_v49  ;;  %3812 = vst.msk [vmem:[%s7308_s30 + $0x7c] sm:$0xf] %vm3780_vm6, %v4289_v14  ;;  %v8639_v42 = vmax.f32 %v6833_v60, 0.0  ;;  %v8640_v3 = vmax.f32 %v6837_v21, 0.0 }
 0x705   : > { %v4297_v33 = vpack.c.bf16 %v8637_v45, %v8637_v45  ;;  %v4298_v9 = vpack.c.bf16 %v8638_v19, %v8638_v19  ;;  %v8641_v57 = vmax.f32 %v6841_v6, 0.0  ;;  %3813 = vst.msk [vmem:[%s7308_s30 + $0x80] sm:$0xf] %vm3780_vm6, %v4290_v47  ;;  %3814 = vst.msk [vmem:[%s7308_s30 + $0x84] sm:$0xf] %vm3780_vm6, %v4291_v37  ;;  %v8642_v28 = vmax.f32 %v6845_v31, 0.0 }
 0x706   : > { %v4299_v44 = vpack.c.bf16 %v8639_v42, %v8639_v42  ;;  %v4300_v62 = vpack.c.bf16 %v8640_v3, %v8640_v3  ;;  %3815 = vst.msk [vmem:[%s7308_s30 + $0x88] sm:$0xf] %vm3780_vm6, %v4292_v12  ;;  %3816 = vst.msk [vmem:[%s7308_s30 + $0x8c] sm:$0xf] %vm3780_vm6, %v4293_v54  ;;  %v8643_v21 = vmax.f32 %v6849_v61, 0.0  ;;  %v8644_v52 = vmax.f32 %v6853_v5, 0.0 }
 0x707   : > { %v4301_v23 = vpack.c.bf16 %v8641_v57, %v8641_v57  ;;  %v4302_v60 = vpack.c.bf16 %v8642_v28, %v8642_v28  ;;  %v8645_v34 = vmax.f32 %v6857_v10, 0.0  ;;  %3817 = vst.msk [vmem:[%s7308_s30 + $0x90] sm:$0xf] %vm3780_vm6, %v4294_v53  ;;  %3818 = vst.msk [vmem:[%s7308_s30 + $0x94] sm:$0xf] %vm3780_vm6, %v4295_v16  ;;  %v8646_v31 = vmax.f32 %v6861_v22, 0.0 }
 0x708   : > { %v4303_v6 = vpack.c.bf16 %v8643_v21, %v8643_v21  ;;  %v4304_v20 = vpack.c.bf16 %v8644_v52, %v8644_v52  ;;  %3819 = vst.msk [vmem:[%s7308_s30 + $0x98] sm:$0xf] %vm3780_vm6, %v4296_v63  ;;  %3820 = vst.msk [vmem:[%s7308_s30 + $0x9c] sm:$0xf] %vm3780_vm6, %v4297_v33  ;;  %v8647_v5 = vmax.f32 %v6865_v30, 0.0  ;;  %v8648_v0 = vmax.f32 %v6869_v17, 0.0 }
 0x709   : > { %v4305_v7 = vpack.c.bf16 %v8645_v34, %v8645_v34  ;;  %v4306_v61 = vpack.c.bf16 %v8646_v31, %v8646_v31  ;;  %v8649_v25 = vmax.f32 %v6873_v58, 0.0  ;;  %3821 = vst.msk [vmem:[%s7308_s30 + $0xa0] sm:$0xf] %vm3780_vm6, %v4298_v9  ;;  %3822 = vst.msk [vmem:[%s7308_s30 + $0xa4] sm:$0xf] %vm3780_vm6, %v4299_v44  ;;  %v8650_v22 = vmax.f32 %v6877_v46, 0.0 }
 0x70a   : > { %v4307_v10 = vpack.c.bf16 %v8647_v5, %v8647_v5  ;;  %v4308_v4 = vpack.c.bf16 %v8648_v0, %v8648_v0  ;;  %3823 = vst.msk [vmem:[%s7308_s30 + $0xa8] sm:$0xf] %vm3780_vm6, %v4300_v62  ;;  %3824 = vst.msk [vmem:[%s7308_s30 + $0xac] sm:$0xf] %vm3780_vm6, %v4301_v23  ;;  %v8651_v17 = vmax.f32 %v6881_v48, 0.0  ;;  %v8652_v24 = vmax.f32 %v6885_v51, 0.0 }
 0x70b   : > { %v4309_v56 = vpack.c.bf16 %v8649_v25, %v8649_v25  ;;  %v4310_v30 = vpack.c.bf16 %v8650_v22, %v8650_v22  ;;  %v8654_v43 = vmax.f32 %v8653_v35, 0.0  ;;  %3825 = vst.msk [vmem:[%s7308_s30 + $0xb0] sm:$0xf] %vm3780_vm6, %v4302_v60  ;;  %3826 = vst.msk [vmem:[%s7308_s30 + $0xb4] sm:$0xf] %vm3780_vm6, %v4303_v6  ;;  %v8655_v46 = vld [vmem:[#allocation72_spill] sm:$0xff] }
 0x70c   : > { %v4311_v58 = vpack.c.bf16 %v8651_v17, %v8651_v17  ;;  %v4312_v59 = vpack.c.bf16 %v8652_v24, %v8652_v24  ;;  %3827 = vst.msk [vmem:[%s7308_s30 + $0xb8] sm:$0xf] %vm3780_vm6, %v4304_v20  ;;  %3828 = vst.msk [vmem:[%s7308_s30 + $0xbc] sm:$0xf] %vm3780_vm6, %v4305_v7  ;;  %v8656_v48 = vmax.f32 %v8655_v46, 0.0  ;;  %v8657_v55 = vld [vmem:[#allocation73_spill] sm:$0xff] }
 0x70d   : > { %v4313_v40 = vpack.c.bf16 %v8654_v43, %v8654_v43  ;;  %v8658_v29 = vmax.f32 %v8657_v55, 0.0  ;;  %v8659_v38 = vld [vmem:[#allocation74_spill] sm:$0xff]  ;;  %v8661_v47 = vld [vmem:[#allocation75_spill] sm:$0xff]  ;;  %3829 = vst.msk [vmem:[%s7308_s30 + $0xc0] sm:$0xf] %vm3780_vm6, %v4306_v61  ;;  %v8663_v2 = vld [vmem:[#allocation76_spill] sm:$0xff] }
 0x70e   : > { %v4314_v51 = vpack.c.bf16 %v8656_v48, %v8656_v48  ;;  %v8660_v14 = vmax.f32 %v8659_v38, 0.0  ;;  %v8662_v15 = vmax.f32 %v8661_v47, 0.0  ;;  %3830 = vst.msk [vmem:[%s7308_s30 + $0xc4] sm:$0xf] %vm3780_vm6, %v4307_v10  ;;  %3831 = vst.msk [vmem:[%s7308_s30 + $0xc8] sm:$0xf] %vm3780_vm6, %v4308_v4 }
 0x70f   : > { %v4315_v49 = vpack.c.bf16 %v8658_v29, %v8658_v29  ;;  %3832 = vst.msk [vmem:[%s7308_s30 + $0xcc] sm:$0xf] %vm3780_vm6, %v4309_v56  ;;  %v8664_v12 = vmax.f32 %v8663_v2, 0.0  ;;  %v8665_v54 = vld [vmem:[#allocation90_spill] sm:$0xff]  ;;  %v8667_v50 = vld [vmem:[#allocation91_spill] sm:$0xff]  ;;  %v8669_v63 = vld [vmem:[#allocation92_spill] sm:$0xff] }
 0x710   : > { %v4316_v8 = vpack.c.bf16 %v8660_v14, %v8660_v14  ;;  %v4317_v37 = vpack.c.bf16 %v8662_v15, %v8662_v15  ;;  %v8666_v18 = vmax.f32 %v8665_v54, 0.0  ;;  %v8668_v16 = vmax.f32 %v8667_v50, 0.0  ;;  %3833 = vst.msk [vmem:[%s7308_s30 + $0xd0] sm:$0xf] %vm3780_vm6, %v4310_v30  ;;  %3834 = vst.msk [vmem:[%s7308_s30 + $0xd4] sm:$0xf] %vm3780_vm6, %v4311_v58 }
 0x711   : > { %v4318_v39 = vpack.c.bf16 %v8664_v12, %v8664_v12  ;;  %v8670_v45 = vmax.f32 %v8669_v63, 0.0  ;;  %3835 = vst.msk [vmem:[%s7308_s30 + $0xd8] sm:$0xf] %vm3780_vm6, %v4312_v59  ;;  %3836 = vst.msk [vmem:[%s7308_s30 + $0xdc] sm:$0xf] %vm3780_vm6, %v4313_v40  ;;  %v8671_v19 = vld [vmem:[#allocation93_spill] sm:$0xff] }
 0x712   : > { %v4319_v53 = vpack.c.bf16 %v8666_v18, %v8666_v18  ;;  %v4320_v26 = vpack.c.bf16 %v8668_v16, %v8668_v16  ;;  %v8672_v9 = vmax.f32 %v8671_v19, 0.0  ;;  %v8673_v44 = vld [vmem:[#allocation94_spill] sm:$0xff]  ;;  %v8675_v57 = vld [vmem:[#allocation95_spill] sm:$0xff]  ;;  %v8677_v60 = vld [vmem:[#allocation96_spill] sm:$0xff]  ;;  %3837 = vst.msk [vmem:[%s7308_s30 + $0xe0] sm:$0xf] %vm3780_vm6, %v4314_v51 }
 0x713   : > { %v4321_v33 = vpack.c.bf16 %v8670_v45, %v8670_v45  ;;  %v8674_v3 = vmax.f32 %v8673_v44, 0.0  ;;  %v8676_v23 = vmax.f32 %v8675_v57, 0.0  ;;  %v8678_v21 = vmax.f32 %v8677_v60, 0.0  ;;  %3838 = vst.msk [vmem:[%s7308_s30 + $0xe4] sm:$0xf] %vm3780_vm6, %v4315_v49  ;;  %v8679_v52 = vld [vmem:[#allocation97_spill] sm:$0xff] }
 0x714   : > { %v4322_v42 = vpack.c.bf16 %v8672_v9, %v8672_v9  ;;  %3839 = vst.msk [vmem:[%s7308_s30 + $0xe8] sm:$0xf] %vm3780_vm6, %v4316_v8  ;;  %3840 = vst.msk [vmem:[%s7308_s30 + $0xec] sm:$0xf] %vm3780_vm6, %v4317_v37  ;;  %v8680_v20 = vmax.f32 %v8679_v52, 0.0  ;;  %v8681_v7 = vld [vmem:[#allocation98_spill] sm:$0xff] }
 0x715   : > { %v4323_v62 = vpack.c.bf16 %v8674_v3, %v8674_v3  ;;  %v4324_v28 = vpack.c.bf16 %v8676_v23, %v8676_v23  ;;  %v4325_v6 = vpack.c.bf16 %v8678_v21, %v8678_v21  ;;  %v8682_v31 = vmax.f32 %v8681_v7, 0.0  ;;  %v8683_v5 = vld [vmem:[#allocation99_spill] sm:$0xff]  ;;  %v8685_v4 = vld [vmem:[#allocation100_spill] sm:$0xff]  ;;  %3841 = vst.msk [vmem:[%s7308_s30 + $0xf0] sm:$0xf] %vm3780_vm6, %v4318_v39  ;;  %v8687_v22 = vld [vmem:[#allocation77_spill] sm:$0xff] }
 0x716   : > { %v4326_v34 = vpack.c.bf16 %v8680_v20, %v8680_v20  ;;  %v8684_v10 = vmax.f32 %v8683_v5, 0.0  ;;  %v8686_v25 = vmax.f32 %v8685_v4, 0.0  ;;  %3842 = vst.msk [vmem:[%s7308_s30 + $0xf4] sm:$0xf] %vm3780_vm6, %v4319_v53  ;;  %3843 = vst.msk [vmem:[%s7308_s30 + $0xf8] sm:$0xf] %vm3780_vm6, %v4320_v26 }
 0x717   : > { %v4327_v61 = vpack.c.bf16 %v8682_v31, %v8682_v31  ;;  %3844 = vst.msk [vmem:[%s7308_s30 + $0xfc] sm:$0xf] %vm3780_vm6, %v4321_v33  ;;  %v8688_v30 = vmax.f32 %v8687_v22, 0.0  ;;  %v8689_v58 = vld [vmem:[#allocation78_spill] sm:$0xff]  ;;  %v8691_v35 = vld [vmem:[#allocation79_spill] sm:$0xff]  ;;  %v8693_v46 = vld [vmem:[#allocation80_spill] sm:$0xff] }
 0x718   : > { %v4328_v0 = vpack.c.bf16 %v8684_v10, %v8684_v10  ;;  %v4329_v56 = vpack.c.bf16 %v8686_v25, %v8686_v25  ;;  %v8690_v24 = vmax.f32 %v8689_v58, 0.0  ;;  %v8692_v43 = vmax.f32 %v8691_v35, 0.0  ;;  %3845 = vst.msk [vmem:[%s7308_s30 + $0x100] sm:$0xf] %vm3780_vm6, %v4322_v42  ;;  %3846 = vst.msk [vmem:[%s7308_s30 + $0x104] sm:$0xf] %vm3780_vm6, %v4323_v62 }
 0x719   : > { %v4330_v17 = vpack.c.bf16 %v8688_v30, %v8688_v30  ;;  %v8694_v48 = vmax.f32 %v8693_v46, 0.0  ;;  %3847 = vst.msk [vmem:[%s7308_s30 + $0x108] sm:$0xf] %vm3780_vm6, %v4324_v28  ;;  %3848 = vst.msk [vmem:[%s7308_s30 + $0x10c] sm:$0xf] %vm3780_vm6, %v4325_v6  ;;  %v8695_v55 = vld [vmem:[#allocation81_spill] sm:$0xff] }
 0x71a   : > { %v4331_v59 = vpack.c.bf16 %v8690_v24, %v8690_v24  ;;  %v4332_v40 = vpack.c.bf16 %v8692_v43, %v8692_v43  ;;  %v8696_v29 = vmax.f32 %v8695_v55, 0.0  ;;  %v8697_v38 = vld [vmem:[#allocation82_spill] sm:$0xff]  ;;  %v8699_v47 = vld [vmem:[#allocation8_spill] sm:$0xff]  ;;  %3849 = vst.msk [vmem:[%s7308_s30 + $0x110] sm:$0xf] %vm3780_vm6, %v4326_v34  ;;  %v8703_v54 = vld [vmem:[#allocation7_spill] sm:$0xff] }
 0x71b   : > { %v4333_v51 = vpack.c.bf16 %v8694_v48, %v8694_v48  ;;  %v8698_v14 = vmax.f32 %v8697_v38, 0.0  ;;  %v8700_v15 = vmax.f32 %v8699_v47, 0.0  ;;  %v8701_v2 = vld [vmem:[#allocation10_spill] sm:$0xff]  ;;  %3850 = vst.msk [vmem:[%s7308_s30 + $0x114] sm:$0xf] %vm3780_vm6, %v4327_v61  ;;  %v8704_v18 = vmax.f32 %v8703_v54, 0.0 }
 0x71c   : > { %v4334_v49 = vpack.c.bf16 %v8696_v29, %v8696_v29  ;;  %v8702_v12 = vmax.f32 %v8701_v2, 0.0  ;;  %3851 = vst.msk [vmem:[%s7308_s30 + $0x118] sm:$0xf] %vm3780_vm6, %v4328_v0  ;;  %3852 = vst.msk [vmem:[%s7308_s30 + $0x11c] sm:$0xf] %vm3780_vm6, %v4329_v56  ;;  %v8705_v50 = vld [vmem:[#allocation9_spill] sm:$0xff] }
 0x71d   : > { %v4335_v8 = vpack.c.bf16 %v8698_v14, %v8698_v14  ;;  %v4336_v37 = vpack.c.bf16 %v8700_v15, %v8700_v15  ;;  %v4338_v53 = vpack.c.bf16 %v8704_v18, %v8704_v18  ;;  %v8706_v16 = vmax.f32 %v8705_v50, 0.0  ;;  %v8707_v63 = vld [vmem:[#allocation4_spill] sm:$0xff]  ;;  %v8709_v19 = vld [vmem:[#allocation5_spill] sm:$0xff]  ;;  %3853 = vst.msk [vmem:[%s7308_s30 + $0x120] sm:$0xf] %vm3780_vm6, %v4330_v17  ;;  %v8711_v44 = vld [vmem:[#allocation6_spill] sm:$0xff] }
 0x71e   : > { %v4337_v39 = vpack.c.bf16 %v8702_v12, %v8702_v12  ;;  %v8708_v45 = vmax.f32 %v8707_v63, 0.0  ;;  %v8710_v9 = vmax.f32 %v8709_v19, 0.0  ;;  %3854 = vst.msk [vmem:[%s7308_s30 + $0x124] sm:$0xf] %vm3780_vm6, %v4331_v59  ;;  %3855 = vst.msk [vmem:[%s7308_s30 + $0x128] sm:$0xf] %vm3780_vm6, %v4332_v40 }
 0x71f   : > { %v4339_v26 = vpack.c.bf16 %v8706_v16, %v8706_v16  ;;  %3856 = vst.msk [vmem:[%s7308_s30 + $0x12c] sm:$0xf] %vm3780_vm6, %v4333_v51  ;;  %v8712_v3 = vmax.f32 %v8711_v44, 0.0  ;;  %v8713_v57 = vld [vmem:[#allocation11_spill] sm:$0xff]  ;;  %v8715_v60 = vld [vmem:[#allocation12_spill] sm:$0xff]  ;;  %v8717_v52 = vld [vmem:[#allocation13_spill] sm:$0xff] }
 0x720   : > { %v4340_v33 = vpack.c.bf16 %v8708_v45, %v8708_v45  ;;  %v4341_v42 = vpack.c.bf16 %v8710_v9, %v8710_v9  ;;  %v8714_v23 = vmax.f32 %v8713_v57, 0.0  ;;  %v8716_v21 = vmax.f32 %v8715_v60, 0.0  ;;  %3857 = vst.msk [vmem:[%s7308_s30 + $0x130] sm:$0xf] %vm3780_vm6, %v4334_v49  ;;  %3858 = vst.msk [vmem:[%s7308_s30 + $0x134] sm:$0xf] %vm3780_vm6, %v4335_v8 }
 0x721   : > { %v4342_v62 = vpack.c.bf16 %v8712_v3, %v8712_v3  ;;  %v8718_v20 = vmax.f32 %v8717_v52, 0.0  ;;  %3859 = vst.msk [vmem:[%s7308_s30 + $0x138] sm:$0xf] %vm3780_vm6, %v4336_v37  ;;  %3860 = vst.msk [vmem:[%s7308_s30 + $0x13c] sm:$0xf] %vm3780_vm6, %v4337_v39  ;;  %v8719_v7 = vld [vmem:[#allocation14_spill] sm:$0xff] }
 0x722   : > { %v4343_v28 = vpack.c.bf16 %v8714_v23, %v8714_v23  ;;  %v4344_v6 = vpack.c.bf16 %v8716_v21, %v8716_v21  ;;  %v8720_v31 = vmax.f32 %v8719_v7, 0.0  ;;  %v8721_v5 = vld [vmem:[#allocation15_spill] sm:$0xff]  ;;  %v8723_v4 = vld [vmem:[#allocation16_spill] sm:$0xff]  ;;  %v8725_v22 = vld [vmem:[#allocation17_spill] sm:$0xff]  ;;  %3861 = vst.msk [vmem:[%s7308_s30 + $0x140] sm:$0xf] %vm3780_vm6, %v4338_v53 }
 0x723   : > { %v4345_v34 = vpack.c.bf16 %v8718_v20, %v8718_v20  ;;  %v8722_v10 = vmax.f32 %v8721_v5, 0.0  ;;  %v8724_v25 = vmax.f32 %v8723_v4, 0.0  ;;  %v8726_v30 = vmax.f32 %v8725_v22, 0.0  ;;  %3862 = vst.msk [vmem:[%s7308_s30 + $0x144] sm:$0xf] %vm3780_vm6, %v4339_v26  ;;  %v8727_v58 = vld [vmem:[#allocation18_spill] sm:$0xff] }
 0x724   : > { %v4346_v61 = vpack.c.bf16 %v8720_v31, %v8720_v31  ;;  %3863 = vst.msk [vmem:[%s7308_s30 + $0x148] sm:$0xf] %vm3780_vm6, %v4340_v33  ;;  %3864 = vst.msk [vmem:[%s7308_s30 + $0x14c] sm:$0xf] %vm3780_vm6, %v4341_v42  ;;  %v8728_v24 = vmax.f32 %v8727_v58, 0.0  ;;  %v8729_v35 = vld [vmem:[#allocation19_spill] sm:$0xff] }
 0x725   : > { %v4347_v0 = vpack.c.bf16 %v8722_v10, %v8722_v10  ;;  %v4348_v56 = vpack.c.bf16 %v8724_v25, %v8724_v25  ;;  %v4349_v17 = vpack.c.bf16 %v8726_v30, %v8726_v30  ;;  %v8730_v43 = vmax.f32 %v8729_v35, 0.0  ;;  %v8731_v46 = vld [vmem:[#allocation20_spill] sm:$0xff]  ;;  %v8733_v55 = vld [vmem:[#allocation21_spill] sm:$0xff]  ;;  %3865 = vst.msk [vmem:[%s7308_s30 + $0x150] sm:$0xf] %vm3780_vm6, %v4342_v62  ;;  %v8735_v38 = vld [vmem:[#allocation22_spill] sm:$0xff] }
 0x726   : > { %v4350_v59 = vpack.c.bf16 %v8728_v24, %v8728_v24  ;;  %v8732_v48 = vmax.f32 %v8731_v46, 0.0  ;;  %v8734_v29 = vmax.f32 %v8733_v55, 0.0  ;;  %3866 = vst.msk [vmem:[%s7308_s30 + $0x154] sm:$0xf] %vm3780_vm6, %v4343_v28  ;;  %3867 = vst.msk [vmem:[%s7308_s30 + $0x158] sm:$0xf] %vm3780_vm6, %v4344_v6 }
 0x727   : > { %v4351_v40 = vpack.c.bf16 %v8730_v43, %v8730_v43  ;;  %3868 = vst.msk [vmem:[%s7308_s30 + $0x15c] sm:$0xf] %vm3780_vm6, %v4345_v34  ;;  %v8736_v14 = vmax.f32 %v8735_v38, 0.0  ;;  %v8737_v47 = vld [vmem:[#allocation23_spill] sm:$0xff]  ;;  %v8739_v2 = vld [vmem:[#allocation24_spill] sm:$0xff]  ;;  %v8741_v54 = vmax.f32 %v8557_v1, 0.0 }
 0x728   : > { %v4352_v51 = vpack.c.bf16 %v8732_v48, %v8732_v48  ;;  %v4353_v49 = vpack.c.bf16 %v8734_v29, %v8734_v29  ;;  %v8738_v15 = vmax.f32 %v8737_v47, 0.0  ;;  %v8740_v12 = vmax.f32 %v8739_v2, 0.0  ;;  %3869 = vst.msk [vmem:[%s7308_s30 + $0x160] sm:$0xf] %vm3780_vm6, %v4346_v61  ;;  %3870 = vst.msk [vmem:[%s7308_s30 + $0x164] sm:$0xf] %vm3780_vm6, %v4347_v0 }
 0x729   : > { %v4354_v8 = vpack.c.bf16 %v8736_v14, %v8736_v14  ;;  %v4357_v18 = vpack.c.bf16 %v8741_v54, %v8741_v54  ;;  %3871 = vst.msk [vmem:[%s7308_s30 + $0x168] sm:$0xf] %vm3780_vm6, %v4348_v56  ;;  %3872 = vst.msk [vmem:[%s7308_s30 + $0x16c] sm:$0xf] %vm3780_vm6, %v4349_v17  ;;  %v8742_v53 = vld [vmem:[#allocation26_spill] sm:$0xff]  ;;  %v8744_v26 = vld [vmem:[#allocation27_spill] sm:$0xff] }
 0x72a   : > { %v4355_v37 = vpack.c.bf16 %v8738_v15, %v8738_v15  ;;  %v4356_v39 = vpack.c.bf16 %v8740_v12, %v8740_v12  ;;  %v8743_v50 = vmax.f32 %v8742_v53, 0.0  ;;  %v8745_v1 = vmax.f32 %v8744_v26, 0.0  ;;  %v8747_v19 = vld [vmem:[#allocation29_spill] sm:$0xff]  ;;  %3873 = vst.msk [vmem:[%s7308_s30 + $0x170] sm:$0xf] %vm3780_vm6, %v4350_v59  ;;  %v8749_v44 = vld [vmem:[#allocation30_spill] sm:$0xff] }
 0x72b   : > { %v8746_v45 = vmax.f32 %v8560_v36, 0.0  ;;  %v8748_v9 = vmax.f32 %v8747_v19, 0.0  ;;  %3874 = vst.msk [vmem:[%s7308_s30 + $0x174] sm:$0xf] %vm3780_vm6, %v4351_v40  ;;  %3875 = vst.msk [vmem:[%s7308_s30 + $0x178] sm:$0xf] %vm3780_vm6, %v4352_v51 }
 0x72c   : > { %v4358_v16 = vpack.c.bf16 %v8743_v50, %v8743_v50  ;;  %v4359_v63 = vpack.c.bf16 %v8745_v1, %v8745_v1  ;;  %3876 = vst.msk [vmem:[%s7308_s30 + $0x17c] sm:$0xf] %vm3780_vm6, %v4353_v49  ;;  %v8750_v3 = vmax.f32 %v8749_v44, 0.0  ;;  %v8751_v62 = vld [vmem:[#allocation31_spill] sm:$0xff]  ;;  %v8753_v28 = vld [vmem:[#allocation32_spill] sm:$0xff]  ;;  %v8755_v6 = vld [vmem:[#allocation33_spill] sm:$0xff] }
 0x72d   : > { %v4360_v33 = vpack.c.bf16 %v8746_v45, %v8746_v45  ;;  %v4361_v42 = vpack.c.bf16 %v8748_v9, %v8748_v9  ;;  %v8752_v57 = vmax.f32 %v8751_v62, 0.0  ;;  %v8754_v60 = vmax.f32 %v8753_v28, 0.0  ;;  %3877 = vst.msk [vmem:[%s7308_s30 + $0x180] sm:$0xf] %vm3780_vm6, %v4354_v8  ;;  %3878 = vst.msk [vmem:[%s7308_s30 + $0x184] sm:$0xf] %vm3780_vm6, %v4355_v37 }
 0x72e   : > { %v4362_v36 = vpack.c.bf16 %v8750_v3, %v8750_v3  ;;  %v8756_v52 = vmax.f32 %v8755_v6, 0.0  ;;  %3879 = vst.msk [vmem:[%s7308_s30 + $0x188] sm:$0xf] %vm3780_vm6, %v4356_v39  ;;  %3880 = vst.msk [vmem:[%s7308_s30 + $0x18c] sm:$0xf] %vm3780_vm6, %v4357_v18  ;;  %v8757_v34 = vmax.f32 %v8566_v41, 0.0 }
 0x72f   : > { %v4363_v23 = vpack.c.bf16 %v8752_v57, %v8752_v57  ;;  %v4364_v21 = vpack.c.bf16 %v8754_v60, %v8754_v60  ;;  %v8758_v31 = vmax.f32 %v8567_v32, 0.0  ;;  %v8759_v5 = vmax.f32 %v8568_v27, 0.0  ;;  %v8760_v0 = vld [vmem:[#allocation37_spill] sm:$0xff]  ;;  %3881 = vst.msk [vmem:[%s7308_s30 + $0x190] sm:$0xf] %vm3780_vm6, %v4358_v16  ;;  %v8762_v32 = vld [vmem:[#allocation38_spill] sm:$0xff] }
 0x730   : > { %v4365_v20 = vpack.c.bf16 %v8756_v52, %v8756_v52  ;;  %v4366_v7 = vpack.c.bf16 %v8757_v34, %v8757_v34  ;;  %v8761_v4 = vmax.f32 %v8760_v0, 0.0  ;;  %3882 = vst.msk [vmem:[%s7308_s30 + $0x194] sm:$0xf] %vm3780_vm6, %v4359_v63  ;;  %3883 = vst.msk [vmem:[%s7308_s30 + $0x198] sm:$0xf] %vm3780_vm6, %v4360_v33  ;;  %v8763_v41 = vmax.f32 %v8762_v32, 0.0 }
 0x731   : > { %v4367_v61 = vpack.c.bf16 %v8758_v31, %v8758_v31  ;;  %v4368_v10 = vpack.c.bf16 %v8759_v5, %v8759_v5  ;;  %3884 = vst.msk [vmem:[%s7308_s30 + $0x19c] sm:$0xf] %vm3780_vm6, %v4361_v42  ;;  %v8764_v56 = vmax.f32 %v8570_v13, 0.0  ;;  %v8765_v30 = vmax.f32 %v8571_v11, 0.0  ;;  %v8766_v58 = vld [vmem:[#allocation41_spill] sm:$0xff]  ;;  %v8768_v13 = vld [vmem:[#allocation42_spill] sm:$0xff] }
 0x732   : > { %v4369_v25 = vpack.c.bf16 %v8761_v4, %v8761_v4  ;;  %v4370_v27 = vpack.c.bf16 %v8763_v41, %v8763_v41  ;;  %v8767_v24 = vmax.f32 %v8766_v58, 0.0  ;;  %3885 = vst.msk [vmem:[%s7308_s30 + $0x1a0] sm:$0xf] %vm3780_vm6, %v4362_v36  ;;  %3886 = vst.msk [vmem:[%s7308_s30 + $0x1a4] sm:$0xf] %vm3780_vm6, %v4363_v23  ;;  %v8769_v35 = vmax.f32 %v8768_v13, 0.0 }
 0x733   : > { %v4371_v22 = vpack.c.bf16 %v8764_v56, %v8764_v56  ;;  %v4372_v17 = vpack.c.bf16 %v8765_v30, %v8765_v30  ;;  %3887 = vst.msk [vmem:[%s7308_s30 + $0x1a8] sm:$0xf] %vm3780_vm6, %v4364_v21  ;;  %3888 = vst.msk [vmem:[%s7308_s30 + $0x1ac] sm:$0xf] %vm3780_vm6, %v4365_v20  ;;  %v8770_v43 = vld [vmem:[#allocation43_spill] sm:$0xff]  ;;  %v8772_v48 = vld [vmem:[#allocation101_spill] sm:$0xff] }
 0x734   : > { %v4373_v59 = vpack.c.bf16 %v8767_v24, %v8767_v24  ;;  %v4374_v11 = vpack.c.bf16 %v8769_v35, %v8769_v35  ;;  %v8771_v40 = vmax.f32 %v8770_v43, 0.0  ;;  %v8773_v51 = vmax.f32 %v8772_v48, 0.0  ;;  %v8774_v29 = vld [vmem:[#allocation44_spill] sm:$0xff]  ;;  %3889 = vst.msk [vmem:[%s7308_s30 + $0x1b0] sm:$0xf] %vm3780_vm6, %v4366_v7  ;;  %v8776_v14 = vld [vmem:[#allocation45_spill] sm:$0xff] }
 0x735   : > { %v8775_v49 = vmax.f32 %v8774_v29, 0.0  ;;  %3890 = vst.msk [vmem:[%s7308_s30 + $0x1b4] sm:$0xf] %vm3780_vm6, %v4367_v61  ;;  %3891 = vst.msk [vmem:[%s7308_s30 + $0x1b8] sm:$0xf] %vm3780_vm6, %v4368_v10  ;;  %v8777_v8 = vmax.f32 %v8776_v14, 0.0 }
 0x736   : > { %v4375_v46 = vpack.c.bf16 %v8771_v40, %v8771_v40  ;;  %v4376_v55 = vpack.c.bf16 %v8773_v51, %v8773_v51  ;;  %3892 = vst.msk [vmem:[%s7308_s30 + $0x1bc] sm:$0xf] %vm3780_vm6, %v4369_v25  ;;  %v8778_v15 = vld [vmem:[#allocation46_spill] sm:$0xff]  ;;  %v8780_v12 = vld [vmem:[#allocation47_spill] sm:$0xff]  ;;  %v8782_v18 = vld [vmem:[#allocation48_spill] sm:$0xff] }
 0x737   : > { %v4377_v38 = vpack.c.bf16 %v8775_v49, %v8775_v49  ;;  %v4378_v47 = vpack.c.bf16 %v8777_v8, %v8777_v8  ;;  %v8779_v37 = vmax.f32 %v8778_v15, 0.0  ;;  %v8781_v39 = vmax.f32 %v8780_v12, 0.0  ;;  %3893 = vst.msk [vmem:[%s7308_s30 + $0x1c0] sm:$0xf] %vm3780_vm6, %v4370_v27  ;;  %3894 = vst.msk [vmem:[%s7308_s30 + $0x1c4] sm:$0xf] %vm3780_vm6, %v4371_v22 }
 0x738   : > { %v8783_v53 = vmax.f32 %v8782_v18, 0.0  ;;  %3895 = vst.msk [vmem:[%s7308_s30 + $0x1c8] sm:$0xf] %vm3780_vm6, %v4372_v17  ;;  %3896 = vst.msk [vmem:[%s7308_s30 + $0x1cc] sm:$0xf] %vm3780_vm6, %v4373_v59  ;;  %v8784_v16 = vld [vmem:[#allocation102_spill] sm:$0xff] }
 0x739   : > { %v4379_v2 = vpack.c.bf16 %v8779_v37, %v8779_v37  ;;  %v4380_v54 = vpack.c.bf16 %v8781_v39, %v8781_v39  ;;  %v8785_v26 = vmax.f32 %v8784_v16, 0.0  ;;  %v8786_v63 = vld [vmem:[#allocation103_spill] sm:$0xff]  ;;  %v8788_v19 = vld [vmem:[#allocation104_spill] sm:$0xff]  ;;  %v8790_v44 = vld [vmem:[#allocation105_spill] sm:$0xff]  ;;  %3897 = vst.msk [vmem:[%s7308_s30 + $0x1d0] sm:$0xf] %vm3780_vm6, %v4374_v11 }
 0x73a   : > { %v4381_v50 = vpack.c.bf16 %v8783_v53, %v8783_v53  ;;  %v8787_v45 = vmax.f32 %v8786_v63, 0.0  ;;  %v8789_v9 = vmax.f32 %v8788_v19, 0.0  ;;  %v8791_v3 = vmax.f32 %v8790_v44, 0.0  ;;  %3898 = vst.msk [vmem:[%s7308_s30 + $0x1d4] sm:$0xf] %vm3780_vm6, %v4375_v46 }
 0x73b   : > { %v4382_v1 = vpack.c.bf16 %v8785_v26, %v8785_v26  ;;  %3899 = vst.msk [vmem:[%s7308_s30 + $0x1d8] sm:$0xf] %vm3780_vm6, %v4376_v55  ;;  %3900 = vst.msk [vmem:[%s7308_s30 + $0x1dc] sm:$0xf] %vm3780_vm6, %v4377_v38 }
 0x73c   : > { %v4383_v33 = vpack.c.bf16 %v8787_v45, %v8787_v45  ;;  %v4384_v42 = vpack.c.bf16 %v8789_v9, %v8789_v9  ;;  %v4385_v36 = vpack.c.bf16 %v8791_v3, %v8791_v3  ;;  %3901 = vst.msk [vmem:[%s7308_s30 + $0x1e0] sm:$0xf] %vm3780_vm6, %v4378_v47  ;;  %3902 = vst.msk [vmem:[%s7308_s30 + $0x1e4] sm:$0xf] %vm3780_vm6, %v4379_v2 }
 0x73d   : > { %3903 = vst.msk [vmem:[%s7308_s30 + $0x1e8] sm:$0xf] %vm3780_vm6, %v4380_v54  ;;  %3904 = vst.msk [vmem:[%s7308_s30 + $0x1ec] sm:$0xf] %vm3780_vm6, %v4381_v50 }
 0x73e   : > { %3905 = vst.msk [vmem:[%s7308_s30 + $0x1f0] sm:$0xf] %vm3780_vm6, %v4382_v1  ;;  %3906 = vst.msk [vmem:[%s7308_s30 + $0x1f4] sm:$0xf] %vm3780_vm6, %v4383_v33 }
 0x73f   : > { %3907 = vst.msk [vmem:[%s7308_s30 + $0x1f8] sm:$0xf] %vm3780_vm6, %v4384_v42  ;;  %3908 = vst.msk [vmem:[%s7308_s30 + $0x1fc] sm:$0xf] %vm3780_vm6, %v4385_v36 }
 0x740 PF: > { %s16_s23 = sadd.s32 1, %s4891_s23   ;;  %s8792_s21 = smov %s4887_s22 }
 0x741   : > { %p13_p5 = scmp.ge.s32.totalorder %s16_s23, 4   ;;  %s8793_s22 = smov %s8795_s24 }
 0x743   :  { %15 = sbr.rel (!%p13_p5) target bundleno = 2 (0x2), region = 83 }

</bundles_post_ra>
